<compile_context>
chip_gen: v5e
topology: v5e:2x2
jax: 0.10.0
libtpu: 0.0.40
codegen_flags: <defaults>
</compile_context>

<pallas_src>
import math
import numpy as np
import jax
import jax.numpy as jnp
from jax.experimental import pallas as pl
from jax.experimental.pallas import tpu as pltpu

EPS = 1e-6
GROUPS = 32


def make_resnet_block_kernel(H, W, c_in, c_out):
    f32 = jnp.float32
    bf16 = jnp.bfloat16
    HW = H * W
    inv_hw = 1.0 / float(HW)
    gs_in = c_in // GROUPS
    gs_out = c_out // GROUPS
    TAPS = [(dy, dx) for dy in (-1, 0, 1) for dx in (-1, 0, 1)]  # t = (dy+1)*3+(dx+1)

    def kernel(x_ref, g1_ref, be1_ref, w1h_ref, w1l_ref, b1_ref,
               g2_ref, be2_ref, w2h_ref, w2l_ref, b2_ref, out_ref):
        x = x_ref[0].astype(f32)                                 # (HW, c_in)

        # Edge masks for the conv output shifts; computed once, shared by both
        # convs.  Each is a tiny (HW, 1) column broadcast over the lanes.
        row = jax.lax.broadcasted_iota(jnp.int32, (HW, 1), 0)
        col = row % W
        col_ok = {-1: (col >= 1).astype(f32), 0: None, 1: (col <= W - 2).astype(f32)}
        row_ok = {-1: (row >= W).astype(f32), 0: None, 1: (row < HW - W).astype(f32)}
        tap_mask = {}
        for (dy, dx) in TAPS:
            if (dy, dx) == (0, 0):
                continue
            m = row_ok[dy]
            if col_ok[dx] is not None:
                m = col_ok[dx] if m is None else m * col_ok[dx]
            tap_mask[(dy, dx)] = m

        def group_mean(s, gs, c):
            # Per-channel group mean of spatial sums `s` (1, c); divides by HW*gs.
            if gs == 1:
                return s * inv_hw
            sg = jnp.sum(s.reshape(GROUPS, gs), axis=-1, keepdims=True)
            sg = sg * (inv_hw / float(gs))
            return jnp.broadcast_to(sg, (GROUPS, gs)).reshape(1, c)

        def gn_swish(z, gs, gamma_ref, beta_ref):
            c = z.shape[-1]
            # One-pass variance (clamped) — fine at 2e-4; two independent sums
            # (fusing the two traversals is a minor v5e-only win).
            s1 = jnp.sum(z, axis=0, keepdims=True)               # (1, c)
            s2 = jnp.sum(z * z, axis=0, keepdims=True)
            mean = group_mean(s1, gs, c)
            ex2 = group_mean(s2, gs, c)
            var = jnp.maximum(ex2 - mean * mean, 0.0)
            inv = jax.lax.rsqrt(var + EPS)
            scale = inv * gamma_ref[...]
            shift = beta_ref[...] - mean * scale
            zn = z * scale + shift                               # implicit (1,c) bcast
            return zn * (1.0 / (1.0 + jnp.exp(-zn)))             # nonlinear(x)

        def conv3x3(z, wh_ref, wl_ref, b_ref):
            # z: (HW, ci) f32.  9 per-tap matmuls on the un-shifted input; the
            # dy/dx shifts go on the (HW, co) OUTPUTS via pltpu.roll + mask
            # (the masked/wrapped rows are exactly the conv's zero padding).
            # bf16x3 error compensation: x@w ~= xh@wh + xh@wl + xl@wh (f32 acc).
            zh = z.astype(bf16)
            zl = (z - zh.astype(f32)).astype(bf16)

            def tap_mm(t):
                return (jnp.dot(zh, wh_ref[t], preferred_element_type=f32)
                        + jnp.dot(zh, wl_ref[t], preferred_element_type=f32)
                        + jnp.dot(zl, wh_ref[t], preferred_element_type=f32))

            acc = tap_mm(4)                                      # center tap (0, 0)
            for t, (dy, dx) in enumerate(TAPS):
                if (dy, dx) == (0, 0):
                    continue
                y = tap_mm(t)
                shift = (-(dy * W + dx)) % HW                    # out[p] = y[p + dy*W + dx]
                acc = acc + pltpu.roll(y, shift=shift, axis=0) * tap_mask[(dy, dx)]
            return acc + b_ref[...]                              # bias AFTER the shifts

        h1 = gn_swish(x, gs_in, g1_ref, be1_ref)                 # norm1 + swish
        c1 = conv3x3(h1, w1h_ref, w1l_ref, b1_ref)               # conv1
        h2 = gn_swish(c1, gs_out, g2_ref, be2_ref)               # norm2 + swish
        # dropout: nn.Dropout is identity at eval time (no scaling applied)
        c2 = conv3x3(h2, w2h_ref, w2l_ref, b2_ref)               # conv2
        # shortcut: identity (see TODO at top)
        out_ref[0] = (c2 + x).astype(out_ref.dtype)

    return kernel


def _vmem_limit_bytes():
    """Per-generation VMEM budget: large on v5e/v6e (128 MiB), conservative otherwise."""
    try:
        kind = jax.devices()[0].device_kind.lower()
    except Exception:
        kind = ""
    if "v5" in kind or "v6" in kind or "trillium" in kind:
        return 112 * 1024 * 1024        # leave headroom below 128 MiB physical
    return 52 * 1024 * 1024             # safe on v7x's 64 MiB/TC and unknown chips


def _prepare_params(params, c_in, c_out):
    """Fold conv weights into per-tap (9, ci, co) matrices, split into bf16 hi/lo."""
    def fold_taps(w_oihw):
        ci, co = w_oihw.shape[1], w_oihw.shape[0]
        # (co, ci, ky, kx) -> (ky, kx, ci, co) -> (9, ci, co); t = ky*3 + kx.
        w = jnp.transpose(w_oihw, (2, 3, 1, 0)).reshape(9, ci, co).astype(jnp.float32)
        wh = w.astype(jnp.bfloat16)
        wl = (w - wh.astype(jnp.float32)).astype(jnp.bfloat16)
        return wh, wl

    w1h, w1l = fold_taps(params["w1"])
    w2h, w2l = fold_taps(params["w2"])
    return dict(
        g1=params["gamma1"].reshape(1, c_in).astype(jnp.float32),
        be1=params["beta1"].reshape(1, c_in).astype(jnp.float32),
        w1h=w1h, w1l=w1l, b1=params["b1"].reshape(1, c_out).astype(jnp.float32),
        g2=params["gamma2"].reshape(1, c_out).astype(jnp.float32),
        be2=params["beta2"].reshape(1, c_out).astype(jnp.float32),
        w2h=w2h, w2l=w2l, b2=params["b2"].reshape(1, c_out).astype(jnp.float32),
    )


def resnet_block_flat(x_flat, prepared, H, W):
    """Core entry point: x_flat is (N, H*W, C) with channels on the lane axis."""
    n, HW, c_in = x_flat.shape
    c_out = prepared["b1"].shape[-1]
    kernel = make_resnet_block_kernel(H, W, c_in, c_out)

    def bcast_spec(shape):
        zeros = (0,) * len(shape)
        return pl.BlockSpec(shape, lambda i, z=zeros: z)

    # NOTE(perf): the constant-index weight/bias/affine blocks are still
    #   double-buffered by the default pipeliner; single-buffering them
    #   (pipeline_mode=pl.Buffered(1)) would reclaim that VMEM.
    # NOTE(perf): for production VQGAN shapes on v7x (64 MiB VMEM/TC), tile
    #   spatially into H-strips with a 1-row halo and a 2-pass GroupNorm
    #   (stats pass + normalize/conv pass) instead of whole-sample blocks.
    # NOTE(perf): with c_out < 128 (toy configs) the lane axis is under-occupied
    #   and output stores are masked; production channels (128-512) are lane-dense.
    return pl.pallas_call(
        kernel,
        out_shape=jax.ShapeDtypeStruct((n, HW, c_out), x_flat.dtype),
        grid_spec=pltpu.PrefetchScalarGridSpec(
            num_scalar_prefetch=0,
            grid=(n,),                              # one grid step per sample
            in_specs=[
                pl.BlockSpec((1, HW, c_in), lambda i: (i, 0, 0)),
                bcast_spec((1, c_in)),              # gamma1
                bcast_spec((1, c_in)),              # beta1
                bcast_spec((9, c_in, c_out)),       # conv1 taps (bf16 hi)
                bcast_spec((9, c_in, c_out)),       # conv1 taps (bf16 lo)
                bcast_spec((1, c_out)),             # b1
                bcast_spec((1, c_out)),             # gamma2
                bcast_spec((1, c_out)),             # beta2
                bcast_spec((9, c_out, c_out)),      # conv2 taps (bf16 hi)
                bcast_spec((9, c_out, c_out)),      # conv2 taps (bf16 lo)
                bcast_spec((1, c_out)),             # b2
            ],
            out_specs=pl.BlockSpec((1, HW, c_out), lambda i: (i, 0, 0)),
        ),
        compiler_params=pltpu.CompilerParams(
            dimension_semantics=("parallel",),      # batch independent: 2 TCs on v7x
            vmem_limit_bytes=_vmem_limit_bytes(),
        ),
    )(x_flat, prepared["g1"], prepared["be1"], prepared["w1h"], prepared["w1l"],
      prepared["b1"], prepared["g2"], prepared["be2"], prepared["w2h"],
      prepared["w2l"], prepared["b2"])


def resnet_block(x_nchw, params):
    """NCHW wrapper matching the PyTorch module interface.

    For stacks of ResnetBlocks, convert to (N, H*W, C) once at the model
    boundary and call resnet_block_flat directly to avoid the per-block
    NCHW<->NHWC HBM passes.
    """
    n, c_in, H, W = x_nchw.shape
    c_out = params["w1"].shape[0]
    assert c_in % GROUPS == 0 and c_out % GROUPS == 0
    assert c_in == c_out, "literal forward only runs when in_channel == out_channel"
    x = jnp.transpose(x_nchw, (0, 2, 3, 1)).reshape(n, H * W, c_in)
    prepared = _prepare_params(params, c_in, c_out)
    out = resnet_block_flat(x, prepared, H, W)
    return jnp.transpose(out.reshape(n, H, W, c_out), (0, 3, 1, 2))   # -> NCHW


def reference(x, params):
    """Pure-JAX NCHW reference matching the PyTorch module (eval mode)."""
    def gn(z, gamma, beta):
        N, C, H, W = z.shape
        zg = z.reshape(N, GROUPS, -1)
        mean = jnp.mean(zg, axis=2, keepdims=True)
        var = jnp.var(zg, axis=2, keepdims=True)
        zn = ((zg - mean) / jnp.sqrt(var + EPS)).reshape(N, C, H, W)
        return zn * gamma[None, :, None, None] + beta[None, :, None, None]

    def conv(z, w, b):
        y = jax.lax.conv_general_dilated(
            z, w, window_strides=(1, 1), padding=((1, 1), (1, 1)),
            dimension_numbers=("NCHW", "OIHW", "NCHW"),
            precision=jax.lax.Precision.HIGHEST)
        return y + b[None, :, None, None]

    def nonlinear(z):
        return z * (1.0 / (1.0 + jnp.exp(-z)))

    h = gn(x, params["gamma1"], params["beta1"])
    h = nonlinear(h)
    h = conv(h, params["w1"], params["b1"])
    h = gn(h, params["gamma2"], params["beta2"])
    h = nonlinear(h)
    h = conv(h, params["w2"], params["b2"])
    return h + x


if __name__ == "__main__":
    # GroupNorm(num_groups=32) forces channels to be a multiple of 32.
    N, C, H, W = 2, 32, 8, 8
    key = jax.random.PRNGKey(0)
    ks = jax.random.split(key, 9)
    x = jax.random.normal(ks[0], (N, C, H, W), jnp.float32)
    wscale = 1.0 / math.sqrt(9 * C)
    params = dict(
        gamma1=1.0 + 0.05 * jax.random.normal(ks[1], (C,), jnp.float32),
        beta1=0.05 * jax.random.normal(ks[2], (C,), jnp.float32),
        w1=wscale * jax.random.normal(ks[3], (C, C, 3, 3), jnp.float32),
        b1=0.05 * jax.random.normal(ks[4], (C,), jnp.float32),
        gamma2=1.0 + 0.05 * jax.random.normal(ks[5], (C,), jnp.float32),
        beta2=0.05 * jax.random.normal(ks[6], (C,), jnp.float32),
        w2=wscale * jax.random.normal(ks[7], (C, C, 3, 3), jnp.float32),
        b2=0.05 * jax.random.normal(ks[8], (C,), jnp.float32),
    )

    out = resnet_block(x, params)
    out = jax.block_until_ready(out)
    ref = reference(x, params)

    assert out.shape == (N, C, H, W) and out.dtype == jnp.float32
    np.testing.assert_allclose(np.asarray(out), np.asarray(ref), atol=2e-4, rtol=2e-4)
    print("KERNEL_OK")
</pallas_src>

<mosaic_0001>
module attributes {stable_mosaic.version = 11 : i64} {
  func.func @kernel(%arg0: i32, %arg1: memref<1x64x32xf32, #tpu.memory_space<vmem>>, %arg2: memref<1x32xf32, #tpu.memory_space<vmem>>, %arg3: memref<1x32xf32, #tpu.memory_space<vmem>>, %arg4: memref<9x32x32xbf16, #tpu.memory_space<vmem>>, %arg5: memref<9x32x32xbf16, #tpu.memory_space<vmem>>, %arg6: memref<1x32xf32, #tpu.memory_space<vmem>>, %arg7: memref<1x32xf32, #tpu.memory_space<vmem>>, %arg8: memref<1x32xf32, #tpu.memory_space<vmem>>, %arg9: memref<9x32x32xbf16, #tpu.memory_space<vmem>>, %arg10: memref<9x32x32xbf16, #tpu.memory_space<vmem>>, %arg11: memref<1x32xf32, #tpu.memory_space<vmem>>, %arg12: memref<1x64x32xf32, #tpu.memory_space<vmem>>) attributes {dimension_semantics = [#tpu.dimension_semantics<parallel>], iteration_bounds = array<i64: 2>, scalar_prefetch = 0 : i64, scratch_operands = 0 : i64, tpu.core_type = #tpu.core_type<tc>, window_params = [{transform_indices = @transform_0, window_bounds = array<i64: 1, 64, 32>}, {pipeline_mode = #tpu.pipeline_mode<synchronous>, transform_indices = @transform_1, window_bounds = array<i64: 1, 32>}, {pipeline_mode = #tpu.pipeline_mode<synchronous>, transform_indices = @transform_2, window_bounds = array<i64: 1, 32>}, {pipeline_mode = #tpu.pipeline_mode<synchronous>, transform_indices = @transform_3, window_bounds = array<i64: 9, 32, 32>}, {pipeline_mode = #tpu.pipeline_mode<synchronous>, transform_indices = @transform_4, window_bounds = array<i64: 9, 32, 32>}, {pipeline_mode = #tpu.pipeline_mode<synchronous>, transform_indices = @transform_5, window_bounds = array<i64: 1, 32>}, {pipeline_mode = #tpu.pipeline_mode<synchronous>, transform_indices = @transform_6, window_bounds = array<i64: 1, 32>}, {pipeline_mode = #tpu.pipeline_mode<synchronous>, transform_indices = @transform_7, window_bounds = array<i64: 1, 32>}, {pipeline_mode = #tpu.pipeline_mode<synchronous>, transform_indices = @transform_8, window_bounds = array<i64: 9, 32, 32>}, {pipeline_mode = #tpu.pipeline_mode<synchronous>, transform_indices = @transform_9, window_bounds = array<i64: 9, 32, 32>}, {pipeline_mode = #tpu.pipeline_mode<synchronous>, transform_indices = @transform_10, window_bounds = array<i64: 1, 32>}, {transform_indices = @transform_11, window_bounds = array<i64: 1, 64, 32>}]} {
    %c0 = arith.constant 0 : index
    %c0_0 = arith.constant 0 : index
    %c0_1 = arith.constant 0 : index
    %0 = vector.load %arg1[%c0, %c0_0, %c0_1] : memref<1x64x32xf32, #tpu.memory_space<vmem>>, vector<1x64x32xf32>
    %1 = vector.shape_cast %0 : vector<1x64x32xf32> to vector<64x32xf32>
    %2 = tpu.iota {dimensions = array<i32: 0>} : vector<64x1xi32>
    %c8_i32 = arith.constant 8 : i32
    %c0_i32 = arith.constant 0 : i32
    %3 = arith.cmpi eq, %c8_i32, %c0_i32 : i32
    %c1_i32 = arith.constant 1 : i32
    %4 = arith.select %3, %c1_i32, %c8_i32 : i32
    %5 = vector.broadcast %4 : i32 to vector<64x1xi32>
    %6 = arith.remsi %2, %5 : vector<64x1xi32>
    %c0_i32_2 = arith.constant 0 : i32
    %7 = vector.broadcast %c0_i32_2 : i32 to vector<64x1xi32>
    %8 = arith.cmpi ne, %6, %7 : vector<64x1xi32>
    %c0_i32_3 = arith.constant 0 : i32
    %9 = vector.broadcast %c0_i32_3 : i32 to vector<64x1xi32>
    %10 = arith.cmpi slt, %6, %9 : vector<64x1xi32>
    %c0_i32_4 = arith.constant 0 : i32
    %11 = arith.cmpi slt, %4, %c0_i32_4 : i32
    %12 = vector.broadcast %11 : i1 to vector<64x1xi1>
    %13 = vector.broadcast %12 : vector<64x1xi1> to vector<64x1xi1>
    %14 = arith.xori %10, %13 : vector<64x1xi1>
    %15 = arith.andi %14, %8 : vector<64x1xi1>
    %16 = vector.broadcast %4 : i32 to vector<64x1xi32>
    %17 = arith.addi %6, %16 : vector<64x1xi32>
    %18 = arith.select %15, %17, %6 : vector<64x1xi1>, vector<64x1xi32>
    %c1_i32_5 = arith.constant 1 : i32
    %19 = vector.broadcast %c1_i32_5 : i32 to vector<64x1xi32>
    %20 = arith.cmpi sge, %18, %19 : vector<64x1xi32>
    %21 = arith.extui %20 : vector<64x1xi1> to vector<64x1xi32>
    %22 = arith.sitofp %21 : vector<64x1xi32> to vector<64x1xf32>
    %c6_i32 = arith.constant 6 : i32
    %23 = vector.broadcast %c6_i32 : i32 to vector<64x1xi32>
    %24 = arith.cmpi sle, %18, %23 : vector<64x1xi32>
    %25 = arith.extui %24 : vector<64x1xi1> to vector<64x1xi32>
    %26 = arith.sitofp %25 : vector<64x1xi32> to vector<64x1xf32>
    %c8_i32_6 = arith.constant 8 : i32
    %27 = vector.broadcast %c8_i32_6 : i32 to vector<64x1xi32>
    %28 = arith.cmpi sge, %2, %27 : vector<64x1xi32>
    %29 = arith.extui %28 : vector<64x1xi1> to vector<64x1xi32>
    %30 = arith.sitofp %29 : vector<64x1xi32> to vector<64x1xf32>
    %c56_i32 = arith.constant 56 : i32
    %31 = vector.broadcast %c56_i32 : i32 to vector<64x1xi32>
    %32 = arith.cmpi slt, %2, %31 : vector<64x1xi32>
    %33 = arith.extui %32 : vector<64x1xi1> to vector<64x1xi32>
    %34 = arith.sitofp %33 : vector<64x1xi32> to vector<64x1xf32>
    %35 = arith.mulf %30, %22 : vector<64x1xf32>
    %36 = arith.mulf %30, %26 : vector<64x1xf32>
    %37 = arith.mulf %34, %22 : vector<64x1xf32>
    %38 = arith.mulf %34, %26 : vector<64x1xf32>
    %cst = arith.constant dense<0.000000e+00> : vector<32xf32>
    %39 = vector.multi_reduction <add>, %1, %cst [0] : vector<64x32xf32> to vector<32xf32>
    %40 = vector.shape_cast %39 : vector<32xf32> to vector<1x32xf32>
    %41 = arith.mulf %1, %1 : vector<64x32xf32>
    %cst_7 = arith.constant dense<0.000000e+00> : vector<32xf32>
    %42 = vector.multi_reduction <add>, %41, %cst_7 [0] : vector<64x32xf32> to vector<32xf32>
    %43 = vector.shape_cast %42 : vector<32xf32> to vector<1x32xf32>
    %cst_8 = arith.constant 1.562500e-02 : f32
    %44 = vector.broadcast %cst_8 : f32 to vector<1x32xf32>
    %45 = arith.mulf %40, %44 : vector<1x32xf32>
    %cst_9 = arith.constant 1.562500e-02 : f32
    %46 = vector.broadcast %cst_9 : f32 to vector<1x32xf32>
    %47 = arith.mulf %43, %46 : vector<1x32xf32>
    %48 = arith.mulf %45, %45 : vector<1x32xf32>
    %49 = arith.subf %47, %48 : vector<1x32xf32>
    %cst_10 = arith.constant 0.000000e+00 : f32
    %50 = vector.broadcast %cst_10 : f32 to vector<1x32xf32>
    %51 = arith.maximumf %49, %50 : vector<1x32xf32>
    %cst_11 = arith.constant 9.99999997E-7 : f32
    %52 = vector.broadcast %cst_11 : f32 to vector<1x32xf32>
    %53 = arith.addf %51, %52 : vector<1x32xf32>
    %54 = math.rsqrt %53 : vector<1x32xf32>
    %c0_12 = arith.constant 0 : index
    %c0_13 = arith.constant 0 : index
    %55 = vector.load %arg2[%c0_12, %c0_13] : memref<1x32xf32, #tpu.memory_space<vmem>>, vector<1x32xf32>
    %56 = arith.mulf %54, %55 : vector<1x32xf32>
    %c0_14 = arith.constant 0 : index
    %c0_15 = arith.constant 0 : index
    %57 = vector.load %arg3[%c0_14, %c0_15] : memref<1x32xf32, #tpu.memory_space<vmem>>, vector<1x32xf32>
    %58 = arith.mulf %45, %56 : vector<1x32xf32>
    %59 = arith.subf %57, %58 : vector<1x32xf32>
    %60 = vector.broadcast %56 : vector<1x32xf32> to vector<64x32xf32>
    %61 = arith.mulf %1, %60 : vector<64x32xf32>
    %62 = vector.broadcast %59 : vector<1x32xf32> to vector<64x32xf32>
    %63 = arith.addf %61, %62 : vector<64x32xf32>
    %cst_16 = arith.constant 0.000000e+00 : f32
    %64 = vector.broadcast %cst_16 : f32 to vector<64x32xf32>
    %65 = arith.subf %64, %63 : vector<64x32xf32>
    %66 = math.exp %65 : vector<64x32xf32>
    %cst_17 = arith.constant 1.000000e+00 : f32
    %67 = vector.broadcast %cst_17 : f32 to vector<64x32xf32>
    %68 = arith.addf %67, %66 : vector<64x32xf32>
    %cst_18 = arith.constant 1.000000e+00 : f32
    %69 = vector.broadcast %cst_18 : f32 to vector<64x32xf32>
    %70 = arith.divf %69, %68 : vector<64x32xf32>
    %71 = arith.mulf %63, %70 : vector<64x32xf32>
    %72 = arith.truncf %71 : vector<64x32xf32> to vector<64x32xbf16>
    %73 = arith.extf %72 : vector<64x32xbf16> to vector<64x32xf32>
    %74 = arith.subf %71, %73 : vector<64x32xf32>
    %75 = arith.truncf %74 : vector<64x32xf32> to vector<64x32xbf16>
    %c4 = arith.constant 4 : index
    %c0_19 = arith.constant 0 : index
    %c0_20 = arith.constant 0 : index
    %76 = vector.load %arg4[%c4, %c0_19, %c0_20] : memref<9x32x32xbf16, #tpu.memory_space<vmem>>, vector<1x32x32xbf16>
    %77 = vector.shape_cast %76 : vector<1x32x32xbf16> to vector<32x32xbf16>
    %cst_21 = arith.constant dense<0.000000e+00> : vector<64x32xf32>
    %78 = tpu.matmul %72, %77, %cst_21 {dimension_numbers = #tpu.dot_dimension_numbers<[1], [0], [0], [1], [0, 0, 1, 1], [], []>} : vector<64x32xbf16>, vector<32x32xbf16>, vector<64x32xf32> -> vector<64x32xf32>
    %c4_22 = arith.constant 4 : index
    %c0_23 = arith.constant 0 : index
    %c0_24 = arith.constant 0 : index
    %79 = vector.load %arg5[%c4_22, %c0_23, %c0_24] : memref<9x32x32xbf16, #tpu.memory_space<vmem>>, vector<1x32x32xbf16>
    %80 = vector.shape_cast %79 : vector<1x32x32xbf16> to vector<32x32xbf16>
    %cst_25 = arith.constant dense<0.000000e+00> : vector<64x32xf32>
    %81 = tpu.matmul %72, %80, %cst_25 {dimension_numbers = #tpu.dot_dimension_numbers<[1], [0], [0], [1], [0, 0, 1, 1], [], []>} : vector<64x32xbf16>, vector<32x32xbf16>, vector<64x32xf32> -> vector<64x32xf32>
    %82 = arith.addf %78, %81 : vector<64x32xf32>
    %c4_26 = arith.constant 4 : index
    %c0_27 = arith.constant 0 : index
    %c0_28 = arith.constant 0 : index
    %83 = vector.load %arg4[%c4_26, %c0_27, %c0_28] : memref<9x32x32xbf16, #tpu.memory_space<vmem>>, vector<1x32x32xbf16>
    %84 = vector.shape_cast %83 : vector<1x32x32xbf16> to vector<32x32xbf16>
    %cst_29 = arith.constant dense<0.000000e+00> : vector<64x32xf32>
    %85 = tpu.matmul %75, %84, %cst_29 {dimension_numbers = #tpu.dot_dimension_numbers<[1], [0], [0], [1], [0, 0, 1, 1], [], []>} : vector<64x32xbf16>, vector<32x32xbf16>, vector<64x32xf32> -> vector<64x32xf32>
    %86 = arith.addf %82, %85 : vector<64x32xf32>
    %c0_30 = arith.constant 0 : index
    %c0_31 = arith.constant 0 : index
    %c0_32 = arith.constant 0 : index
    %87 = vector.load %arg4[%c0_30, %c0_31, %c0_32] : memref<9x32x32xbf16, #tpu.memory_space<vmem>>, vector<1x32x32xbf16>
    %88 = vector.shape_cast %87 : vector<1x32x32xbf16> to vector<32x32xbf16>
    %cst_33 = arith.constant dense<0.000000e+00> : vector<64x32xf32>
    %89 = tpu.matmul %72, %88, %cst_33 {dimension_numbers = #tpu.dot_dimension_numbers<[1], [0], [0], [1], [0, 0, 1, 1], [], []>} : vector<64x32xbf16>, vector<32x32xbf16>, vector<64x32xf32> -> vector<64x32xf32>
    %c0_34 = arith.constant 0 : index
    %c0_35 = arith.constant 0 : index
    %c0_36 = arith.constant 0 : index
    %90 = vector.load %arg5[%c0_34, %c0_35, %c0_36] : memref<9x32x32xbf16, #tpu.memory_space<vmem>>, vector<1x32x32xbf16>
    %91 = vector.shape_cast %90 : vector<1x32x32xbf16> to vector<32x32xbf16>
    %cst_37 = arith.constant dense<0.000000e+00> : vector<64x32xf32>
    %92 = tpu.matmul %72, %91, %cst_37 {dimension_numbers = #tpu.dot_dimension_numbers<[1], [0], [0], [1], [0, 0, 1, 1], [], []>} : vector<64x32xbf16>, vector<32x32xbf16>, vector<64x32xf32> -> vector<64x32xf32>
    %93 = arith.addf %89, %92 : vector<64x32xf32>
    %c0_38 = arith.constant 0 : index
    %c0_39 = arith.constant 0 : index
    %c0_40 = arith.constant 0 : index
    %94 = vector.load %arg4[%c0_38, %c0_39, %c0_40] : memref<9x32x32xbf16, #tpu.memory_space<vmem>>, vector<1x32x32xbf16>
    %95 = vector.shape_cast %94 : vector<1x32x32xbf16> to vector<32x32xbf16>
    %cst_41 = arith.constant dense<0.000000e+00> : vector<64x32xf32>
    %96 = tpu.matmul %75, %95, %cst_41 {dimension_numbers = #tpu.dot_dimension_numbers<[1], [0], [0], [1], [0, 0, 1, 1], [], []>} : vector<64x32xbf16>, vector<32x32xbf16>, vector<64x32xf32> -> vector<64x32xf32>
    %97 = arith.addf %93, %96 : vector<64x32xf32>
    %c9_i32 = arith.constant 9 : i32
    %98 = tpu.dynamic_rotate %97 by %c9_i32 dim 0 : vector<64x32xf32>, i32 -> vector<64x32xf32>
    %99 = vector.broadcast %35 : vector<64x1xf32> to vector<64x32xf32>
    %100 = arith.mulf %98, %99 : vector<64x32xf32>
    %101 = arith.addf %86, %100 : vector<64x32xf32>
    %c1 = arith.constant 1 : index
    %c0_42 = arith.constant 0 : index
    %c0_43 = arith.constant 0 : index
    %102 = vector.load %arg4[%c1, %c0_42, %c0_43] : memref<9x32x32xbf16, #tpu.memory_space<vmem>>, vector<1x32x32xbf16>
    %103 = vector.shape_cast %102 : vector<1x32x32xbf16> to vector<32x32xbf16>
    %cst_44 = arith.constant dense<0.000000e+00> : vector<64x32xf32>
    %104 = tpu.matmul %72, %103, %cst_44 {dimension_numbers = #tpu.dot_dimension_numbers<[1], [0], [0], [1], [0, 0, 1, 1], [], []>} : vector<64x32xbf16>, vector<32x32xbf16>, vector<64x32xf32> -> vector<64x32xf32>
    %c1_45 = arith.constant 1 : index
    %c0_46 = arith.constant 0 : index
    %c0_47 = arith.constant 0 : index
    %105 = vector.load %arg5[%c1_45, %c0_46, %c0_47] : memref<9x32x32xbf16, #tpu.memory_space<vmem>>, vector<1x32x32xbf16>
    %106 = vector.shape_cast %105 : vector<1x32x32xbf16> to vector<32x32xbf16>
    %cst_48 = arith.constant dense<0.000000e+00> : vector<64x32xf32>
    %107 = tpu.matmul %72, %106, %cst_48 {dimension_numbers = #tpu.dot_dimension_numbers<[1], [0], [0], [1], [0, 0, 1, 1], [], []>} : vector<64x32xbf16>, vector<32x32xbf16>, vector<64x32xf32> -> vector<64x32xf32>
    %108 = arith.addf %104, %107 : vector<64x32xf32>
    %c1_49 = arith.constant 1 : index
    %c0_50 = arith.constant 0 : index
    %c0_51 = arith.constant 0 : index
    %109 = vector.load %arg4[%c1_49, %c0_50, %c0_51] : memref<9x32x32xbf16, #tpu.memory_space<vmem>>, vector<1x32x32xbf16>
    %110 = vector.shape_cast %109 : vector<1x32x32xbf16> to vector<32x32xbf16>
    %cst_52 = arith.constant dense<0.000000e+00> : vector<64x32xf32>
    %111 = tpu.matmul %75, %110, %cst_52 {dimension_numbers = #tpu.dot_dimension_numbers<[1], [0], [0], [1], [0, 0, 1, 1], [], []>} : vector<64x32xbf16>, vector<32x32xbf16>, vector<64x32xf32> -> vector<64x32xf32>
    %112 = arith.addf %108, %111 : vector<64x32xf32>
    %c8_i32_53 = arith.constant 8 : i32
    %113 = tpu.dynamic_rotate %112 by %c8_i32_53 dim 0 : vector<64x32xf32>, i32 -> vector<64x32xf32>
    %114 = vector.broadcast %30 : vector<64x1xf32> to vector<64x32xf32>
    %115 = arith.mulf %113, %114 : vector<64x32xf32>
    %116 = arith.addf %101, %115 : vector<64x32xf32>
    %c2 = arith.constant 2 : index
    %c0_54 = arith.constant 0 : index
    %c0_55 = arith.constant 0 : index
    %117 = vector.load %arg4[%c2, %c0_54, %c0_55] : memref<9x32x32xbf16, #tpu.memory_space<vmem>>, vector<1x32x32xbf16>
    %118 = vector.shape_cast %117 : vector<1x32x32xbf16> to vector<32x32xbf16>
    %cst_56 = arith.constant dense<0.000000e+00> : vector<64x32xf32>
    %119 = tpu.matmul %72, %118, %cst_56 {dimension_numbers = #tpu.dot_dimension_numbers<[1], [0], [0], [1], [0, 0, 1, 1], [], []>} : vector<64x32xbf16>, vector<32x32xbf16>, vector<64x32xf32> -> vector<64x32xf32>
    %c2_57 = arith.constant 2 : index
    %c0_58 = arith.constant 0 : index
    %c0_59 = arith.constant 0 : index
    %120 = vector.load %arg5[%c2_57, %c0_58, %c0_59] : memref<9x32x32xbf16, #tpu.memory_space<vmem>>, vector<1x32x32xbf16>
    %121 = vector.shape_cast %120 : vector<1x32x32xbf16> to vector<32x32xbf16>
    %cst_60 = arith.constant dense<0.000000e+00> : vector<64x32xf32>
    %122 = tpu.matmul %72, %121, %cst_60 {dimension_numbers = #tpu.dot_dimension_numbers<[1], [0], [0], [1], [0, 0, 1, 1], [], []>} : vector<64x32xbf16>, vector<32x32xbf16>, vector<64x32xf32> -> vector<64x32xf32>
    %123 = arith.addf %119, %122 : vector<64x32xf32>
    %c2_61 = arith.constant 2 : index
    %c0_62 = arith.constant 0 : index
    %c0_63 = arith.constant 0 : index
    %124 = vector.load %arg4[%c2_61, %c0_62, %c0_63] : memref<9x32x32xbf16, #tpu.memory_space<vmem>>, vector<1x32x32xbf16>
    %125 = vector.shape_cast %124 : vector<1x32x32xbf16> to vector<32x32xbf16>
    %cst_64 = arith.constant dense<0.000000e+00> : vector<64x32xf32>
    %126 = tpu.matmul %75, %125, %cst_64 {dimension_numbers = #tpu.dot_dimension_numbers<[1], [0], [0], [1], [0, 0, 1, 1], [], []>} : vector<64x32xbf16>, vector<32x32xbf16>, vector<64x32xf32> -> vector<64x32xf32>
    %127 = arith.addf %123, %126 : vector<64x32xf32>
    %c7_i32 = arith.constant 7 : i32
    %128 = tpu.dynamic_rotate %127 by %c7_i32 dim 0 : vector<64x32xf32>, i32 -> vector<64x32xf32>
    %129 = vector.broadcast %36 : vector<64x1xf32> to vector<64x32xf32>
    %130 = arith.mulf %128, %129 : vector<64x32xf32>
    %131 = arith.addf %116, %130 : vector<64x32xf32>
    %c3 = arith.constant 3 : index
    %c0_65 = arith.constant 0 : index
    %c0_66 = arith.constant 0 : index
    %132 = vector.load %arg4[%c3, %c0_65, %c0_66] : memref<9x32x32xbf16, #tpu.memory_space<vmem>>, vector<1x32x32xbf16>
    %133 = vector.shape_cast %132 : vector<1x32x32xbf16> to vector<32x32xbf16>
    %cst_67 = arith.constant dense<0.000000e+00> : vector<64x32xf32>
    %134 = tpu.matmul %72, %133, %cst_67 {dimension_numbers = #tpu.dot_dimension_numbers<[1], [0], [0], [1], [0, 0, 1, 1], [], []>} : vector<64x32xbf16>, vector<32x32xbf16>, vector<64x32xf32> -> vector<64x32xf32>
    %c3_68 = arith.constant 3 : index
    %c0_69 = arith.constant 0 : index
    %c0_70 = arith.constant 0 : index
    %135 = vector.load %arg5[%c3_68, %c0_69, %c0_70] : memref<9x32x32xbf16, #tpu.memory_space<vmem>>, vector<1x32x32xbf16>
    %136 = vector.shape_cast %135 : vector<1x32x32xbf16> to vector<32x32xbf16>
    %cst_71 = arith.constant dense<0.000000e+00> : vector<64x32xf32>
    %137 = tpu.matmul %72, %136, %cst_71 {dimension_numbers = #tpu.dot_dimension_numbers<[1], [0], [0], [1], [0, 0, 1, 1], [], []>} : vector<64x32xbf16>, vector<32x32xbf16>, vector<64x32xf32> -> vector<64x32xf32>
    %138 = arith.addf %134, %137 : vector<64x32xf32>
    %c3_72 = arith.constant 3 : index
    %c0_73 = arith.constant 0 : index
    %c0_74 = arith.constant 0 : index
    %139 = vector.load %arg4[%c3_72, %c0_73, %c0_74] : memref<9x32x32xbf16, #tpu.memory_space<vmem>>, vector<1x32x32xbf16>
    %140 = vector.shape_cast %139 : vector<1x32x32xbf16> to vector<32x32xbf16>
    %cst_75 = arith.constant dense<0.000000e+00> : vector<64x32xf32>
    %141 = tpu.matmul %75, %140, %cst_75 {dimension_numbers = #tpu.dot_dimension_numbers<[1], [0], [0], [1], [0, 0, 1, 1], [], []>} : vector<64x32xbf16>, vector<32x32xbf16>, vector<64x32xf32> -> vector<64x32xf32>
    %142 = arith.addf %138, %141 : vector<64x32xf32>
    %c1_i32_76 = arith.constant 1 : i32
    %143 = tpu.dynamic_rotate %142 by %c1_i32_76 dim 0 : vector<64x32xf32>, i32 -> vector<64x32xf32>
    %144 = vector.broadcast %22 : vector<64x1xf32> to vector<64x32xf32>
    %145 = arith.mulf %143, %144 : vector<64x32xf32>
    %146 = arith.addf %131, %145 : vector<64x32xf32>
    %c5 = arith.constant 5 : index
    %c0_77 = arith.constant 0 : index
    %c0_78 = arith.constant 0 : index
    %147 = vector.load %arg4[%c5, %c0_77, %c0_78] : memref<9x32x32xbf16, #tpu.memory_space<vmem>>, vector<1x32x32xbf16>
    %148 = vector.shape_cast %147 : vector<1x32x32xbf16> to vector<32x32xbf16>
    %cst_79 = arith.constant dense<0.000000e+00> : vector<64x32xf32>
    %149 = tpu.matmul %72, %148, %cst_79 {dimension_numbers = #tpu.dot_dimension_numbers<[1], [0], [0], [1], [0, 0, 1, 1], [], []>} : vector<64x32xbf16>, vector<32x32xbf16>, vector<64x32xf32> -> vector<64x32xf32>
    %c5_80 = arith.constant 5 : index
    %c0_81 = arith.constant 0 : index
    %c0_82 = arith.constant 0 : index
    %150 = vector.load %arg5[%c5_80, %c0_81, %c0_82] : memref<9x32x32xbf16, #tpu.memory_space<vmem>>, vector<1x32x32xbf16>
    %151 = vector.shape_cast %150 : vector<1x32x32xbf16> to vector<32x32xbf16>
    %cst_83 = arith.constant dense<0.000000e+00> : vector<64x32xf32>
    %152 = tpu.matmul %72, %151, %cst_83 {dimension_numbers = #tpu.dot_dimension_numbers<[1], [0], [0], [1], [0, 0, 1, 1], [], []>} : vector<64x32xbf16>, vector<32x32xbf16>, vector<64x32xf32> -> vector<64x32xf32>
    %153 = arith.addf %149, %152 : vector<64x32xf32>
    %c5_84 = arith.constant 5 : index
    %c0_85 = arith.constant 0 : index
    %c0_86 = arith.constant 0 : index
    %154 = vector.load %arg4[%c5_84, %c0_85, %c0_86] : memref<9x32x32xbf16, #tpu.memory_space<vmem>>, vector<1x32x32xbf16>
    %155 = vector.shape_cast %154 : vector<1x32x32xbf16> to vector<32x32xbf16>
    %cst_87 = arith.constant dense<0.000000e+00> : vector<64x32xf32>
    %156 = tpu.matmul %75, %155, %cst_87 {dimension_numbers = #tpu.dot_dimension_numbers<[1], [0], [0], [1], [0, 0, 1, 1], [], []>} : vector<64x32xbf16>, vector<32x32xbf16>, vector<64x32xf32> -> vector<64x32xf32>
    %157 = arith.addf %153, %156 : vector<64x32xf32>
    %c63_i32 = arith.constant 63 : i32
    %158 = tpu.dynamic_rotate %157 by %c63_i32 dim 0 : vector<64x32xf32>, i32 -> vector<64x32xf32>
    %159 = vector.broadcast %26 : vector<64x1xf32> to vector<64x32xf32>
    %160 = arith.mulf %158, %159 : vector<64x32xf32>
    %161 = arith.addf %146, %160 : vector<64x32xf32>
    %c6 = arith.constant 6 : index
    %c0_88 = arith.constant 0 : index
    %c0_89 = arith.constant 0 : index
    %162 = vector.load %arg4[%c6, %c0_88, %c0_89] : memref<9x32x32xbf16, #tpu.memory_space<vmem>>, vector<1x32x32xbf16>
    %163 = vector.shape_cast %162 : vector<1x32x32xbf16> to vector<32x32xbf16>
    %cst_90 = arith.constant dense<0.000000e+00> : vector<64x32xf32>
    %164 = tpu.matmul %72, %163, %cst_90 {dimension_numbers = #tpu.dot_dimension_numbers<[1], [0], [0], [1], [0, 0, 1, 1], [], []>} : vector<64x32xbf16>, vector<32x32xbf16>, vector<64x32xf32> -> vector<64x32xf32>
    %c6_91 = arith.constant 6 : index
    %c0_92 = arith.constant 0 : index
    %c0_93 = arith.constant 0 : index
    %165 = vector.load %arg5[%c6_91, %c0_92, %c0_93] : memref<9x32x32xbf16, #tpu.memory_space<vmem>>, vector<1x32x32xbf16>
    %166 = vector.shape_cast %165 : vector<1x32x32xbf16> to vector<32x32xbf16>
    %cst_94 = arith.constant dense<0.000000e+00> : vector<64x32xf32>
    %167 = tpu.matmul %72, %166, %cst_94 {dimension_numbers = #tpu.dot_dimension_numbers<[1], [0], [0], [1], [0, 0, 1, 1], [], []>} : vector<64x32xbf16>, vector<32x32xbf16>, vector<64x32xf32> -> vector<64x32xf32>
    %168 = arith.addf %164, %167 : vector<64x32xf32>
    %c6_95 = arith.constant 6 : index
    %c0_96 = arith.constant 0 : index
    %c0_97 = arith.constant 0 : index
    %169 = vector.load %arg4[%c6_95, %c0_96, %c0_97] : memref<9x32x32xbf16, #tpu.memory_space<vmem>>, vector<1x32x32xbf16>
    %170 = vector.shape_cast %169 : vector<1x32x32xbf16> to vector<32x32xbf16>
    %cst_98 = arith.constant dense<0.000000e+00> : vector<64x32xf32>
    %171 = tpu.matmul %75, %170, %cst_98 {dimension_numbers = #tpu.dot_dimension_numbers<[1], [0], [0], [1], [0, 0, 1, 1], [], []>} : vector<64x32xbf16>, vector<32x32xbf16>, vector<64x32xf32> -> vector<64x32xf32>
    %172 = arith.addf %168, %171 : vector<64x32xf32>
    %c57_i32 = arith.constant 57 : i32
    %173 = tpu.dynamic_rotate %172 by %c57_i32 dim 0 : vector<64x32xf32>, i32 -> vector<64x32xf32>
    %174 = vector.broadcast %37 : vector<64x1xf32> to vector<64x32xf32>
    %175 = arith.mulf %173, %174 : vector<64x32xf32>
    %176 = arith.addf %161, %175 : vector<64x32xf32>
    %c7 = arith.constant 7 : index
    %c0_99 = arith.constant 0 : index
    %c0_100 = arith.constant 0 : index
    %177 = vector.load %arg4[%c7, %c0_99, %c0_100] : memref<9x32x32xbf16, #tpu.memory_space<vmem>>, vector<1x32x32xbf16>
    %178 = vector.shape_cast %177 : vector<1x32x32xbf16> to vector<32x32xbf16>
    %cst_101 = arith.constant dense<0.000000e+00> : vector<64x32xf32>
    %179 = tpu.matmul %72, %178, %cst_101 {dimension_numbers = #tpu.dot_dimension_numbers<[1], [0], [0], [1], [0, 0, 1, 1], [], []>} : vector<64x32xbf16>, vector<32x32xbf16>, vector<64x32xf32> -> vector<64x32xf32>
    %c7_102 = arith.constant 7 : index
    %c0_103 = arith.constant 0 : index
    %c0_104 = arith.constant 0 : index
    %180 = vector.load %arg5[%c7_102, %c0_103, %c0_104] : memref<9x32x32xbf16, #tpu.memory_space<vmem>>, vector<1x32x32xbf16>
    %181 = vector.shape_cast %180 : vector<1x32x32xbf16> to vector<32x32xbf16>
    %cst_105 = arith.constant dense<0.000000e+00> : vector<64x32xf32>
    %182 = tpu.matmul %72, %181, %cst_105 {dimension_numbers = #tpu.dot_dimension_numbers<[1], [0], [0], [1], [0, 0, 1, 1], [], []>} : vector<64x32xbf16>, vector<32x32xbf16>, vector<64x32xf32> -> vector<64x32xf32>
    %183 = arith.addf %179, %182 : vector<64x32xf32>
    %c7_106 = arith.constant 7 : index
    %c0_107 = arith.constant 0 : index
    %c0_108 = arith.constant 0 : index
    %184 = vector.load %arg4[%c7_106, %c0_107, %c0_108] : memref<9x32x32xbf16, #tpu.memory_space<vmem>>, vector<1x32x32xbf16>
    %185 = vector.shape_cast %184 : vector<1x32x32xbf16> to vector<32x32xbf16>
    %cst_109 = arith.constant dense<0.000000e+00> : vector<64x32xf32>
    %186 = tpu.matmul %75, %185, %cst_109 {dimension_numbers = #tpu.dot_dimension_numbers<[1], [0], [0], [1], [0, 0, 1, 1], [], []>} : vector<64x32xbf16>, vector<32x32xbf16>, vector<64x32xf32> -> vector<64x32xf32>
    %187 = arith.addf %183, %186 : vector<64x32xf32>
    %c56_i32_110 = arith.constant 56 : i32
    %188 = tpu.dynamic_rotate %187 by %c56_i32_110 dim 0 : vector<64x32xf32>, i32 -> vector<64x32xf32>
    %189 = vector.broadcast %34 : vector<64x1xf32> to vector<64x32xf32>
    %190 = arith.mulf %188, %189 : vector<64x32xf32>
    %191 = arith.addf %176, %190 : vector<64x32xf32>
    %c8 = arith.constant 8 : index
    %c0_111 = arith.constant 0 : index
    %c0_112 = arith.constant 0 : index
    %192 = vector.load %arg4[%c8, %c0_111, %c0_112] : memref<9x32x32xbf16, #tpu.memory_space<vmem>>, vector<1x32x32xbf16>
    %193 = vector.shape_cast %192 : vector<1x32x32xbf16> to vector<32x32xbf16>
    %cst_113 = arith.constant dense<0.000000e+00> : vector<64x32xf32>
    %194 = tpu.matmul %72, %193, %cst_113 {dimension_numbers = #tpu.dot_dimension_numbers<[1], [0], [0], [1], [0, 0, 1, 1], [], []>} : vector<64x32xbf16>, vector<32x32xbf16>, vector<64x32xf32> -> vector<64x32xf32>
    %c8_114 = arith.constant 8 : index
    %c0_115 = arith.constant 0 : index
    %c0_116 = arith.constant 0 : index
    %195 = vector.load %arg5[%c8_114, %c0_115, %c0_116] : memref<9x32x32xbf16, #tpu.memory_space<vmem>>, vector<1x32x32xbf16>
    %196 = vector.shape_cast %195 : vector<1x32x32xbf16> to vector<32x32xbf16>
    %cst_117 = arith.constant dense<0.000000e+00> : vector<64x32xf32>
    %197 = tpu.matmul %72, %196, %cst_117 {dimension_numbers = #tpu.dot_dimension_numbers<[1], [0], [0], [1], [0, 0, 1, 1], [], []>} : vector<64x32xbf16>, vector<32x32xbf16>, vector<64x32xf32> -> vector<64x32xf32>
    %198 = arith.addf %194, %197 : vector<64x32xf32>
    %c8_118 = arith.constant 8 : index
    %c0_119 = arith.constant 0 : index
    %c0_120 = arith.constant 0 : index
    %199 = vector.load %arg4[%c8_118, %c0_119, %c0_120] : memref<9x32x32xbf16, #tpu.memory_space<vmem>>, vector<1x32x32xbf16>
    %200 = vector.shape_cast %199 : vector<1x32x32xbf16> to vector<32x32xbf16>
    %cst_121 = arith.constant dense<0.000000e+00> : vector<64x32xf32>
    %201 = tpu.matmul %75, %200, %cst_121 {dimension_numbers = #tpu.dot_dimension_numbers<[1], [0], [0], [1], [0, 0, 1, 1], [], []>} : vector<64x32xbf16>, vector<32x32xbf16>, vector<64x32xf32> -> vector<64x32xf32>
    %202 = arith.addf %198, %201 : vector<64x32xf32>
    %c55_i32 = arith.constant 55 : i32
    %203 = tpu.dynamic_rotate %202 by %c55_i32 dim 0 : vector<64x32xf32>, i32 -> vector<64x32xf32>
    %204 = vector.broadcast %38 : vector<64x1xf32> to vector<64x32xf32>
    %205 = arith.mulf %203, %204 : vector<64x32xf32>
    %206 = arith.addf %191, %205 : vector<64x32xf32>
    %c0_122 = arith.constant 0 : index
    %c0_123 = arith.constant 0 : index
    %207 = vector.load %arg6[%c0_122, %c0_123] : memref<1x32xf32, #tpu.memory_space<vmem>>, vector<1x32xf32>
    %208 = vector.broadcast %207 : vector<1x32xf32> to vector<64x32xf32>
    %209 = arith.addf %206, %208 : vector<64x32xf32>
    %cst_124 = arith.constant dense<0.000000e+00> : vector<32xf32>
    %210 = vector.multi_reduction <add>, %209, %cst_124 [0] : vector<64x32xf32> to vector<32xf32>
    %211 = vector.shape_cast %210 : vector<32xf32> to vector<1x32xf32>
    %212 = arith.mulf %209, %209 : vector<64x32xf32>
    %cst_125 = arith.constant dense<0.000000e+00> : vector<32xf32>
    %213 = vector.multi_reduction <add>, %212, %cst_125 [0] : vector<64x32xf32> to vector<32xf32>
    %214 = vector.shape_cast %213 : vector<32xf32> to vector<1x32xf32>
    %cst_126 = arith.constant 1.562500e-02 : f32
    %215 = vector.broadcast %cst_126 : f32 to vector<1x32xf32>
    %216 = arith.mulf %211, %215 : vector<1x32xf32>
    %cst_127 = arith.constant 1.562500e-02 : f32
    %217 = vector.broadcast %cst_127 : f32 to vector<1x32xf32>
    %218 = arith.mulf %214, %217 : vector<1x32xf32>
    %219 = arith.mulf %216, %216 : vector<1x32xf32>
    %220 = arith.subf %218, %219 : vector<1x32xf32>
    %cst_128 = arith.constant 0.000000e+00 : f32
    %221 = vector.broadcast %cst_128 : f32 to vector<1x32xf32>
    %222 = arith.maximumf %220, %221 : vector<1x32xf32>
    %cst_129 = arith.constant 9.99999997E-7 : f32
    %223 = vector.broadcast %cst_129 : f32 to vector<1x32xf32>
    %224 = arith.addf %222, %223 : vector<1x32xf32>
    %225 = math.rsqrt %224 : vector<1x32xf32>
    %c0_130 = arith.constant 0 : index
    %c0_131 = arith.constant 0 : index
    %226 = vector.load %arg7[%c0_130, %c0_131] : memref<1x32xf32, #tpu.memory_space<vmem>>, vector<1x32xf32>
    %227 = arith.mulf %225, %226 : vector<1x32xf32>
    %c0_132 = arith.constant 0 : index
    %c0_133 = arith.constant 0 : index
    %228 = vector.load %arg8[%c0_132, %c0_133] : memref<1x32xf32, #tpu.memory_space<vmem>>, vector<1x32xf32>
    %229 = arith.mulf %216, %227 : vector<1x32xf32>
    %230 = arith.subf %228, %229 : vector<1x32xf32>
    %231 = vector.broadcast %227 : vector<1x32xf32> to vector<64x32xf32>
    %232 = arith.mulf %209, %231 : vector<64x32xf32>
    %233 = vector.broadcast %230 : vector<1x32xf32> to vector<64x32xf32>
    %234 = arith.addf %232, %233 : vector<64x32xf32>
    %cst_134 = arith.constant 0.000000e+00 : f32
    %235 = vector.broadcast %cst_134 : f32 to vector<64x32xf32>
    %236 = arith.subf %235, %234 : vector<64x32xf32>
    %237 = math.exp %236 : vector<64x32xf32>
    %cst_135 = arith.constant 1.000000e+00 : f32
    %238 = vector.broadcast %cst_135 : f32 to vector<64x32xf32>
    %239 = arith.addf %238, %237 : vector<64x32xf32>
    %cst_136 = arith.constant 1.000000e+00 : f32
    %240 = vector.broadcast %cst_136 : f32 to vector<64x32xf32>
    %241 = arith.divf %240, %239 : vector<64x32xf32>
    %242 = arith.mulf %234, %241 : vector<64x32xf32>
    %243 = arith.truncf %242 : vector<64x32xf32> to vector<64x32xbf16>
    %244 = arith.extf %243 : vector<64x32xbf16> to vector<64x32xf32>
    %245 = arith.subf %242, %244 : vector<64x32xf32>
    %246 = arith.truncf %245 : vector<64x32xf32> to vector<64x32xbf16>
    %c4_137 = arith.constant 4 : index
    %c0_138 = arith.constant 0 : index
    %c0_139 = arith.constant 0 : index
    %247 = vector.load %arg9[%c4_137, %c0_138, %c0_139] : memref<9x32x32xbf16, #tpu.memory_space<vmem>>, vector<1x32x32xbf16>
    %248 = vector.shape_cast %247 : vector<1x32x32xbf16> to vector<32x32xbf16>
    %cst_140 = arith.constant dense<0.000000e+00> : vector<64x32xf32>
    %249 = tpu.matmul %243, %248, %cst_140 {dimension_numbers = #tpu.dot_dimension_numbers<[1], [0], [0], [1], [0, 0, 1, 1], [], []>} : vector<64x32xbf16>, vector<32x32xbf16>, vector<64x32xf32> -> vector<64x32xf32>
    %c4_141 = arith.constant 4 : index
    %c0_142 = arith.constant 0 : index
    %c0_143 = arith.constant 0 : index
    %250 = vector.load %arg10[%c4_141, %c0_142, %c0_143] : memref<9x32x32xbf16, #tpu.memory_space<vmem>>, vector<1x32x32xbf16>
    %251 = vector.shape_cast %250 : vector<1x32x32xbf16> to vector<32x32xbf16>
    %cst_144 = arith.constant dense<0.000000e+00> : vector<64x32xf32>
    %252 = tpu.matmul %243, %251, %cst_144 {dimension_numbers = #tpu.dot_dimension_numbers<[1], [0], [0], [1], [0, 0, 1, 1], [], []>} : vector<64x32xbf16>, vector<32x32xbf16>, vector<64x32xf32> -> vector<64x32xf32>
    %253 = arith.addf %249, %252 : vector<64x32xf32>
    %c4_145 = arith.constant 4 : index
    %c0_146 = arith.constant 0 : index
    %c0_147 = arith.constant 0 : index
    %254 = vector.load %arg9[%c4_145, %c0_146, %c0_147] : memref<9x32x32xbf16, #tpu.memory_space<vmem>>, vector<1x32x32xbf16>
    %255 = vector.shape_cast %254 : vector<1x32x32xbf16> to vector<32x32xbf16>
    %cst_148 = arith.constant dense<0.000000e+00> : vector<64x32xf32>
    %256 = tpu.matmul %246, %255, %cst_148 {dimension_numbers = #tpu.dot_dimension_numbers<[1], [0], [0], [1], [0, 0, 1, 1], [], []>} : vector<64x32xbf16>, vector<32x32xbf16>, vector<64x32xf32> -> vector<64x32xf32>
    %257 = arith.addf %253, %256 : vector<64x32xf32>
    %c0_149 = arith.constant 0 : index
    %c0_150 = arith.constant 0 : index
    %c0_151 = arith.constant 0 : index
    %258 = vector.load %arg9[%c0_149, %c0_150, %c0_151] : memref<9x32x32xbf16, #tpu.memory_space<vmem>>, vector<1x32x32xbf16>
    %259 = vector.shape_cast %258 : vector<1x32x32xbf16> to vector<32x32xbf16>
    %cst_152 = arith.constant dense<0.000000e+00> : vector<64x32xf32>
    %260 = tpu.matmul %243, %259, %cst_152 {dimension_numbers = #tpu.dot_dimension_numbers<[1], [0], [0], [1], [0, 0, 1, 1], [], []>} : vector<64x32xbf16>, vector<32x32xbf16>, vector<64x32xf32> -> vector<64x32xf32>
    %c0_153 = arith.constant 0 : index
    %c0_154 = arith.constant 0 : index
    %c0_155 = arith.constant 0 : index
    %261 = vector.load %arg10[%c0_153, %c0_154, %c0_155] : memref<9x32x32xbf16, #tpu.memory_space<vmem>>, vector<1x32x32xbf16>
    %262 = vector.shape_cast %261 : vector<1x32x32xbf16> to vector<32x32xbf16>
    %cst_156 = arith.constant dense<0.000000e+00> : vector<64x32xf32>
    %263 = tpu.matmul %243, %262, %cst_156 {dimension_numbers = #tpu.dot_dimension_numbers<[1], [0], [0], [1], [0, 0, 1, 1], [], []>} : vector<64x32xbf16>, vector<32x32xbf16>, vector<64x32xf32> -> vector<64x32xf32>
    %264 = arith.addf %260, %263 : vector<64x32xf32>
    %c0_157 = arith.constant 0 : index
    %c0_158 = arith.constant 0 : index
    %c0_159 = arith.constant 0 : index
    %265 = vector.load %arg9[%c0_157, %c0_158, %c0_159] : memref<9x32x32xbf16, #tpu.memory_space<vmem>>, vector<1x32x32xbf16>
    %266 = vector.shape_cast %265 : vector<1x32x32xbf16> to vector<32x32xbf16>
    %cst_160 = arith.constant dense<0.000000e+00> : vector<64x32xf32>
    %267 = tpu.matmul %246, %266, %cst_160 {dimension_numbers = #tpu.dot_dimension_numbers<[1], [0], [0], [1], [0, 0, 1, 1], [], []>} : vector<64x32xbf16>, vector<32x32xbf16>, vector<64x32xf32> -> vector<64x32xf32>
    %268 = arith.addf %264, %267 : vector<64x32xf32>
    %c9_i32_161 = arith.constant 9 : i32
    %269 = tpu.dynamic_rotate %268 by %c9_i32_161 dim 0 : vector<64x32xf32>, i32 -> vector<64x32xf32>
    %270 = vector.broadcast %35 : vector<64x1xf32> to vector<64x32xf32>
    %271 = arith.mulf %269, %270 : vector<64x32xf32>
    %272 = arith.addf %257, %271 : vector<64x32xf32>
    %c1_162 = arith.constant 1 : index
    %c0_163 = arith.constant 0 : index
    %c0_164 = arith.constant 0 : index
    %273 = vector.load %arg9[%c1_162, %c0_163, %c0_164] : memref<9x32x32xbf16, #tpu.memory_space<vmem>>, vector<1x32x32xbf16>
    %274 = vector.shape_cast %273 : vector<1x32x32xbf16> to vector<32x32xbf16>
    %cst_165 = arith.constant dense<0.000000e+00> : vector<64x32xf32>
    %275 = tpu.matmul %243, %274, %cst_165 {dimension_numbers = #tpu.dot_dimension_numbers<[1], [0], [0], [1], [0, 0, 1, 1], [], []>} : vector<64x32xbf16>, vector<32x32xbf16>, vector<64x32xf32> -> vector<64x32xf32>
    %c1_166 = arith.constant 1 : index
    %c0_167 = arith.constant 0 : index
    %c0_168 = arith.constant 0 : index
    %276 = vector.load %arg10[%c1_166, %c0_167, %c0_168] : memref<9x32x32xbf16, #tpu.memory_space<vmem>>, vector<1x32x32xbf16>
    %277 = vector.shape_cast %276 : vector<1x32x32xbf16> to vector<32x32xbf16>
    %cst_169 = arith.constant dense<0.000000e+00> : vector<64x32xf32>
    %278 = tpu.matmul %243, %277, %cst_169 {dimension_numbers = #tpu.dot_dimension_numbers<[1], [0], [0], [1], [0, 0, 1, 1], [], []>} : vector<64x32xbf16>, vector<32x32xbf16>, vector<64x32xf32> -> vector<64x32xf32>
    %279 = arith.addf %275, %278 : vector<64x32xf32>
    %c1_170 = arith.constant 1 : index
    %c0_171 = arith.constant 0 : index
    %c0_172 = arith.constant 0 : index
    %280 = vector.load %arg9[%c1_170, %c0_171, %c0_172] : memref<9x32x32xbf16, #tpu.memory_space<vmem>>, vector<1x32x32xbf16>
    %281 = vector.shape_cast %280 : vector<1x32x32xbf16> to vector<32x32xbf16>
    %cst_173 = arith.constant dense<0.000000e+00> : vector<64x32xf32>
    %282 = tpu.matmul %246, %281, %cst_173 {dimension_numbers = #tpu.dot_dimension_numbers<[1], [0], [0], [1], [0, 0, 1, 1], [], []>} : vector<64x32xbf16>, vector<32x32xbf16>, vector<64x32xf32> -> vector<64x32xf32>
    %283 = arith.addf %279, %282 : vector<64x32xf32>
    %c8_i32_174 = arith.constant 8 : i32
    %284 = tpu.dynamic_rotate %283 by %c8_i32_174 dim 0 : vector<64x32xf32>, i32 -> vector<64x32xf32>
    %285 = vector.broadcast %30 : vector<64x1xf32> to vector<64x32xf32>
    %286 = arith.mulf %284, %285 : vector<64x32xf32>
    %287 = arith.addf %272, %286 : vector<64x32xf32>
    %c2_175 = arith.constant 2 : index
    %c0_176 = arith.constant 0 : index
    %c0_177 = arith.constant 0 : index
    %288 = vector.load %arg9[%c2_175, %c0_176, %c0_177] : memref<9x32x32xbf16, #tpu.memory_space<vmem>>, vector<1x32x32xbf16>
    %289 = vector.shape_cast %288 : vector<1x32x32xbf16> to vector<32x32xbf16>
    %cst_178 = arith.constant dense<0.000000e+00> : vector<64x32xf32>
    %290 = tpu.matmul %243, %289, %cst_178 {dimension_numbers = #tpu.dot_dimension_numbers<[1], [0], [0], [1], [0, 0, 1, 1], [], []>} : vector<64x32xbf16>, vector<32x32xbf16>, vector<64x32xf32> -> vector<64x32xf32>
    %c2_179 = arith.constant 2 : index
    %c0_180 = arith.constant 0 : index
    %c0_181 = arith.constant 0 : index
    %291 = vector.load %arg10[%c2_179, %c0_180, %c0_181] : memref<9x32x32xbf16, #tpu.memory_space<vmem>>, vector<1x32x32xbf16>
    %292 = vector.shape_cast %291 : vector<1x32x32xbf16> to vector<32x32xbf16>
    %cst_182 = arith.constant dense<0.000000e+00> : vector<64x32xf32>
    %293 = tpu.matmul %243, %292, %cst_182 {dimension_numbers = #tpu.dot_dimension_numbers<[1], [0], [0], [1], [0, 0, 1, 1], [], []>} : vector<64x32xbf16>, vector<32x32xbf16>, vector<64x32xf32> -> vector<64x32xf32>
    %294 = arith.addf %290, %293 : vector<64x32xf32>
    %c2_183 = arith.constant 2 : index
    %c0_184 = arith.constant 0 : index
    %c0_185 = arith.constant 0 : index
    %295 = vector.load %arg9[%c2_183, %c0_184, %c0_185] : memref<9x32x32xbf16, #tpu.memory_space<vmem>>, vector<1x32x32xbf16>
    %296 = vector.shape_cast %295 : vector<1x32x32xbf16> to vector<32x32xbf16>
    %cst_186 = arith.constant dense<0.000000e+00> : vector<64x32xf32>
    %297 = tpu.matmul %246, %296, %cst_186 {dimension_numbers = #tpu.dot_dimension_numbers<[1], [0], [0], [1], [0, 0, 1, 1], [], []>} : vector<64x32xbf16>, vector<32x32xbf16>, vector<64x32xf32> -> vector<64x32xf32>
    %298 = arith.addf %294, %297 : vector<64x32xf32>
    %c7_i32_187 = arith.constant 7 : i32
    %299 = tpu.dynamic_rotate %298 by %c7_i32_187 dim 0 : vector<64x32xf32>, i32 -> vector<64x32xf32>
    %300 = vector.broadcast %36 : vector<64x1xf32> to vector<64x32xf32>
    %301 = arith.mulf %299, %300 : vector<64x32xf32>
    %302 = arith.addf %287, %301 : vector<64x32xf32>
    %c3_188 = arith.constant 3 : index
    %c0_189 = arith.constant 0 : index
    %c0_190 = arith.constant 0 : index
    %303 = vector.load %arg9[%c3_188, %c0_189, %c0_190] : memref<9x32x32xbf16, #tpu.memory_space<vmem>>, vector<1x32x32xbf16>
    %304 = vector.shape_cast %303 : vector<1x32x32xbf16> to vector<32x32xbf16>
    %cst_191 = arith.constant dense<0.000000e+00> : vector<64x32xf32>
    %305 = tpu.matmul %243, %304, %cst_191 {dimension_numbers = #tpu.dot_dimension_numbers<[1], [0], [0], [1], [0, 0, 1, 1], [], []>} : vector<64x32xbf16>, vector<32x32xbf16>, vector<64x32xf32> -> vector<64x32xf32>
    %c3_192 = arith.constant 3 : index
    %c0_193 = arith.constant 0 : index
    %c0_194 = arith.constant 0 : index
    %306 = vector.load %arg10[%c3_192, %c0_193, %c0_194] : memref<9x32x32xbf16, #tpu.memory_space<vmem>>, vector<1x32x32xbf16>
    %307 = vector.shape_cast %306 : vector<1x32x32xbf16> to vector<32x32xbf16>
    %cst_195 = arith.constant dense<0.000000e+00> : vector<64x32xf32>
    %308 = tpu.matmul %243, %307, %cst_195 {dimension_numbers = #tpu.dot_dimension_numbers<[1], [0], [0], [1], [0, 0, 1, 1], [], []>} : vector<64x32xbf16>, vector<32x32xbf16>, vector<64x32xf32> -> vector<64x32xf32>
    %309 = arith.addf %305, %308 : vector<64x32xf32>
    %c3_196 = arith.constant 3 : index
    %c0_197 = arith.constant 0 : index
    %c0_198 = arith.constant 0 : index
    %310 = vector.load %arg9[%c3_196, %c0_197, %c0_198] : memref<9x32x32xbf16, #tpu.memory_space<vmem>>, vector<1x32x32xbf16>
    %311 = vector.shape_cast %310 : vector<1x32x32xbf16> to vector<32x32xbf16>
    %cst_199 = arith.constant dense<0.000000e+00> : vector<64x32xf32>
    %312 = tpu.matmul %246, %311, %cst_199 {dimension_numbers = #tpu.dot_dimension_numbers<[1], [0], [0], [1], [0, 0, 1, 1], [], []>} : vector<64x32xbf16>, vector<32x32xbf16>, vector<64x32xf32> -> vector<64x32xf32>
    %313 = arith.addf %309, %312 : vector<64x32xf32>
    %c1_i32_200 = arith.constant 1 : i32
    %314 = tpu.dynamic_rotate %313 by %c1_i32_200 dim 0 : vector<64x32xf32>, i32 -> vector<64x32xf32>
    %315 = vector.broadcast %22 : vector<64x1xf32> to vector<64x32xf32>
    %316 = arith.mulf %314, %315 : vector<64x32xf32>
    %317 = arith.addf %302, %316 : vector<64x32xf32>
    %c5_201 = arith.constant 5 : index
    %c0_202 = arith.constant 0 : index
    %c0_203 = arith.constant 0 : index
    %318 = vector.load %arg9[%c5_201, %c0_202, %c0_203] : memref<9x32x32xbf16, #tpu.memory_space<vmem>>, vector<1x32x32xbf16>
    %319 = vector.shape_cast %318 : vector<1x32x32xbf16> to vector<32x32xbf16>
    %cst_204 = arith.constant dense<0.000000e+00> : vector<64x32xf32>
    %320 = tpu.matmul %243, %319, %cst_204 {dimension_numbers = #tpu.dot_dimension_numbers<[1], [0], [0], [1], [0, 0, 1, 1], [], []>} : vector<64x32xbf16>, vector<32x32xbf16>, vector<64x32xf32> -> vector<64x32xf32>
    %c5_205 = arith.constant 5 : index
    %c0_206 = arith.constant 0 : index
    %c0_207 = arith.constant 0 : index
    %321 = vector.load %arg10[%c5_205, %c0_206, %c0_207] : memref<9x32x32xbf16, #tpu.memory_space<vmem>>, vector<1x32x32xbf16>
    %322 = vector.shape_cast %321 : vector<1x32x32xbf16> to vector<32x32xbf16>
    %cst_208 = arith.constant dense<0.000000e+00> : vector<64x32xf32>
    %323 = tpu.matmul %243, %322, %cst_208 {dimension_numbers = #tpu.dot_dimension_numbers<[1], [0], [0], [1], [0, 0, 1, 1], [], []>} : vector<64x32xbf16>, vector<32x32xbf16>, vector<64x32xf32> -> vector<64x32xf32>
    %324 = arith.addf %320, %323 : vector<64x32xf32>
    %c5_209 = arith.constant 5 : index
    %c0_210 = arith.constant 0 : index
    %c0_211 = arith.constant 0 : index
    %325 = vector.load %arg9[%c5_209, %c0_210, %c0_211] : memref<9x32x32xbf16, #tpu.memory_space<vmem>>, vector<1x32x32xbf16>
    %326 = vector.shape_cast %325 : vector<1x32x32xbf16> to vector<32x32xbf16>
    %cst_212 = arith.constant dense<0.000000e+00> : vector<64x32xf32>
    %327 = tpu.matmul %246, %326, %cst_212 {dimension_numbers = #tpu.dot_dimension_numbers<[1], [0], [0], [1], [0, 0, 1, 1], [], []>} : vector<64x32xbf16>, vector<32x32xbf16>, vector<64x32xf32> -> vector<64x32xf32>
    %328 = arith.addf %324, %327 : vector<64x32xf32>
    %c63_i32_213 = arith.constant 63 : i32
    %329 = tpu.dynamic_rotate %328 by %c63_i32_213 dim 0 : vector<64x32xf32>, i32 -> vector<64x32xf32>
    %330 = vector.broadcast %26 : vector<64x1xf32> to vector<64x32xf32>
    %331 = arith.mulf %329, %330 : vector<64x32xf32>
    %332 = arith.addf %317, %331 : vector<64x32xf32>
    %c6_214 = arith.constant 6 : index
    %c0_215 = arith.constant 0 : index
    %c0_216 = arith.constant 0 : index
    %333 = vector.load %arg9[%c6_214, %c0_215, %c0_216] : memref<9x32x32xbf16, #tpu.memory_space<vmem>>, vector<1x32x32xbf16>
    %334 = vector.shape_cast %333 : vector<1x32x32xbf16> to vector<32x32xbf16>
    %cst_217 = arith.constant dense<0.000000e+00> : vector<64x32xf32>
    %335 = tpu.matmul %243, %334, %cst_217 {dimension_numbers = #tpu.dot_dimension_numbers<[1], [0], [0], [1], [0, 0, 1, 1], [], []>} : vector<64x32xbf16>, vector<32x32xbf16>, vector<64x32xf32> -> vector<64x32xf32>
    %c6_218 = arith.constant 6 : index
    %c0_219 = arith.constant 0 : index
    %c0_220 = arith.constant 0 : index
    %336 = vector.load %arg10[%c6_218, %c0_219, %c0_220] : memref<9x32x32xbf16, #tpu.memory_space<vmem>>, vector<1x32x32xbf16>
    %337 = vector.shape_cast %336 : vector<1x32x32xbf16> to vector<32x32xbf16>
    %cst_221 = arith.constant dense<0.000000e+00> : vector<64x32xf32>
    %338 = tpu.matmul %243, %337, %cst_221 {dimension_numbers = #tpu.dot_dimension_numbers<[1], [0], [0], [1], [0, 0, 1, 1], [], []>} : vector<64x32xbf16>, vector<32x32xbf16>, vector<64x32xf32> -> vector<64x32xf32>
    %339 = arith.addf %335, %338 : vector<64x32xf32>
    %c6_222 = arith.constant 6 : index
    %c0_223 = arith.constant 0 : index
    %c0_224 = arith.constant 0 : index
    %340 = vector.load %arg9[%c6_222, %c0_223, %c0_224] : memref<9x32x32xbf16, #tpu.memory_space<vmem>>, vector<1x32x32xbf16>
    %341 = vector.shape_cast %340 : vector<1x32x32xbf16> to vector<32x32xbf16>
    %cst_225 = arith.constant dense<0.000000e+00> : vector<64x32xf32>
    %342 = tpu.matmul %246, %341, %cst_225 {dimension_numbers = #tpu.dot_dimension_numbers<[1], [0], [0], [1], [0, 0, 1, 1], [], []>} : vector<64x32xbf16>, vector<32x32xbf16>, vector<64x32xf32> -> vector<64x32xf32>
    %343 = arith.addf %339, %342 : vector<64x32xf32>
    %c57_i32_226 = arith.constant 57 : i32
    %344 = tpu.dynamic_rotate %343 by %c57_i32_226 dim 0 : vector<64x32xf32>, i32 -> vector<64x32xf32>
    %345 = vector.broadcast %37 : vector<64x1xf32> to vector<64x32xf32>
    %346 = arith.mulf %344, %345 : vector<64x32xf32>
    %347 = arith.addf %332, %346 : vector<64x32xf32>
    %c7_227 = arith.constant 7 : index
    %c0_228 = arith.constant 0 : index
    %c0_229 = arith.constant 0 : index
    %348 = vector.load %arg9[%c7_227, %c0_228, %c0_229] : memref<9x32x32xbf16, #tpu.memory_space<vmem>>, vector<1x32x32xbf16>
    %349 = vector.shape_cast %348 : vector<1x32x32xbf16> to vector<32x32xbf16>
    %cst_230 = arith.constant dense<0.000000e+00> : vector<64x32xf32>
    %350 = tpu.matmul %243, %349, %cst_230 {dimension_numbers = #tpu.dot_dimension_numbers<[1], [0], [0], [1], [0, 0, 1, 1], [], []>} : vector<64x32xbf16>, vector<32x32xbf16>, vector<64x32xf32> -> vector<64x32xf32>
    %c7_231 = arith.constant 7 : index
    %c0_232 = arith.constant 0 : index
    %c0_233 = arith.constant 0 : index
    %351 = vector.load %arg10[%c7_231, %c0_232, %c0_233] : memref<9x32x32xbf16, #tpu.memory_space<vmem>>, vector<1x32x32xbf16>
    %352 = vector.shape_cast %351 : vector<1x32x32xbf16> to vector<32x32xbf16>
    %cst_234 = arith.constant dense<0.000000e+00> : vector<64x32xf32>
    %353 = tpu.matmul %243, %352, %cst_234 {dimension_numbers = #tpu.dot_dimension_numbers<[1], [0], [0], [1], [0, 0, 1, 1], [], []>} : vector<64x32xbf16>, vector<32x32xbf16>, vector<64x32xf32> -> vector<64x32xf32>
    %354 = arith.addf %350, %353 : vector<64x32xf32>
    %c7_235 = arith.constant 7 : index
    %c0_236 = arith.constant 0 : index
    %c0_237 = arith.constant 0 : index
    %355 = vector.load %arg9[%c7_235, %c0_236, %c0_237] : memref<9x32x32xbf16, #tpu.memory_space<vmem>>, vector<1x32x32xbf16>
    %356 = vector.shape_cast %355 : vector<1x32x32xbf16> to vector<32x32xbf16>
    %cst_238 = arith.constant dense<0.000000e+00> : vector<64x32xf32>
    %357 = tpu.matmul %246, %356, %cst_238 {dimension_numbers = #tpu.dot_dimension_numbers<[1], [0], [0], [1], [0, 0, 1, 1], [], []>} : vector<64x32xbf16>, vector<32x32xbf16>, vector<64x32xf32> -> vector<64x32xf32>
    %358 = arith.addf %354, %357 : vector<64x32xf32>
    %c56_i32_239 = arith.constant 56 : i32
    %359 = tpu.dynamic_rotate %358 by %c56_i32_239 dim 0 : vector<64x32xf32>, i32 -> vector<64x32xf32>
    %360 = vector.broadcast %34 : vector<64x1xf32> to vector<64x32xf32>
    %361 = arith.mulf %359, %360 : vector<64x32xf32>
    %362 = arith.addf %347, %361 : vector<64x32xf32>
    %c8_240 = arith.constant 8 : index
    %c0_241 = arith.constant 0 : index
    %c0_242 = arith.constant 0 : index
    %363 = vector.load %arg9[%c8_240, %c0_241, %c0_242] : memref<9x32x32xbf16, #tpu.memory_space<vmem>>, vector<1x32x32xbf16>
    %364 = vector.shape_cast %363 : vector<1x32x32xbf16> to vector<32x32xbf16>
    %cst_243 = arith.constant dense<0.000000e+00> : vector<64x32xf32>
    %365 = tpu.matmul %243, %364, %cst_243 {dimension_numbers = #tpu.dot_dimension_numbers<[1], [0], [0], [1], [0, 0, 1, 1], [], []>} : vector<64x32xbf16>, vector<32x32xbf16>, vector<64x32xf32> -> vector<64x32xf32>
    %c8_244 = arith.constant 8 : index
    %c0_245 = arith.constant 0 : index
    %c0_246 = arith.constant 0 : index
    %366 = vector.load %arg10[%c8_244, %c0_245, %c0_246] : memref<9x32x32xbf16, #tpu.memory_space<vmem>>, vector<1x32x32xbf16>
    %367 = vector.shape_cast %366 : vector<1x32x32xbf16> to vector<32x32xbf16>
    %cst_247 = arith.constant dense<0.000000e+00> : vector<64x32xf32>
    %368 = tpu.matmul %243, %367, %cst_247 {dimension_numbers = #tpu.dot_dimension_numbers<[1], [0], [0], [1], [0, 0, 1, 1], [], []>} : vector<64x32xbf16>, vector<32x32xbf16>, vector<64x32xf32> -> vector<64x32xf32>
    %369 = arith.addf %365, %368 : vector<64x32xf32>
    %c8_248 = arith.constant 8 : index
    %c0_249 = arith.constant 0 : index
    %c0_250 = arith.constant 0 : index
    %370 = vector.load %arg9[%c8_248, %c0_249, %c0_250] : memref<9x32x32xbf16, #tpu.memory_space<vmem>>, vector<1x32x32xbf16>
    %371 = vector.shape_cast %370 : vector<1x32x32xbf16> to vector<32x32xbf16>
    %cst_251 = arith.constant dense<0.000000e+00> : vector<64x32xf32>
    %372 = tpu.matmul %246, %371, %cst_251 {dimension_numbers = #tpu.dot_dimension_numbers<[1], [0], [0], [1], [0, 0, 1, 1], [], []>} : vector<64x32xbf16>, vector<32x32xbf16>, vector<64x32xf32> -> vector<64x32xf32>
    %373 = arith.addf %369, %372 : vector<64x32xf32>
    %c55_i32_252 = arith.constant 55 : i32
    %374 = tpu.dynamic_rotate %373 by %c55_i32_252 dim 0 : vector<64x32xf32>, i32 -> vector<64x32xf32>
    %375 = vector.broadcast %38 : vector<64x1xf32> to vector<64x32xf32>
    %376 = arith.mulf %374, %375 : vector<64x32xf32>
    %377 = arith.addf %362, %376 : vector<64x32xf32>
    %c0_253 = arith.constant 0 : index
    %c0_254 = arith.constant 0 : index
    %378 = vector.load %arg11[%c0_253, %c0_254] : memref<1x32xf32, #tpu.memory_space<vmem>>, vector<1x32xf32>
    %379 = vector.broadcast %378 : vector<1x32xf32> to vector<64x32xf32>
    %380 = arith.addf %377, %379 : vector<64x32xf32>
    %381 = arith.addf %380, %1 : vector<64x32xf32>
    %c0_255 = arith.constant 0 : index
    %c0_256 = arith.constant 0 : index
    %c0_257 = arith.constant 0 : index
    %382 = vector.load %arg12[%c0_255, %c0_256, %c0_257] : memref<1x64x32xf32, #tpu.memory_space<vmem>>, vector<1x64x32xf32>
    %383 = vector.shape_cast %382 : vector<1x64x32xf32> to vector<64x32xf32>
    %384 = vector.shape_cast %381 : vector<64x32xf32> to vector<1x64x32xf32>
    tpu.vector_store %arg12[%c0_255, %c0_256, %c0_257], %384 {strides = array<i32>} : memref<1x64x32xf32, #tpu.memory_space<vmem>>, vector<1x64x32xf32>,
    return
  }
  func.func @transform_0(%arg0: i32) -> (i32, i32, i32) {
    %c0_i32 = arith.constant 0 : i32
    %c0_i32_0 = arith.constant 0 : i32
    %c0_i32_1 = arith.constant 0 : i32
    return %arg0, %c0_i32, %c0_i32_0 : i32, i32, i32
  }
  func.func @transform_1(%arg0: i32) -> (i32, i32) {
    %c0_i32 = arith.constant 0 : i32
    %c0_i32_0 = arith.constant 0 : i32
    %c0_i32_1 = arith.constant 0 : i32
    return %c0_i32, %c0_i32_0 : i32, i32
  }
  func.func @transform_2(%arg0: i32) -> (i32, i32) {
    %c0_i32 = arith.constant 0 : i32
    %c0_i32_0 = arith.constant 0 : i32
    %c0_i32_1 = arith.constant 0 : i32
    return %c0_i32, %c0_i32_0 : i32, i32
  }
  func.func @transform_3(%arg0: i32) -> (i32, i32, i32) {
    %c0_i32 = arith.constant 0 : i32
    %c0_i32_0 = arith.constant 0 : i32
    %c0_i32_1 = arith.constant 0 : i32
    %c0_i32_2 = arith.constant 0 : i32
    return %c0_i32, %c0_i32_0, %c0_i32_1 : i32, i32, i32
  }
  func.func @transform_4(%arg0: i32) -> (i32, i32, i32) {
    %c0_i32 = arith.constant 0 : i32
    %c0_i32_0 = arith.constant 0 : i32
    %c0_i32_1 = arith.constant 0 : i32
    %c0_i32_2 = arith.constant 0 : i32
    return %c0_i32, %c0_i32_0, %c0_i32_1 : i32, i32, i32
  }
  func.func @transform_5(%arg0: i32) -> (i32, i32) {
    %c0_i32 = arith.constant 0 : i32
    %c0_i32_0 = arith.constant 0 : i32
    %c0_i32_1 = arith.constant 0 : i32
    return %c0_i32, %c0_i32_0 : i32, i32
  }
  func.func @transform_6(%arg0: i32) -> (i32, i32) {
    %c0_i32 = arith.constant 0 : i32
    %c0_i32_0 = arith.constant 0 : i32
    %c0_i32_1 = arith.constant 0 : i32
    return %c0_i32, %c0_i32_0 : i32, i32
  }
  func.func @transform_7(%arg0: i32) -> (i32, i32) {
    %c0_i32 = arith.constant 0 : i32
    %c0_i32_0 = arith.constant 0 : i32
    %c0_i32_1 = arith.constant 0 : i32
    return %c0_i32, %c0_i32_0 : i32, i32
  }
  func.func @transform_8(%arg0: i32) -> (i32, i32, i32) {
    %c0_i32 = arith.constant 0 : i32
    %c0_i32_0 = arith.constant 0 : i32
    %c0_i32_1 = arith.constant 0 : i32
    %c0_i32_2 = arith.constant 0 : i32
    return %c0_i32, %c0_i32_0, %c0_i32_1 : i32, i32, i32
  }
  func.func @transform_9(%arg0: i32) -> (i32, i32, i32) {
    %c0_i32 = arith.constant 0 : i32
    %c0_i32_0 = arith.constant 0 : i32
    %c0_i32_1 = arith.constant 0 : i32
    %c0_i32_2 = arith.constant 0 : i32
    return %c0_i32, %c0_i32_0, %c0_i32_1 : i32, i32, i32
  }
  func.func @transform_10(%arg0: i32) -> (i32, i32) {
    %c0_i32 = arith.constant 0 : i32
    %c0_i32_0 = arith.constant 0 : i32
    %c0_i32_1 = arith.constant 0 : i32
    return %c0_i32, %c0_i32_0 : i32, i32
  }
  func.func @transform_11(%arg0: i32) -> (i32, i32, i32) {
    %c0_i32 = arith.constant 0 : i32
    %c0_i32_0 = arith.constant 0 : i32
    %c0_i32_1 = arith.constant 0 : i32
    return %arg0, %c0_i32, %c0_i32_0 : i32, i32, i32
  }
}

</mosaic_0001>

<bundles_post_ra>
// kernel: tpu_custom_call.1
= control target key start
LH: loop header
LB: loop body
LE: loop exit
PB: predicated region body
PF: predicated region fallthrough
CT: control target
= control target key end

     0   :  { %16 = vsyncpa [#allocation3], 0  ;;  %s7327_s0 = inlined_call_operand.vmem [shape: f32[2,64,32], index: 0, kind: input, shape index: {}]   ;;  %s7328_s1 = inlined_call_operand.vmem [shape: f32[1,32], index: 1, kind: input, shape index: {}]   ;;  %s7329_s2 = inlined_call_operand.vmem [shape: f32[1,32], index: 2, kind: input, shape index: {}]   ;;  %s7330_s3 = inlined_call_operand.vmem [shape: bf16[9,32,32], index: 3, kind: input, shape index: {}]   ;;  %s7331_s4 = inlined_call_operand.hbm [shape: bf16[9,32,32], index: 4, kind: input, shape index: {}]   ;;  %s7332_s5 = inlined_call_operand.vmem [shape: f32[1,32], index: 5, kind: input, shape index: {}]   ;;  %s7333_s6 = inlined_call_operand.vmem [shape: f32[1,32], index: 6, kind: input, shape index: {}]   ;;  %s7334_s7 = inlined_call_operand.vmem [shape: f32[1,32], index: 7, kind: input, shape index: {}]   ;;  %s7335_s8 = inlined_call_operand.hbm [shape: bf16[9,32,32], index: 8, kind: input, shape index: {}]   ;;  %s7336_s9 = inlined_call_operand.hbm [shape: bf16[9,32,32], index: 9, kind: input, shape index: {}]   ;;  %s7337_s10 = inlined_call_operand.vmem [shape: f32[1,32], index: 10, kind: input, shape index: {}]   ;;  %s7338_s11 = inlined_call_operand.vmem [shape: f32[2,64,32], index: 11, kind: output, shape index: {}]  }
   0x1   :  { %17 = vsyncpa [#allocation5], 0  ;;  %s5159_s17 = smov 0  }
   0x2 LB: > { %s5165_s18 = sadd.s32 4294967295, %s5091_s17   ;;  %p4222_p0 = scmp.ge.s32.totalorder %s5091_s17, 1  ;;  %s5091_s17 = sphi %s5159_s17, %s23_s17  }
   0x3   : > { %p290_p1 = scmp.lt.s32.totalorder %s5091_s17, 3  ;;  %p4889_p2 = scmp.eq.s32.totalorder %s5165_s18, 0 }
   0x4   : > { %s333_s21 = sshll.u32 %s7335_s8, 4  ;;  %s310_s25 = sshll.u32 %s7331_s4, 4  ;;  %s334_s21 = int_to_ptr.hbm [resolvable:$true] %s333_s21  ;;  %s311_s25 = int_to_ptr.hbm [resolvable:$true] %s310_s25 }
   0x5   : > { %p5173_p3 = pnand %p4222_p0, %p290_p1  ;;  %s5093_s26 = smov [#allocation4]  }
   0x6   : > { %s335_s27 = sshll.u32 %s5093_s26, 4  ;;  %s5094_s28 = smov [#allocation2]   ;;  %s336_s27 = int_to_ptr.vmem [resolvable:$true] %s335_s27 }
   0x7   : > { %p4879_p4 = pneg %p5173_p3  ;;  %s312_s29 = sshll.u32 %s5094_s28, 4  ;;  %s313_s29 = int_to_ptr.vmem [resolvable:$true] %s312_s29 }
   0x8   : > { %s347_s13 = sshll.u32 %s7336_s9, 4  ;;  %s5095_s14 = smov 64   ;;  %s348_s13 = int_to_ptr.hbm [resolvable:$true] %s347_s13 }
   0x9   : > { %p4880_p5 = pnand %p4889_p2, %p4879_p4  ;;  %s5096_s15 = smov 4  }
   0xa   : > { %s5097_s16 = smov [#allocation6]   ;;  %376 = sbr.rel (%p5173_p3) target bundleno = 1436 (0x59c), region = 64 }
   0xb   : > { %4885 = dma.hbm_to_vmem [thread:$0]  (!%p4880_p5), %s334_s21, 2304, %s336_s27, [#allocation5], %s5095_s14, %s5095_s14, %s5096_s15  }
   0xc   : > { %4882 = dma.hbm_to_vmem [thread:$0]  (!%p4880_p5), %s311_s25, 2304, %s313_s29, [#allocation3], %s5095_s14, %s5095_s14, %s5096_s15  }
   0xd   : > { %s349_s19 = sshll.u32 %s5097_s16, 4  ;;  %s350_s19 = int_to_ptr.vmem [resolvable:$true] %s349_s19 }
   0xe   : > { %4888 = dma.hbm_to_vmem [thread:$0]  (!%p4880_p5), %s348_s13, 2304, %s350_s19, [#allocation5], %s5095_s14, %s5095_s14, %s5096_s15  }
   0xf   : > { %5082 = dma.done.wait (%p4889_p2), [#allocation3], 2304  }
  0x10   : > { %5084 = vsyncadd (%p4889_p2), [#allocation3], 4294964992 }
  0x11   : > { %5086 = dma.done.wait (%p4889_p2), [#allocation5], 4608  }
  0x12   : > { %5088 = vsyncadd (%p4889_p2), [#allocation5], 4294962688  ;;  %p427_p6 = scmp.lt.s32.totalorder %s5165_s18, 1  ;;  %vm7339_vm0 = vcmask 261120   ;;  %v4794_v0 = vld [vmem:[#allocation2 + $0x48] sm:$0xff]  ;;  %v4793_v2 = vld [vmem:[#allocation2 + $0x40] sm:$0xff] }
  0x13   : > { %v4792_v1 = vld [vmem:[%s7330_s3 + $0x48] sm:$0xff]  ;;  %4863 = vmatpush.bf16.msra.mxu2 %v4794_v0  ;;  %v4791_v5 = vld [vmem:[%s7330_s3 + $0x40] sm:$0xff]  ;;  %1019 = vmatpush.bf16.msra.mxu0 %v4794_v0 }
  0x14   : > { %s7655_s18 = smov (!%p427_p6, %s5165_s18), 1  ;;  %4865 = vmatpush.bf16.msra.mxu3 %v4792_v1  ;;  %1060 = vmatpush.bf16.msra.mxu1 %v4792_v1 }
  0x15   : > { %s4789_s20 = sshll.u32 %s7655_s18, 6 }
  0x16   : > { %s5207_s23 = scalar_lea.vmem %s7327_s0, %s4789_s20  ;;  %s7261_s29 = scalar_lea.vmem %s7338_s11, %s4789_s20 }
  0x17   : > { %v5213_v3 = vld [vmem:[%s5207_s23] sm:$0xff]  ;;  %v5216_v4 = vld [vmem:[%s5207_s23 + $0x8] sm:$0xff]  ;;  %v5222_v6 = vld [vmem:[%s5207_s23 + $0x10] sm:$0xff]  ;;  %4864 = vmatpush.bf16.msra.mxu2 %v4793_v2  ;;  %1020 = vmatpush.bf16.msra.mxu0 %v4793_v2 }
  0x18   : > { %v5225_v7 = vld [vmem:[%s5207_s23 + $0x18] sm:$0xff]  ;;  %v680_v8 = vsel %vm7339_vm0, %v5213_v3, 0.0  ;;  %v681_v9 = vsel %vm7339_vm0, %v5216_v4, 0.0  ;;  %v701_v10 = vmul.f32 %v5213_v3, %v5213_v3  ;;  %v702_v11 = vmul.f32 %v5216_v4, %v5216_v4  ;;  %v5236_v12 = vld [vmem:[%s5207_s23 + $0x20] sm:$0xff]  ;;  %v5245_v17 = vld [vmem:[%s5207_s23 + $0x28] sm:$0xff]  ;;  %4866 = vmatpush.bf16.msra.mxu3 %v4791_v5  ;;  %1061 = vmatpush.bf16.msra.mxu1 %v4791_v5 }
  0x19   : > { %v682_v13 = vadd.f32 %v681_v9, %v680_v8  ;;  %v683_v14 = vsel %vm7339_vm0, %v5222_v6, 0.0  ;;  %v685_v15 = vsel %vm7339_vm0, %v5225_v7, 0.0  ;;  %v703_v16 = vmul.f32 %v5222_v6, %v5222_v6  ;;  %v5256_v24 = vld [vmem:[%s5207_s23 + $0x30] sm:$0xff]  ;;  %v445_v31 = vld [vmem:[%s5207_s23 + $0x38] sm:$0xff] }
  0x1a   : > { %v704_v19 = vmul.f32 %v5225_v7, %v5225_v7  ;;  %v687_v20 = vsel %vm7339_vm0, %v5236_v12, 0.0  ;;  %v705_v21 = vmul.f32 %v5236_v12, %v5236_v12  ;;  %v709_v22 = vsel %vm7339_vm0, %v701_v10, 0.0 }
  0x1b   : > { %v684_v18 = vadd.f32 %v683_v14, %v682_v13  ;;  %v710_v23 = vsel %vm7339_vm0, %v702_v11, 0.0  ;;  %v712_v27 = vsel %vm7339_vm0, %v703_v16, 0.0  ;;  %1101 = vmatpush.bf16.msrb.mxu2 %v4792_v1  ;;  %v689_v28 = vsel %vm7339_vm0, %v5245_v17, 0.0 }
  0x1c   : > { %v711_v26 = vadd.f32 %v710_v23, %v709_v22  ;;  %v706_v29 = vmul.f32 %v5245_v17, %v5245_v17  ;;  %v714_v30 = vsel %vm7339_vm0, %v704_v19, 0.0  ;;  %v691_v34 = vsel %vm7339_vm0, %v5256_v24, 0.0  ;;  %v748_v19 = vld [vmem:[%s7329_s2] sm:$0x1] }
  0x1d   : > { %v686_v25 = vadd.f32 %v685_v15, %v684_v18  ;;  %v707_v35 = vmul.f32 %v5256_v24, %v5256_v24  ;;  %v716_v36 = vsel %vm7339_vm0, %v705_v21, 0.0  ;;  %v693_v39 = vsel %vm7339_vm0, %v445_v31, 0.0  ;;  %v746_v15 = vld [vmem:[%s7328_s1] sm:$0x1] }
  0x1e   : > { %v713_v33 = vadd.f32 %v712_v27, %v711_v26  ;;  %v708_v40 = vmul.f32 %v445_v31, %v445_v31  ;;  %v718_v41 = vsel %vm7339_vm0, %v706_v29, 0.0 }
  0x1f   : > { %v688_v32 = vadd.f32 %v687_v20, %v686_v25  ;;  %1102 = vmatpush.bf16.msrb.mxu2 %v4791_v5  ;;  %v720_v44 = vsel %vm7339_vm0, %v707_v35, 0.0 }
  0x20   : > { %v715_v38 = vadd.f32 %v714_v30, %v713_v33  ;;  %v722_v47 = vsel %vm7339_vm0, %v708_v40, 0.0 }
  0x21   : > { %v690_v37 = vadd.f32 %v689_v28, %v688_v32 }
  0x22   : > { %v717_v43 = vadd.f32 %v716_v36, %v715_v38 }
  0x23   : > { %v692_v42 = vadd.f32 %v691_v34, %v690_v37 }
  0x24   : > { %v719_v46 = vadd.f32 %v718_v41, %v717_v43 }
  0x25   : > { %v694_v45 = vadd.f32 %v693_v39, %v692_v42 }
  0x26   : > { %v721_v49 = vadd.f32 %v720_v44, %v719_v46 }
  0x27   : > { %v695_v48 = vrot.slane %v694_v45, 4 }
  0x28   : > { %v723_v51 = vadd.f32 %v722_v47, %v721_v49 }
  0x29   : > { %v696_v50 = vadd.f32 %v695_v48, %v694_v45 }
  0x2a   : > { %v724_v53 = vrot.slane %v723_v51, 4 }
  0x2b   : > { %v697_v52 = vrot.slane %v696_v50, 2 }
  0x2c   : > { %v725_v55 = vadd.f32 %v724_v53, %v723_v51 }
  0x2d   : > { %v698_v54 = vadd.f32 %v697_v52, %v696_v50 }
  0x2e   : > { %v726_v57 = vrot.slane %v725_v55, 2 }
  0x2f   : > { %v699_v56 = vrot.slane %v698_v54, 1 }
  0x30   : > { %v727_v59 = vadd.f32 %v726_v57, %v725_v55 }
  0x31   : > { %v700_v58 = vadd.f32 %v699_v56, %v698_v54 }
  0x32   : > { %v728_v60 = vrot.slane %v727_v59, 1 }
  0x33   : > { %v730_v61 = vmul.f32 0.015625, %v700_v58 }
  0x34   : > { %v729_v62 = vadd.f32 %v728_v60, %v727_v59 }
  0x35   : > { %v732_v63 = vmul.f32 %v730_v61, %v730_v61 }
  0x36   : > { %v731_v0 = vmul.f32 0.015625, %v729_v62 }
  0x38   : > { %v733_v1 = vsub.f32 %v731_v0, %v732_v63 }
  0x3a   : > { %v734_v2 = vmax.f32 %v733_v1, 0.0 }
  0x3c   : > { %v735_v5 = vadd.f32 1e-06, %v734_v2 }
  0x3e   : > { %4911 = vrsqrt.f32 %v735_v5  ;;  %vm742_vm1 = vweird.f32 %v735_v5 }
  0x44   : > { %v4912_v8 = vpop.eup %4911 }
  0x45   : > { %v737_v9 = vmul.f32 %v4912_v8, %v735_v5  ;;  %vm743_vm2 = vweird.f32 %v4912_v8 }
  0x46   : > { %vm744_vm3 = vmor %vm742_vm1, %vm743_vm2 }
  0x47   : > { %v738_v10 = vmul.f32 %v4912_v8, %v737_v9 }
  0x49   : > { %v739_v11 = vmul.f32 0.5, %v738_v10 }
  0x4b   : > { %v740_v13 = vsub.f32 1.5, %v739_v11 }
  0x4d   : > { %v741_v14 = vmul.f32 %v4912_v8, %v740_v13 }
  0x4f   : > { %v745_v16 = vsel %vm744_vm3, %v4912_v8, %v741_v14 }
  0x50   : > { %v747_v18 = vmul.f32 %v746_v15, %v745_v16 }
  0x52   : > { %v749_v20 = vmul.f32 %v747_v18, %v730_v61  ;;  %v751_v21 = vperm.slane %v747_v18, 0 }
  0x54   : > { %v750_v22 = vsub.f32 %v748_v19, %v749_v20  ;;  %v756_v23 = vmul.f32 %v751_v21, %v5236_v12  ;;  %v757_v25 = vmul.f32 %v751_v21, %v5245_v17  ;;  %v752_v26 = vmul.f32 %v751_v21, %v5213_v3 }
  0x55   : > { %v753_v27 = vmul.f32 %v751_v21, %v5216_v4  ;;  %v758_v28 = vmul.f32 %v751_v21, %v5256_v24  ;;  %v759_v29 = vmul.f32 %v751_v21, %v445_v31  ;;  %v754_v3 = vmul.f32 %v751_v21, %v5222_v6 }
  0x56   : > { %v761_v30 = vperm.slane %v750_v22, 0  ;;  %v755_v4 = vmul.f32 %v751_v21, %v5225_v7 }
  0x58   : > { %v5285_v32 = vadd.f32 %v761_v30, %v756_v23  ;;  %v5287_v33 = vadd.f32 %v761_v30, %v757_v25  ;;  %v5289_v34 = vadd.f32 %v761_v30, %v752_v26  ;;  %v5291_v35 = vadd.f32 %v761_v30, %v753_v27 }
  0x59   : > { %v5293_v36 = vadd.f32 %v761_v30, %v758_v28  ;;  %v5295_v12 = vadd.f32 %v761_v30, %v759_v29  ;;  %v5305_v44 = vadd.f32 %v761_v30, %v754_v3  ;;  %v5307_v7 = vadd.f32 %v761_v30, %v755_v4 }
  0x5a   : > { %v775_v17 = vsub.f32 0.0, %v5285_v32  ;;  %v776_v24 = vsub.f32 0.0, %v5287_v33  ;;  %v771_v31 = vsub.f32 0.0, %v5289_v34  ;;  %v772_v37 = vsub.f32 0.0, %v5291_v35 }
  0x5b   : > { %v777_v38 = vsub.f32 0.0, %v5293_v36  ;;  %v778_v39 = vsub.f32 0.0, %v5295_v12  ;;  %v773_v46 = vsub.f32 0.0, %v5305_v44  ;;  %v774_v47 = vsub.f32 0.0, %v5307_v7 }
  0x5c   : > { %v787_v40 = vmul.f32 1.442695, %v775_v17  ;;  %v789_v41 = vmul.f32 1.442695, %v776_v24  ;;  %v779_v42 = vmul.f32 1.442695, %v771_v31 }
  0x5d   : > { %v781_v43 = vmul.f32 1.442695, %v772_v37  ;;  %v791_v6 = vmul.f32 1.442695, %v777_v38  ;;  %v793_v45 = vmul.f32 1.442695, %v778_v39 }
  0x5e   : > { %4913 = vpow2.f32 %v787_v40  ;;  %v783_v51 = vmul.f32 1.442695, %v773_v46  ;;  %v785_v54 = vmul.f32 1.442695, %v774_v47 }
  0x5f   : > { %4915 = vpow2.f32 %v789_v41 }
  0x60   : > { %4917 = vpow2.f32 %v779_v42  ;;  %v4795_v42 = vld [vmem:[%s7330_s3] sm:$0xff] }
  0x61   : > { %4919 = vpow2.f32 %v781_v43 }
  0x62   : > { %4921 = vpow2.f32 %v791_v6 }
  0x63   : > { %4923 = vpow2.f32 %v793_v45 }
  0x64   : > { %v4914_v48 = vpop.eup %4913 }
  0x65   : > { %v4916_v49 = vpop.eup %4915  ;;  %v799_v50 = vadd.f32 1.0, %v4914_v48 }
  0x66   : > { %v4918_v52 = vpop.eup %4917  ;;  %v5311_v53 = vadd.f32 1.0, %v4916_v49 }
  0x67   : > { %v4920_v55 = vpop.eup %4919  ;;  %4925 = vrcp.f32 %v799_v50  ;;  %v872_v57 = vand.u32 2147483647, %v799_v50  ;;  %v874_v58 = vand.u32 2147483648, %v799_v50  ;;  %v5315_v61 = vadd.f32 1.0, %v4918_v52 }
  0x68   : > { %v4922_v56 = vpop.eup %4921  ;;  %4927 = vrcp.f32 %v5311_v53  ;;  %v887_v60 = vand.u32 2147483647, %v5311_v53  ;;  %v5317_v62 = vadd.f32 1.0, %v4920_v55  ;;  %v889_v63 = vand.u32 2147483648, %v5311_v53 }
  0x69   : > { %v4924_v59 = vpop.eup %4923  ;;  %4929 = vpow2.f32 %v783_v51  ;;  %v5320_v0 = vadd.f32 1.0, %v4922_v56  ;;  %vm868_vm4 = vweird.f32 %v799_v50  ;;  %vm883_vm5 = vweird.f32 %v5311_v53 }
  0x6a   : > { %4931 = vpow2.f32 %v785_v54  ;;  %v814_v1 = vand.u32 2147483648, %v5315_v61  ;;  %vm5325_vm6 = vcmp.eq.f32.partialorder %v872_v57, 8.507059e+37  ;;  %v875_v5 = vor.u32 1.1754944e-38, %v874_v58 }
  0x6b   : > { %4933 = vrcp.f32 %v5315_v61  ;;  %v812_v8 = vand.u32 2147483647, %v5315_v61  ;;  %v5331_v9 = vadd.f32 1.0, %v4924_v59  ;;  %vm5333_vm7 = vcmp.eq.f32.partialorder %v887_v60, 8.507059e+37 }
  0x6c   : > { %4935 = vrcp.f32 %v5317_v62  ;;  %v827_v13 = vand.u32 2147483647, %v5317_v62  ;;  %v829_v14 = vand.u32 2147483648, %v5317_v62  ;;  %v890_v18 = vor.u32 1.1754944e-38, %v889_v63 }
  0x6d   : > { %v4926_v10 = vpop.eup %4925  ;;  %4937 = vrcp.f32 %v5320_v0  ;;  %vm808_vm8 = vweird.f32 %v5315_v61  ;;  %vm823_vm9 = vweird.f32 %v5317_v62  ;;  %v815_v21 = vor.u32 1.1754944e-38, %v814_v1 }
  0x6e   : > { %v4928_v15 = vpop.eup %4927  ;;  %v864_v16 = vmul.f32 %v4926_v10, %v799_v50  ;;  %v902_v22 = vand.u32 2147483647, %v5320_v0  ;;  %v904_v23 = vand.u32 2147483648, %v5320_v0  ;;  %vm869_vm10 = vweird.f32 %v4926_v10 }
  0x6f   : > { %v4930_v19 = vpop.eup %4929  ;;  %v879_v20 = vmul.f32 %v4928_v15, %v5311_v53  ;;  %vm5347_vm11 = vcmp.eq.f32.partialorder %v812_v8, 8.507059e+37  ;;  %vm898_vm12 = vweird.f32 %v5320_v0  ;;  %4939 = vrcp.f32 %v5331_v9  ;;  %vm5363_vm1 = vmor %vm868_vm4, %vm869_vm10 }
  0x70   : > { %v5345_v25 = vpop.eup %4931  ;;  %v865_v26 = vsub.f32 1.0, %v864_v16  ;;  %vm884_vm13 = vweird.f32 %v4928_v15  ;;  %vm5353_vm14 = vcmp.eq.f32.partialorder %v827_v13, 8.507059e+37  ;;  %v830_v3 = vor.u32 1.1754944e-38, %v829_v14 }
  0x71   : > { %v4934_v28 = vpop.eup %4933  ;;  %v880_v29 = vsub.f32 1.0, %v879_v20  ;;  %v919_v4 = vand.u32 2147483648, %v5331_v9  ;;  %vm913_vm15 = vweird.f32 %v5331_v9  ;;  %v917_v37 = vand.u32 2147483647, %v5331_v9  ;;  %vm5375_vm0 = vmor %vm883_vm5, %vm884_vm13 }
  0x72   : > { %v4936_v17 = vpop.eup %4935  ;;  %v866_v24 = vmul.f32 %v4926_v10, %v865_v26  ;;  %v804_v31 = vmul.f32 %v4934_v28, %v5315_v61  ;;  %vm809_vm2 = vweird.f32 %v4934_v28  ;;  %vm5368_vm3 = vcmp.eq.f32.partialorder %v902_v22, 8.507059e+37 }
  0x73   : > { %v4938_v38 = vpop.eup %4937  ;;  %v881_v40 = vmul.f32 %v4928_v15, %v880_v29  ;;  %v819_v41 = vmul.f32 %v4936_v17, %v5317_v62  ;;  %v905_v43 = vor.u32 1.1754944e-38, %v904_v23  ;;  %vm824_vm4 = vweird.f32 %v4936_v17  ;;  %vm5391_vm5 = vmor %vm808_vm8, %vm809_vm2 }
  0x74   : > { %v867_v6 = vadd.f32 %v4926_v10, %v866_v24  ;;  %v805_v46 = vsub.f32 1.0, %v804_v31  ;;  %v894_v47 = vmul.f32 %v4938_v38, %v5320_v0  ;;  %vm899_vm10 = vweird.f32 %v4938_v38 }
  0x75   : > { %v882_v48 = vadd.f32 %v4928_v15, %v881_v40  ;;  %v820_v49 = vsub.f32 1.0, %v819_v41  ;;  %v920_v50 = vor.u32 1.1754944e-38, %v919_v4  ;;  %v4940_v51 = vpop.eup %4939  ;;  %v5382_v56 = vadd.f32 1.0, %v4930_v19  ;;  %v4796_v19 = vld [vmem:[%s7330_s3 + $0x8] sm:$0xff]  ;;  %v4802_v41 = vld [vmem:[#allocation2 + $0x18] sm:$0xff] }
  0x76   : > { %v871_v52 = vsel %vm5363_vm1, %v4926_v10, %v867_v6  ;;  %v806_v54 = vmul.f32 %v4934_v28, %v805_v46  ;;  %v895_v55 = vsub.f32 1.0, %v894_v47  ;;  %v909_v60 = vmul.f32 %v4940_v51, %v5331_v9  ;;  %1199 = vmatpush.bf16.msrb.mxu0 %v4796_v19  ;;  %1228 = vmatpush.bf16.msrb.mxu1 %v4796_v19 }
  0x77   : > { %v876_v53 = vsel %vm5325_vm6, %v875_v5, %v871_v52  ;;  %v886_v57 = vsel %vm5375_vm0, %v4928_v15, %v882_v48  ;;  %v821_v59 = vmul.f32 %v4936_v17, %v820_v49  ;;  %vm5404_vm0 = vmor %vm823_vm9, %vm824_vm4  ;;  %4941 = vrcp.f32 %v5382_v56 }
  0x78   : > { %v891_v63 = vsel %vm5333_vm7, %v890_v18, %v886_v57  ;;  %v5399_v1 = vmul.f32 %v876_v53, %v5285_v32  ;;  %v807_v2 = vadd.f32 %v4934_v28, %v806_v54  ;;  %v896_v61 = vmul.f32 %v4938_v38, %v895_v55  ;;  %vm5414_vm6 = vmor %vm898_vm12, %vm899_vm10  ;;  %v4798_v18 = vld [vmem:[#allocation2 + $0x8] sm:$0xff] }
  0x79   : > { %v5409_v8 = vmul.f32 %v891_v63, %v5287_v33  ;;  %v822_v10 = vadd.f32 %v4936_v17, %v821_v59  ;;  %v910_v32 = vsub.f32 1.0, %v909_v60  ;;  %vm914_vm7 = vweird.f32 %v4940_v51  ;;  %1158 = vmatpush.bf16.msrb.mxu3 %v4798_v18 }
  0x7a   : > { %v5420_v62 = vpack.c.bf16 %v5399_v1, %v5399_v1  ;;  %v811_v13 = vsel %vm5391_vm5, %v4934_v28, %v807_v2  ;;  %v897_v14 = vadd.f32 %v4938_v38, %v896_v61  ;;  %vm5447_vm8 = vmor %vm913_vm15, %vm914_vm7  ;;  %vm918_vm9 = vcmp.eq.f32.partialorder %v917_v37, 8.507059e+37  ;;  %1200 = vmatpush.bf16.msrb.mxu0 %v4795_v42  ;;  %1229 = vmatpush.bf16.msrb.mxu1 %v4795_v42 }
  0x7b   : > { %v5427_v33 = vpack.c.bf16 %v5409_v8, %v5409_v8  ;;  %v816_v0 = vsel %vm5347_vm11, %v815_v21, %v811_v13  ;;  %v826_v15 = vsel %vm5404_vm0, %v4936_v17, %v822_v10  ;;  %v911_v16 = vmul.f32 %v4940_v51, %v910_v32 }
  0x7c   : > { %v981_v20 = vunpack.c.l.b16 %v5420_v62  ;;  %v831_v22 = vsel %vm5353_vm14, %v830_v3, %v826_v15  ;;  %v5440_v23 = vmul.f32 %v816_v0, %v5289_v34  ;;  %v901_v21 = vsel %vm5414_vm6, %v4938_v38, %v897_v14  ;;  %v4797_v3 = vld [vmem:[#allocation2] sm:$0xff] }
  0x7d   : > { %v982_v27 = vunpack.c.l.b16 %v5427_v33  ;;  %v5453_v28 = vmul.f32 %v831_v22, %v5291_v35  ;;  %v912_v29 = vadd.f32 %v4940_v51, %v911_v16  ;;  %v906_v9 = vsel %vm5368_vm3, %v905_v43, %v901_v21  ;;  %v4942_v24 = vpop.eup %4941  ;;  %1159 = vmatpush.bf16.msrb.mxu3 %v4797_v3 }
  0x7e   : > { %v5457_v34 = vpack.c.bf16 %v5440_v23, %v5440_v23  ;;  %v798_v30 = vadd.f32 1.0, %v5345_v25  ;;  %vm7373_vm11 = vcmask 261120   ;;  %v5477_v38 = vmul.f32 %v906_v9, %v5293_v36 }
  0x7f   : > { %v5462_v4 = vpack.c.b16 %v982_v27, %v981_v20  ;;  %v5466_v35 = vpack.c.bf16 %v5453_v28, %v5453_v28  ;;  %v916_v17 = vsel %vm5447_vm8, %v4940_v51, %v912_v29  ;;  %vm7374_vm12 = vmmov %vm7373_vm11  ;;  %v834_v40 = vmul.f32 %v4942_v24, %v5382_v56 }
  0x80   : > { %v977_v31 = vunpack.c.l.b16 %v5457_v34  ;;  %v921_v37 = vsel %vm918_vm9, %v920_v50, %v916_v17  ;;  %vm838_vm13 = vweird.f32 %v5382_v56  ;;  %v844_v43 = vand.u32 2147483648, %v5382_v56  ;;  %vm7375_vm15 = vmmov %vm7373_vm11  ;;  %v4799_v17 = vld [vmem:[%s7330_s3 + $0x10] sm:$0xff] }
  0x81   : > { %4265 = vmatmul.msk.bf16.vlgmr.msra.gmra.mxu2 %vm7373_vm11, %v5462_v4  ;;  %4277 = vmatmul.msk.bf16.vlgmr.msra.gmra.mxu3 %vm7374_vm12, %v5462_v4  ;;  %v978_v25 = vunpack.c.l.b16 %v5466_v35  ;;  %v5480_v39 = vmul.f32 %v921_v37, %v5295_v12  ;;  %4943 = vrcp.f32 %v798_v30  ;;  %v835_v36 = vsub.f32 1.0, %v834_v40  ;;  %vm7376_vm1 = vmmov %vm7373_vm11  ;;  %v4805_v37 = vld [vmem:[#allocation2 + $0x20] sm:$0xff] }
  0x82   : > { %vm839_vm14 = vweird.f32 %v4942_v24  ;;  %v842_v12 = vand.u32 2147483647, %v5382_v56  ;;  %1320 = vmatpush.bf16.msra.mxu2 %v4802_v41  ;;  %v937_v45 = vpack.c.bf16 %v5477_v38, %v5477_v38  ;;  %v845_v48 = vor.u32 1.1754944e-38, %v844_v43  ;;  %vm7377_vm6 = vmmov %vm7376_vm1 }
  0x83   : > { %v5488_v6 = vpack.c.b16 %v978_v25, %v977_v31  ;;  %v938_v46 = vpack.c.bf16 %v5480_v39, %v5480_v39  ;;  %v836_v47 = vmul.f32 %v4942_v24, %v835_v36  ;;  %vm840_vm2 = vmor %vm838_vm13, %vm839_vm14  ;;  %v859_v57 = vand.u32 2147483648, %v798_v30  ;;  %v4806_v31 = vld [vmem:[#allocation2 + $0x28] sm:$0xff]  ;;  %v4803_v25 = vld [vmem:[%s7330_s3 + $0x20] sm:$0xff] }
  0x84   : > { %vm843_vm3 = vcmp.eq.f32.partialorder %v842_v12, 8.507059e+37  ;;  %v983_v51 = vunpack.c.l.b16 %v937_v45  ;;  %vm853_vm4 = vweird.f32 %v798_v30  ;;  %v857_v59 = vand.u32 2147483647, %v798_v30  ;;  %vm7378_vm7 = vmmov %vm7376_vm1 }
  0x85   : > { %4263 = vmatmul.msk.bf16.vlgmr.msra.gmra.mxu0 %vm7375_vm15, %v5488_v6  ;;  %4275 = vmatmul.msk.bf16.vlgmr.msra.gmra.mxu1 %vm7376_vm1, %v5488_v6  ;;  %v837_v49 = vadd.f32 %v4942_v24, %v836_v47  ;;  %v984_v52 = vunpack.c.l.b16 %v938_v46  ;;  %v860_v2 = vor.u32 1.1754944e-38, %v859_v57  ;;  %v939_v0 = vunpack.c.l.bf16 %v5457_v34  ;;  %vm7379_vm8 = vmmov %vm7376_vm1 }
  0x86   : > { %vm858_vm0 = vcmp.eq.f32.partialorder %v857_v59, 8.507059e+37  ;;  %vm7380_vm9 = vmmov %vm7376_vm1  ;;  %v944_v20 = vunpack.c.l.bf16 %v5427_v33  ;;  %1465 = vmatpush.bf16.msra.mxu1 %v4806_v31 }
  0x87   : > { %v4944_v50 = vpop.eup %4943  ;;  %v841_v54 = vsel %vm840_vm2, %v4942_v24, %v837_v49  ;;  %v5501_v60 = vpack.c.b16 %v984_v52, %v983_v51  ;;  %v947_v18 = vsub.f32 %v5440_v23, %v939_v0  ;;  %vm7381_vm11 = vmmov %vm7376_vm1  ;;  %v4801_v23 = vld [vmem:[#allocation2 + $0x10] sm:$0xff]  ;;  %v4804_v24 = vld [vmem:[%s7330_s3 + $0x28] sm:$0xff] }
  0x88   : > { %v849_v55 = vmul.f32 %v4944_v50, %v798_v30  ;;  %v846_v53 = vsel %vm843_vm3, %v845_v48, %v841_v54  ;;  %vm854_vm10 = vweird.f32 %v4944_v50  ;;  %v952_v26 = vsub.f32 %v5409_v8, %v944_v20  ;;  %vm7382_vm12 = vmmov %vm7376_vm1  ;;  %1321 = vmatpush.bf16.msra.mxu2 %v4801_v23 }
  0x89   : > { %v925_v56 = vmul.f32 %v846_v53, %v5305_v44  ;;  %vm855_vm5 = vmor %vm853_vm4, %vm854_vm10  ;;  %v940_v44 = vunpack.c.l.bf16 %v5466_v35  ;;  %v946_v8 = vunpack.c.l.bf16 %v938_v46  ;;  %v4800_v35 = vld [vmem:[%s7330_s3 + $0x18] sm:$0xff]  ;;  %v4807_v46 = vld [vmem:[%s7330_s3 + $0x30] sm:$0xff] }
  0x8a   : > { %v850_v58 = vsub.f32 1.0, %v849_v55  ;;  %vm7383_vm13 = vmmov %vm7376_vm1  ;;  %1361 = vmatpush.bf16.msra.mxu3 %v4800_v35  ;;  %1390 = vmatpush.bf16.msra.mxu0 %v4800_v35 }
  0x8b   : > { %v933_v10 = vpack.c.bf16 %v925_v56, %v925_v56  ;;  %v948_v19 = vsub.f32 %v5453_v28, %v940_v44  ;;  %vm7384_vm14 = vmmov %vm7376_vm1  ;;  %v954_v30 = vsub.f32 %v5480_v39, %v946_v8  ;;  %1466 = vmatpush.bf16.msra.mxu1 %v4805_v37  ;;  %v4808_v39 = vld [vmem:[%s7330_s3 + $0x38] sm:$0xff] }
  0x8c   : > { %v851_v63 = vmul.f32 %v4944_v50, %v850_v58  ;;  %vm7385_vm15 = vmmov %vm7376_vm1 }
  0x8d   : > { %v979_v14 = vunpack.c.l.b16 %v933_v10  ;;  %v5521_v22 = vpack.c.bf16 %v948_v19, %v947_v18  ;;  %v941_v28 = vunpack.c.l.bf16 %v933_v10  ;;  %vm7386_vm2 = vmmov %vm7376_vm1 }
  0x8e   : > { %v852_v5 = vadd.f32 %v4944_v50, %v851_v63  ;;  %vm7387_vm3 = vmmov %vm7376_vm1  ;;  %1362 = vmatpush.bf16.msra.mxu3 %v4799_v17  ;;  %1391 = vmatpush.bf16.msra.mxu0 %v4799_v17  ;;  %v5098_v17 = vmov 0.0  }
  0x8f   : > { %v949_v29 = vsub.f32 %v925_v56, %v941_v28  ;;  %vm7388_vm4 = vmmov %vm7376_vm1 }
  0x90   : > { %v856_v61 = vsel %vm855_vm5, %v4944_v50, %v852_v5  ;;  %vm7389_vm10 = vmmov %vm7376_vm1 }
  0x91   : > { %4266 = vmatmul.msk.bf16.gmra.mxu2 %vm7377_vm6, %v5501_v60  ;;  %4278 = vmatmul.msk.bf16.gmra.mxu3 %vm7378_vm7, %v5501_v60  ;;  %v861_v11 = vsel %vm858_vm0, %v860_v2, %v856_v61  ;;  %vm7390_vm5 = vmmov %vm7376_vm1 }
  0x92   : > { %v926_v32 = vmul.f32 %v861_v11, %v5307_v7  ;;  %v943_v7 = vunpack.c.l.bf16 %v5420_v62  ;;  %vm7391_vm0 = vmmov %vm7376_vm1  ;;  %v446_v11 = vlaneseq }
  0x93   : > { %vm7392_vm6 = vmmov %vm7391_vm0 }
  0x94   : > { %v934_v13 = vpack.c.bf16 %v926_v32, %v926_v32  ;;  %v951_v21 = vsub.f32 %v5399_v1, %v943_v7  ;;  %v945_v1 = vunpack.c.l.bf16 %v937_v45  ;;  %vm7393_vm7 = vmmov %vm7391_vm0  ;;  %v4809_v45 = vld [vmem:[#allocation2 + $0x30] sm:$0xff]  ;;  %v5629_v0 = vshrl.u32 %v446_v11, 7 }
  0x96   : > { %v980_v15 = vunpack.c.l.b16 %v934_v13  ;;  %v5525_v27 = vpack.c.bf16 %v952_v26, %v951_v21  ;;  %v942_v62 = vunpack.c.l.bf16 %v934_v13  ;;  %v953_v9 = vsub.f32 %v5477_v38, %v945_v1  ;;  %v4810_v38 = vld [vmem:[#allocation2 + $0x38] sm:$0xff] }
  0x97   : > { %v5632_v19 = vadd.s32 16, %v5629_v0 }
  0x98   : > { %v5511_v16 = vpack.c.b16 %v980_v15, %v979_v14  ;;  %v950_v33 = vsub.f32 %v926_v32, %v942_v62  ;;  %v5539_v3 = vpack.c.bf16 %v954_v30, %v953_v9 }
  0x99   : > { %v473_v23 = vand.u32 7, %v5632_v19 }
  0x9a   : > { %4264 = vmatmul.msk.bf16.gmra.mxu0 %vm7379_vm8, %v5511_v16  ;;  %4276 = vmatmul.msk.bf16.gmra.mxu1 %vm7380_vm9, %v5511_v16  ;;  %v5535_v34 = vpack.c.bf16 %v950_v33, %v949_v29  ;;  %vm7394_vm8 = vmmov %vm7391_vm0  ;;  %v5650_v33 = vadd.s32 24, %v5629_v0 }
  0x9b   : > { %vm7395_vm9 = vmmov %vm7391_vm0 }
  0x9c   : > { %v480_v37 = vand.u32 7, %v5650_v33 }
  0xa1   : > { %4279 = vmatmul.msk.bf16.vlgmr.msrb.gmra.mxu2 %vm7381_vm11, %v5521_v22  ;;  %4291 = vmatmul.msk.bf16.vlgmr.msrb.gmra.mxu3 %vm7382_vm12, %v5488_v6  ;;  %vm7396_vm11 = vmmov %vm7391_vm0 }
  0xa2   : > { %1506 = vmatpush.bf16.msrb.mxu2 %v4804_v24  ;;  %1535 = vmatpush.bf16.msrb.mxu3 %v4804_v24  ;;  %vm7397_vm12 = vmmov %vm7391_vm0 }
  0xa6   : > { %1507 = vmatpush.bf16.msrb.mxu2 %v4803_v25  ;;  %1536 = vmatpush.bf16.msrb.mxu3 %v4803_v25 }
  0xaa   : > { %4303 = vmatmul.msk.bf16.vlgmr.msrb.gmra.mxu0 %vm7383_vm13, %v5488_v6  ;;  %4307 = vmatmul.msk.bf16.vlgmr.msrb.gmra.mxu1 %vm7384_vm14, %v5521_v22  ;;  %vm7398_vm13 = vmmov %vm7391_vm0 }
  0xab   : > { %vm7399_vm14 = vmmov %vm7391_vm0  ;;  %1627 = vmatpush.bf16.msrb.mxu0 %v4810_v38  ;;  %1668 = vmatpush.bf16.msrb.mxu1 %v4808_v39 }
  0xaf   : > { %1628 = vmatpush.bf16.msrb.mxu0 %v4809_v45  ;;  %1669 = vmatpush.bf16.msrb.mxu1 %v4807_v46 }
  0xb1   : > { %4280 = vmatmul.msk.bf16.gmra.mxu2 %vm7385_vm15, %v5535_v34  ;;  %4292 = vmatmul.msk.bf16.gmra.mxu3 %vm7376_vm1, %v5511_v16  ;;  %vm7400_vm15 = vmmov %vm7391_vm0 }
  0xb2   : > { %vm7401_vm1 = vmmov %vm7391_vm0 }
  0xba   : > { %4304 = vmatmul.msk.bf16.gmra.mxu0 %vm7386_vm2, %v5511_v16  ;;  %4308 = vmatmul.msk.bf16.gmra.mxu1 %vm7387_vm3, %v5535_v34  ;;  %vm7402_vm2 = vmmov %vm7391_vm0 }
  0xbb   : > { %vm7403_vm3 = vmmov %vm7391_vm0 }
  0xc1   : > { %4281 = vmatmul.msk.bf16.gmra.mxu2 %vm7388_vm4, %v5525_v27  ;;  %4293 = vmatmul.msk.bf16.gmra.mxu3 %vm7389_vm10, %v5462_v4  ;;  %vm7404_vm4 = vmmov %vm7391_vm0 }
  0xc2   : > { %vm7405_vm10 = vmmov %vm7391_vm0 }
  0xca   : > { %4305 = vmatmul.msk.bf16.gmra.mxu0 %vm7390_vm5, %v5462_v4  ;;  %4309 = vmatmul.msk.bf16.gmra.mxu1 %vm7391_vm0, %v5525_v27  ;;  %vm7406_vm5 = vmmov %vm7391_vm0 }
  0xd1   : > { %4282 = vmatmul.msk.bf16.gmra.mxu2 %vm7392_vm6, %v5539_v3  ;;  %4294 = vmatmul.msk.bf16.gmra.mxu3 %vm7393_vm7, %v5501_v60  ;;  %vm7407_vm6 = vmmov %vm7391_vm0 }
  0xd2   : > { %vm7408_vm7 = vmmov %vm7391_vm0 }
  0xda   : > { %4306 = vmatmul.msk.bf16.gmra.mxu0 %vm7394_vm8, %v5501_v60  ;;  %4310 = vmatmul.msk.bf16.gmra.mxu1 %vm7395_vm9, %v5539_v3  ;;  %vm7409_vm8 = vmmov %vm7391_vm0 }
  0xdb   : > { %vm7410_vm9 = vmmov %vm7391_vm0 }
  0xe1   : > { %4323 = vmatmul.msk.bf16.vlgmr.msra.gmra.mxu2 %vm7396_vm11, %v5488_v6  ;;  %4335 = vmatmul.msk.bf16.vlgmr.msra.gmra.mxu3 %vm7397_vm12, %v5488_v6  ;;  %vm7411_vm11 = vmmov %vm7391_vm0 }
  0xe2   : > { %1697 = vmatpush.bf16.msra.mxu2 %v4808_v39  ;;  %vm7412_vm12 = vmmov %vm7391_vm0 }
  0xe6   : > { %1698 = vmatpush.bf16.msra.mxu2 %v4807_v46 }
  0xea   : > { %4339 = vmatmul.msk.bf16.vlgmr.msra.gmra.mxu0 %vm7398_vm13, %v5521_v22  ;;  %4355 = vmatmul.msk.bf16.vlgmr.msra.gmra.mxu1 %vm7399_vm14, %v5488_v6  ;;  %vm7413_vm13 = vmmov %vm7391_vm0 }
  0xeb   : > { %vm7414_vm14 = vmmov %vm7391_vm0 }
  0xf1   : > { %4324 = vmatmul.msk.bf16.gmra.mxu2 %vm7400_vm15, %v5511_v16  ;;  %4336 = vmatmul.msk.bf16.gmra.mxu3 %vm7401_vm1, %v5511_v16  ;;  %vm7415_vm15 = vmmov %vm7391_vm0 }
  0xf2   : > { %vm7416_vm1 = vmmov %vm7391_vm0 }
  0xfa   : > { %4340 = vmatmul.msk.bf16.gmra.mxu0 %vm7402_vm2, %v5535_v34  ;;  %4356 = vmatmul.msk.bf16.gmra.mxu1 %vm7403_vm3, %v5511_v16  ;;  %vm553_vm2 = vcmp.ge.s32.totalorder %v473_v23, 1  ;;  %vm1267_vm3 = vcmp.lt.s32.totalorder %v5629_v0, 1 }
  0xfb   : > { %v5655_v24 = vsel %vm553_vm2, 1.0, %v5098_v17  ;;  %vm7425_vm2 = vmmov %vm7391_vm0 }
 0x101   : > { %4325 = vmatmul.msk.bf16.gmra.mxu2 %vm7404_vm4, %v5462_v4  ;;  %4337 = vmatmul.msk.bf16.gmra.mxu3 %vm7405_vm10, %v5462_v4  ;;  %vm554_vm4 = vcmp.ge.s32.totalorder %v480_v37, 1  ;;  %vm7417_vm10 = vmmov %vm7391_vm0 }
 0x102   : > { %v1022_v40 = vpop.f32.mrf.mxu0  ;;  %v1063_v41 = vpop.f32.mrf.mxu1 }
 0x103   : > { %v1064_v42 = vadd.f32 %v1063_v41, %v1022_v40 }
 0x104   : > { %v1032_v43 = vpop.f32.mrf.mxu2  ;;  %v1073_v36 = vpop.f32.mrf.mxu3 }
 0x105   : > { %v5600_v12 = vadd.f32 %v1073_v36, %v1032_v43  ;;  %v5668_v43 = vadd.s32 32, %v5629_v0 }
 0x10a   : > { %v1024_v47 = vpop.f32.mrf.mxu0  ;;  %v1065_v48 = vpop.f32.mrf.mxu1  ;;  %4341 = vmatmul.msk.bf16.gmra.mxu0 %vm7406_vm5, %v5525_v27  ;;  %4357 = vmatmul.msk.bf16.gmra.mxu1 %vm7391_vm0, %v5462_v4  ;;  %vm7418_vm5 = vmmov %vm7391_vm0 }
 0x10b   : > { %v1066_v49 = vadd.f32 %v1065_v48, %v1024_v47  ;;  %v4814_v47 = vld [vmem:[#allocation2 + $0x58] sm:$0xff] }
 0x10c   : > { %v1034_v50 = vpop.f32.mrf.mxu2  ;;  %v1075_v51 = vpop.f32.mrf.mxu3  ;;  %1788 = vmatpush.bf16.msra.mxu3 %v4814_v47 }
 0x10d   : > { %v5609_v52 = vadd.f32 %v1075_v51, %v1034_v50  ;;  %v487_v51 = vand.u32 7, %v5668_v43 }
 0x111   : > { %4326 = vmatmul.msk.bf16.gmra.mxu2 %vm7407_vm6, %v5501_v60  ;;  %4338 = vmatmul.msk.bf16.gmra.mxu3 %vm7408_vm7, %v5501_v60  ;;  %vm7419_vm6 = vmmov %vm7391_vm0  ;;  %vm555_vm7 = vcmp.ge.s32.totalorder %v487_v51, 1 }
 0x114   : > { %v1037_v54 = vpop.f32.mrf.mxu2  ;;  %v1078_v55 = vpop.f32.mrf.mxu3 }
 0x115   : > { %v5615_v53 = vadd.f32 %v1078_v55, %v1037_v54 }
 0x117   : > { %v1027_v57 = vpop.f32.mrf.mxu0  ;;  %v1068_v58 = vpop.f32.mrf.mxu1 }
 0x118   : > { %v1069_v59 = vadd.f32 %v1068_v58, %v1027_v57 }
 0x11a   : > { %4342 = vmatmul.msk.bf16.gmra.mxu0 %vm7409_vm8, %v5539_v3  ;;  %4358 = vmatmul.msk.bf16.gmra.mxu1 %vm7410_vm9, %v5501_v60  ;;  %vm7420_vm9 = vmmov %vm7391_vm0 }
 0x11c   : > { %v1039_v63 = vpop.f32.mrf.mxu2  ;;  %v1080_v56 = vpop.f32.mrf.mxu3 }
 0x11d   : > { %v5621_v2 = vadd.f32 %v1080_v56, %v1039_v63 }
 0x11f   : > { %v1029_v5 = vpop.f32.mrf.mxu0  ;;  %v1070_v61 = vpop.f32.mrf.mxu1 }
 0x120   : > { %v1071_v10 = vadd.f32 %v1070_v61, %v1029_v5  ;;  %v5690_v5 = vadd.s32 40, %v5629_v0  ;;  %v4812_v61 = vld [vmem:[%s7330_s3 + $0x58] sm:$0xff] }
 0x121   : > { %4367 = vmatmul.msk.bf16.vlgmr.msrb.gmra.mxu2 %vm7411_vm11, %v5488_v6  ;;  %4371 = vmatmul.msk.bf16.vlgmr.msrb.gmra.mxu3 %vm7412_vm12, %v5521_v22  ;;  %vm7421_vm11 = vmmov %vm7391_vm0 }
 0x122   : > { %1829 = vmatpush.bf16.msra.mxu0 %v4812_v61  ;;  %1858 = vmatpush.bf16.msra.mxu1 %v4812_v61  ;;  %vm7422_vm12 = vmmov %vm7391_vm0 }
 0x124   : > { %v1104_v32 = vpop.f32.mrf.mxu2  ;;  %v1161_v13 = vpop.f32.mrf.mxu3 }
 0x125   : > { %v5627_v14 = vadd.f32 %v1104_v32, %v1064_v42 }
 0x127   : > { %v1202_v44 = vpop.f32.mrf.mxu0  ;;  %v1231_v15 = vpop.f32.mrf.mxu1 }
 0x128   : > { %v1203_v18 = vadd.f32 %v1202_v44, %v1161_v13  ;;  %v5696_v44 = vsel %vm555_vm7, 1.0, %v5098_v17 }
 0x12a   : > { %v5634_v7 = vadd.f32 %v1231_v15, %v1203_v18  ;;  %4387 = vmatmul.msk.bf16.vlgmr.msrb.gmra.mxu0 %vm7413_vm13, %v5488_v6  ;;  %4399 = vmatmul.msk.bf16.vlgmr.msrb.gmra.mxu1 %vm7414_vm14, %v5488_v6  ;;  %v494_v18 = vand.u32 7, %v5690_v5  ;;  %vm7423_vm13 = vmmov %vm7391_vm0 }
 0x12c   : > { %v1106_v20 = vpop.f32.mrf.mxu2  ;;  %v1163_v21 = vpop.f32.mrf.mxu3  ;;  %v1259_v1 = vrot.slane %v5634_v7, 7  ;;  %vm556_vm8 = vcmp.ge.s32.totalorder %v494_v18, 1 }
 0x12d   : > { %v5640_v26 = vadd.f32 %v1106_v20, %v1066_v49  ;;  %v5675_v49 = vsel %vm554_vm4, 1.0, %v5098_v17  ;;  %v4811_v20 = vld [vmem:[%s7330_s3 + $0x50] sm:$0xff] }
 0x12e   : > { %1830 = vmatpush.bf16.msra.mxu0 %v4811_v20  ;;  %1859 = vmatpush.bf16.msra.mxu1 %v4811_v20 }
 0x12f   : > { %v1204_v28 = vpop.f32.mrf.mxu0  ;;  %v1233_v62 = vpop.f32.mrf.mxu1 }
 0x130   : > { %v1205_v29 = vadd.f32 %v1204_v28, %v1163_v21 }
 0x131   : > { %4368 = vmatmul.msk.bf16.gmra.mxu2 %vm7415_vm15, %v5511_v16  ;;  %4372 = vmatmul.msk.bf16.gmra.mxu3 %vm7416_vm1, %v5535_v34  ;;  %vm7424_vm1 = vmmov %vm7391_vm0 }
 0x132   : > { %v1252_v8 = vadd.f32 %v1233_v62, %v1205_v29  ;;  %vm7430_vm7 = vmmov %vm7424_vm1 }
 0x134   : > { %v1109_v9 = vpop.f32.mrf.mxu2  ;;  %v1166_v30 = vpop.f32.mrf.mxu3  ;;  %v1260_v35 = vrot.slane %v1252_v8, 7  ;;  %v4818_v8 = vld [vmem:[#allocation2 + $0x68] sm:$0xff] }
 0x135   : > { %v1126_v31 = vadd.f32 %v1109_v9, %v1069_v59  ;;  %v4813_v59 = vld [vmem:[#allocation2 + $0x50] sm:$0xff]  ;;  %1949 = vmatpush.bf16.msrb.mxu2 %v4818_v8 }
 0x136   : > { %v1274_v25 = vsel %vm1267_vm3, %v1259_v1, %v1260_v35  ;;  %1789 = vmatpush.bf16.msra.mxu3 %v4813_v59 }
 0x137   : > { %v1278_v38 = vmul.f32 %v5655_v24, %v1274_v25  ;;  %v1207_v39 = vpop.f32.mrf.mxu0  ;;  %v1236_v40 = vpop.f32.mrf.mxu1 }
 0x138   : > { %v1208_v41 = vadd.f32 %v1207_v39, %v1166_v30  ;;  %v5718_v39 = vsel %vm556_vm8, 1.0, %v5098_v17  ;;  %vm7431_vm8 = vmmov %vm7424_vm1 }
 0x139   : > { %v5663_v42 = vadd.f32 %v1278_v38, %v1126_v31 }
 0x13a   : > { %v1253_v36 = vadd.f32 %v1236_v40, %v1208_v41  ;;  %4388 = vmatmul.msk.bf16.gmra.mxu0 %vm7417_vm10, %v5511_v16  ;;  %4400 = vmatmul.msk.bf16.gmra.mxu1 %vm7418_vm5, %v5511_v16  ;;  %vm7427_vm10 = vmmov %vm7391_vm0 }
 0x13b   : > { %vm7428_vm5 = vmmov %vm7391_vm0 }
 0x13c   : > { %v1111_v45 = vpop.f32.mrf.mxu2  ;;  %v1168_v46 = vpop.f32.mrf.mxu3  ;;  %v1261_v48 = vrot.slane %v1253_v36, 7 }
 0x13d   : > { %v1127_v50 = vadd.f32 %v1111_v45, %v1071_v10 }
 0x13e   : > { %v1273_v54 = vsel %vm1267_vm3, %v1260_v35, %v1261_v48 }
 0x13f   : > { %v1279_v55 = vmul.f32 %v5675_v49, %v1273_v54  ;;  %v1209_v57 = vpop.f32.mrf.mxu0  ;;  %v1238_v58 = vpop.f32.mrf.mxu1 }
 0x140   : > { %v1210_v63 = vadd.f32 %v1209_v57, %v1168_v46 }
 0x141   : > { %4369 = vmatmul.msk.bf16.gmra.mxu2 %vm7391_vm0, %v5462_v4  ;;  %4373 = vmatmul.msk.bf16.gmra.mxu3 %vm7419_vm6, %v5525_v27  ;;  %v5685_v56 = vadd.f32 %v1279_v55, %v1127_v50  ;;  %vm7429_vm6 = vmmov %vm7424_vm1 }
 0x142   : > { %v1254_v10 = vadd.f32 %v1238_v58, %v1210_v63 }
 0x144   : > { %v1114_v11 = vpop.f32.mrf.mxu2  ;;  %v1171_v32 = vpop.f32.mrf.mxu3  ;;  %v1262_v13 = vrot.slane %v1254_v10, 7 }
 0x145   : > { %v1128_v15 = vadd.f32 %v1114_v11, %v5600_v12  ;;  %v5711_v12 = vadd.s32 48, %v5629_v0 }
 0x146   : > { %v1272_v21 = vsel %vm1267_vm3, %v1261_v48, %v1262_v13 }
 0x147   : > { %v1280_v28 = vmul.f32 %v5696_v44, %v1272_v21  ;;  %v1212_v62 = vpop.f32.mrf.mxu0  ;;  %v1241_v29 = vpop.f32.mrf.mxu1  ;;  %v501_v41 = vand.u32 7, %v5711_v12  ;;  %v459_v21 = vand.u32 7, %v5629_v0 }
 0x148   : > { %v1213_v9 = vadd.f32 %v1212_v62, %v1171_v32 }
 0x149   : > { %v5706_v30 = vadd.f32 %v1280_v28, %v1128_v15  ;;  %vm557_vm14 = vcmp.ge.s32.totalorder %v501_v41, 1  ;;  %v5750_v28 = vadd.s32 8, %v5629_v0  ;;  %vm551_vm4 = vcmp.ge.s32.totalorder %v459_v21, 1 }
 0x14a   : > { %v1255_v35 = vadd.f32 %v1241_v29, %v1213_v9  ;;  %4389 = vmatmul.msk.bf16.gmra.mxu0 %vm7420_vm9, %v5462_v4  ;;  %4401 = vmatmul.msk.bf16.gmra.mxu1 %vm7421_vm11, %v5462_v4  ;;  %v5737_v59 = vsel %vm557_vm14, 1.0, %v5098_v17  ;;  %vm7432_vm9 = vmmov %vm7424_vm1 }
 0x14b   : > { %vm7433_vm11 = vmmov %vm7424_vm1 }
 0x14c   : > { %v1116_v31 = vpop.f32.mrf.mxu2  ;;  %v1173_v25 = vpop.f32.mrf.mxu3  ;;  %v1263_v38 = vrot.slane %v1255_v35, 7  ;;  %vm7436_vm14 = vmmov %vm7424_vm1 }
 0x14d   : > { %v1129_v40 = vadd.f32 %v1116_v31, %v5609_v52  ;;  %v5734_v52 = vadd.s32 56, %v5629_v0  ;;  %v466_v31 = vand.u32 7, %v5750_v28 }
 0x14e   : > { %v1271_v36 = vsel %vm1267_vm3, %v1262_v13, %v1263_v38 }
 0x14f   : > { %v1281_v45 = vmul.f32 %v5718_v39, %v1271_v36  ;;  %v1214_v46 = vpop.f32.mrf.mxu0  ;;  %v1243_v47 = vpop.f32.mrf.mxu1  ;;  %v508_v61 = vand.u32 7, %v5734_v52  ;;  %vm552_vm0 = vcmp.ge.s32.totalorder %v466_v31, 1 }
 0x150   : > { %v1215_v48 = vadd.f32 %v1214_v46, %v1173_v25  ;;  %v5767_v46 = vsel %vm551_vm4, 1.0, %v5098_v17  ;;  %vm7439_vm4 = vmmov %vm7424_vm1 }
 0x151   : > { %4370 = vmatmul.msk.bf16.gmra.mxu2 %vm7422_vm12, %v5501_v60  ;;  %4374 = vmatmul.msk.bf16.gmra.mxu3 %vm7423_vm13, %v5539_v3  ;;  %v5729_v50 = vadd.f32 %v1281_v45, %v1129_v40  ;;  %vm558_vm15 = vcmp.ge.s32.totalorder %v508_v61, 1  ;;  %7426 = vst [vmem:[#allocation9_spill] sm:$0xff] %v5767_v46  ;;  %vm7434_vm12 = vmmov %vm7424_vm1 }
 0x152   : > { %v1256_v54 = vadd.f32 %v1243_v47, %v1215_v48  ;;  %v5757_v9 = vsel %vm558_vm15, 1.0, %v5098_v17  ;;  %v4817_v48 = vld [vmem:[#allocation2 + $0x60] sm:$0xff]  ;;  %vm7435_vm13 = vmmov %vm7424_vm1 }
 0x153   : > { %1950 = vmatpush.bf16.msrb.mxu2 %v4817_v48  ;;  %vm7437_vm15 = vmmov %vm7424_vm1 }
 0x154   : > { %v1119_v55 = vpop.f32.mrf.mxu2  ;;  %v1176_v57 = vpop.f32.mrf.mxu3  ;;  %v1264_v58 = vrot.slane %v1256_v54, 7  ;;  %v5778_v54 = vmul.f32 0.0, %v5767_v46 }
 0x155   : > { %v1130_v63 = vadd.f32 %v1119_v55, %v5615_v53 }
 0x156   : > { %v1270_v10 = vsel %vm1267_vm3, %v1263_v38, %v1264_v58 }
 0x157   : > { %v1282_v11 = vmul.f32 %v5737_v59, %v1270_v10  ;;  %v1217_v32 = vpop.f32.mrf.mxu0  ;;  %v1246_v13 = vpop.f32.mrf.mxu1  ;;  %v5781_v10 = vsel %vm552_vm0, 1.0, %v5098_v17  ;;  %vm7442_vm0 = vmmov %vm7424_vm1 }
 0x158   : > { %v1218_v15 = vadd.f32 %v1217_v32, %v1176_v57 }
 0x159   : > { %v5744_v20 = vadd.f32 %v1282_v11, %v1130_v63 }
 0x15a   : > { %v1257_v53 = vadd.f32 %v1246_v13, %v1218_v15  ;;  %4390 = vmatmul.msk.bf16.gmra.mxu0 %vm7424_vm1, %v5501_v60  ;;  %4402 = vmatmul.msk.bf16.gmra.mxu1 %vm7425_vm2, %v5501_v60  ;;  %vm7438_vm2 = vmmov %vm7424_vm1 }
 0x15c   : > { %v1121_v62 = vpop.f32.mrf.mxu2  ;;  %v1178_v29 = vpop.f32.mrf.mxu3  ;;  %v1265_v8 = vrot.slane %v1257_v53, 7 }
 0x15d   : > { %v1131_v35 = vadd.f32 %v1121_v62, %v5621_v2 }
 0x15e   : > { %v1269_v25 = vsel %vm1267_vm3, %v1264_v58, %v1265_v8 }
 0x15f   : > { %v1283_v38 = vmul.f32 %v5757_v9, %v1269_v25  ;;  %v1219_v40 = vpop.f32.mrf.mxu0  ;;  %v1248_v36 = vpop.f32.mrf.mxu1 }
 0x160   : > { %v1220_v45 = vadd.f32 %v1219_v40, %v1178_v29 }
 0x161   : > { %4403 = vmatmul.msk.bf16.vlgmr.msra.gmra.mxu2 %vm7427_vm10, %v5521_v22  ;;  %4419 = vmatmul.msk.bf16.vlgmr.msra.gmra.mxu3 %vm7428_vm5, %v5488_v6  ;;  %v5773_v2 = vadd.f32 %v1283_v38, %v1131_v35  ;;  %vm7440_vm10 = vmmov %vm7424_vm1 }
 0x162   : > { %v1258_v47 = vadd.f32 %v1248_v36, %v1220_v45  ;;  %vm7441_vm5 = vmmov %vm7424_vm1 }
 0x164   : > { %v1323_v55 = vpop.f32.mrf.mxu2  ;;  %v1364_v57 = vpop.f32.mrf.mxu3  ;;  %v1266_v58 = vrot.slane %v1258_v47, 7 }
 0x165   : > { %v1365_v63 = vadd.f32 %v1364_v57, %v1323_v55 }
 0x166   : > { %v1268_v11 = vsel %vm1267_vm3, %v1265_v8, %v1266_v58  ;;  %v1275_v32 = vsel %vm1267_vm3, %v1266_v58, %v1259_v1 }
 0x167   : > { %v1276_v13 = vmul.f32 %v1268_v11, %v5778_v54  ;;  %v1277_v15 = vmul.f32 %v5781_v10, %v1275_v32  ;;  %v1393_v53 = vpop.f32.mrf.mxu0  ;;  %v5791_v62 = vpop.f32.mrf.mxu1 }
 0x168   : > { %v1413_v29 = vadd.f32 %v1393_v53, %v1365_v63 }
 0x169   : > { %v1285_v35 = vadd.f32 %v1277_v15, %v5640_v26  ;;  %v5795_v25 = vadd.f32 %v1276_v13, %v5627_v14 }
 0x16a   : > { %4431 = vmatmul.msk.bf16.vlgmr.msra.gmra.mxu0 %vm7429_vm6, %v5488_v6  ;;  %4435 = vmatmul.msk.bf16.vlgmr.msra.gmra.mxu1 %vm7430_vm7, %v5521_v22  ;;  %vm7443_vm6 = vmmov %vm7442_vm0 }
 0x16b   : > { %v5801_v7 = vadd.f32 %v1413_v29, %v1285_v35  ;;  %vm7444_vm7 = vmmov %vm7442_vm0 }
 0x16c   : > { %v1325_v1 = vpop.f32.mrf.mxu2  ;;  %v1366_v8 = vpop.f32.mrf.mxu3 }
 0x16d   : > { %v1367_v38 = vadd.f32 %v1366_v8, %v1325_v1 }
 0x16f   : > { %v1395_v40 = vpop.f32.mrf.mxu0  ;;  %v5803_v36 = vpop.f32.mrf.mxu1 }
 0x170   : > { %v1414_v45 = vadd.f32 %v1395_v40, %v1367_v38  ;;  %v4820_v40 = vld [vmem:[%s7330_s3 + $0x78] sm:$0xff] }
 0x171   : > { %4404 = vmatmul.msk.bf16.gmra.mxu2 %vm7431_vm8, %v5535_v34  ;;  %4420 = vmatmul.msk.bf16.gmra.mxu3 %vm7432_vm9, %v5511_v16  ;;  %vm576_vm8 = vcmp.le.s32.totalorder %v466_v31, 6  ;;  %vm7349_vm9 = vcmp.lt.s32.totalorder %v5629_v0, 7 }
 0x172   : > { %v5810_v14 = vadd.f32 %v1414_v45, %v5663_v42  ;;  %v4816_v42 = vld [vmem:[%s7330_s3 + $0x68] sm:$0xff]  ;;  %2151 = vmatpush.bf16.msra.mxu2 %v4820_v40 }
 0x173   : > { %1990 = vmatpush.bf16.msrb.mxu3 %v4816_v42  ;;  %2019 = vmatpush.bf16.msrb.mxu0 %v4816_v42 }
 0x174   : > { %v1328_v26 = vpop.f32.mrf.mxu2  ;;  %v1369_v47 = vpop.f32.mrf.mxu3 }
 0x175   : > { %v1370_v48 = vadd.f32 %v1369_v47, %v1328_v26 }
 0x177   : > { %v1398_v55 = vpop.f32.mrf.mxu0  ;;  %v5812_v57 = vpop.f32.mrf.mxu1 }
 0x178   : > { %v1415_v58 = vadd.f32 %v1398_v55, %v1370_v48  ;;  %v4822_v48 = vld [vmem:[#allocation2 + $0x78] sm:$0xff] }
 0x179   : > { %2110 = vmatpush.bf16.msrb.mxu1 %v4822_v48 }
 0x17a   : > { %v5815_v63 = vadd.f32 %v1415_v58, %v5685_v56  ;;  %4432 = vmatmul.msk.bf16.gmra.mxu0 %vm7433_vm11, %v5511_v16  ;;  %4436 = vmatmul.msk.bf16.gmra.mxu1 %vm7434_vm12, %v5535_v34  ;;  %v4815_v56 = vld [vmem:[%s7330_s3 + $0x60] sm:$0xff]  ;;  %vm7445_vm11 = vmmov %vm7442_vm0 }
 0x17b   : > { %1991 = vmatpush.bf16.msrb.mxu3 %v4815_v56  ;;  %2020 = vmatpush.bf16.msrb.mxu0 %v4815_v56  ;;  %vm7446_vm12 = vmmov %vm7442_vm0 }
 0x17c   : > { %v1330_v11 = vpop.f32.mrf.mxu2  ;;  %v1371_v32 = vpop.f32.mrf.mxu3 }
 0x17d   : > { %v1372_v13 = vadd.f32 %v1371_v32, %v1330_v11 }
 0x17f   : > { %v1400_v15 = vpop.f32.mrf.mxu0  ;;  %v5824_v53 = vpop.f32.mrf.mxu1  ;;  %2180 = vmatpush.bf16.msra.mxu3 %v4820_v40 }
 0x180   : > { %v1416_v29 = vadd.f32 %v1400_v15, %v1372_v13 }
 0x181   : > { %4405 = vmatmul.msk.bf16.gmra.mxu2 %vm7435_vm13, %v5525_v27  ;;  %4421 = vmatmul.msk.bf16.gmra.mxu3 %vm7436_vm14, %v5462_v4  ;;  %vm7447_vm13 = vmmov %vm7442_vm0  ;;  %vm577_vm14 = vcmp.le.s32.totalorder %v473_v23, 6 }
 0x182   : > { %v5834_v35 = vadd.f32 %v1416_v29, %v5706_v30 }
 0x184   : > { %v1333_v1 = vpop.f32.mrf.mxu2  ;;  %v1374_v8 = vpop.f32.mrf.mxu3 }
 0x185   : > { %v1375_v38 = vadd.f32 %v1374_v8, %v1333_v1 }
 0x187   : > { %v1403_v45 = vpop.f32.mrf.mxu0  ;;  %v5839_v26 = vpop.f32.mrf.mxu1 }
 0x188   : > { %v1417_v47 = vadd.f32 %v1403_v45, %v1375_v38 }
 0x18a   : > { %v5842_v55 = vadd.f32 %v1417_v47, %v5729_v50  ;;  %4433 = vmatmul.msk.bf16.gmra.mxu0 %vm7437_vm15, %v5462_v4  ;;  %4437 = vmatmul.msk.bf16.gmra.mxu1 %vm7424_vm1, %v5525_v27  ;;  %vm7448_vm15 = vmmov %vm7442_vm0  ;;  %vm578_vm1 = vcmp.le.s32.totalorder %v480_v37, 6 }
 0x18c   : > { %v1335_v30 = vpop.f32.mrf.mxu2  ;;  %v1376_v58 = vpop.f32.mrf.mxu3 }
 0x18d   : > { %v1377_v42 = vadd.f32 %v1376_v58, %v1335_v30 }
 0x18f   : > { %v1405_v11 = vpop.f32.mrf.mxu0  ;;  %v5848_v32 = vpop.f32.mrf.mxu1 }
 0x190   : > { %v1418_v13 = vadd.f32 %v1405_v11, %v1377_v42 }
 0x191   : > { %4406 = vmatmul.msk.bf16.gmra.mxu2 %vm7438_vm2, %v5539_v3  ;;  %4422 = vmatmul.msk.bf16.gmra.mxu3 %vm7439_vm4, %v5501_v60  ;;  %vm7449_vm2 = vmmov %vm7442_vm0 }
 0x192   : > { %v5855_v50 = vadd.f32 %v1418_v13, %v5744_v20  ;;  %vm7450_vm4 = vmmov %vm7442_vm0 }
 0x194   : > { %v1338_v15 = vpop.f32.mrf.mxu2  ;;  %v1379_v56 = vpop.f32.mrf.mxu3 }
 0x195   : > { %v1380_v29 = vadd.f32 %v1379_v56, %v1338_v15  ;;  %v4819_v56 = vld [vmem:[%s7330_s3 + $0x70] sm:$0xff] }
 0x196   : > { %2152 = vmatpush.bf16.msra.mxu2 %v4819_v56  ;;  %2181 = vmatpush.bf16.msra.mxu3 %v4819_v56 }
 0x197   : > { %v1408_v1 = vpop.f32.mrf.mxu0  ;;  %v5857_v8 = vpop.f32.mrf.mxu1 }
 0x198   : > { %v1419_v38 = vadd.f32 %v1408_v1, %v1380_v29 }
 0x19a   : > { %v5860_v40 = vadd.f32 %v1419_v38, %v5773_v2  ;;  %4434 = vmatmul.msk.bf16.gmra.mxu0 %vm7440_vm10, %v5501_v60  ;;  %4438 = vmatmul.msk.bf16.gmra.mxu1 %vm7441_vm5, %v5539_v3  ;;  %vm7451_vm10 = vmmov %vm7442_vm0  ;;  %vm579_vm5 = vcmp.le.s32.totalorder %v487_v51, 6 }
 0x19c   : > { %v1340_v45 = vpop.f32.mrf.mxu2  ;;  %v1381_v47 = vpop.f32.mrf.mxu3 }
 0x19d   : > { %v1382_v20 = vadd.f32 %v1381_v47, %v1340_v45 }
 0x19f   : > { %v1410_v48 = vpop.f32.mrf.mxu0  ;;  %v5866_v30 = vpop.f32.mrf.mxu1 }
 0x1a0   : > { %v1420_v58 = vadd.f32 %v1410_v48, %v1382_v20 }
 0x1a1   : > { %4451 = vmatmul.msk.bf16.vlgmr.msrb.gmra.mxu2 %vm7442_vm0, %v5488_v6  ;;  %4463 = vmatmul.msk.bf16.vlgmr.msrb.gmra.mxu3 %vm7443_vm6, %v5488_v6  ;;  %vm580_vm6 = vcmp.le.s32.totalorder %v494_v18, 6 }
 0x1a2   : > { %v1421_v2 = vmul.f32 0.0, %v1420_v58 }
 0x1a4   : > { %v1509_v42 = vpop.f32.mrf.mxu2  ;;  %v1538_v11 = vpop.f32.mrf.mxu3  ;;  %v5873_v13 = vadd.f32 %v1421_v2, %v5795_v25 }
 0x1a5   : > { %v1510_v15 = vadd.f32 %v1509_v42, %v5791_v62  ;;  %v4821_v62 = vld [vmem:[#allocation2 + $0x70] sm:$0xff] }
 0x1a6   : > { %2111 = vmatpush.bf16.msrb.mxu1 %v4821_v62  ;;  %v5915_v62 = vsel %vm577_vm14, 1.0, %v5098_v17  ;;  %vm7455_vm14 = vmmov %vm7442_vm0 }
 0x1a7   : > { %v5879_v29 = vadd.f32 %v1538_v11, %v1510_v15  ;;  %v1630_v1 = vpop.f32.mrf.mxu0  ;;  %v1671_v38 = vpop.f32.mrf.mxu1  ;;  %v5895_v11 = vsel %vm576_vm8, 1.0, %v5098_v17  ;;  %vm7453_vm8 = vmmov %vm7442_vm0 }
 0x1a8   : > { %v5881_v45 = vadd.f32 %v1671_v38, %v1630_v1 }
 0x1a9   : > { %v7340_v42 = vrot.slane %v5879_v29, 1 }
 0x1aa   : > { %4467 = vmatmul.msk.bf16.vlgmr.msrb.gmra.mxu0 %vm7444_vm7, %v5521_v22  ;;  %4483 = vmatmul.msk.bf16.vlgmr.msrb.gmra.mxu1 %vm7447_vm13, %v5488_v6  ;;  %vm7452_vm7 = vmmov %vm7442_vm0  ;;  %vm575_vm13 = vcmp.le.s32.totalorder %v459_v21, 6 }
 0x1ac   : > { %v1511_v47 = vpop.f32.mrf.mxu2  ;;  %v1540_v25 = vpop.f32.mrf.mxu3 }
 0x1ad   : > { %v1512_v20 = vadd.f32 %v1511_v47, %v5803_v36 }
 0x1af   : > { %v1559_v48 = vadd.f32 %v1540_v25, %v1512_v20  ;;  %v5889_v58 = vpop.f32.mrf.mxu0  ;;  %v5891_v2 = vpop.f32.mrf.mxu1 }
 0x1b1   : > { %v1567_v15 = vrot.slane %v1559_v48, 1  ;;  %4452 = vmatmul.msk.bf16.gmra.mxu2 %vm7445_vm11, %v5511_v16  ;;  %4464 = vmatmul.msk.bf16.gmra.mxu3 %vm7446_vm12, %v5511_v16  ;;  %vm7454_vm11 = vmmov %vm7442_vm0  ;;  %vm581_vm12 = vcmp.le.s32.totalorder %v501_v41, 6 }
 0x1b3   : > { %v1581_v28 = vsel %vm7349_vm9, %v7340_v42, %v1567_v15 }
 0x1b4   : > { %v1584_v31 = vmul.f32 %v5895_v11, %v1581_v28  ;;  %v1514_v36 = vpop.f32.mrf.mxu2  ;;  %v1543_v56 = vpop.f32.mrf.mxu3 }
 0x1b5   : > { %v1515_v1 = vadd.f32 %v1514_v36, %v5812_v57 }
 0x1b6   : > { %v5910_v38 = vadd.f32 %v1584_v31, %v5801_v7 }
 0x1b7   : > { %v1560_v47 = vadd.f32 %v1543_v56, %v1515_v1  ;;  %v1635_v25 = vpop.f32.mrf.mxu0  ;;  %v1676_v20 = vpop.f32.mrf.mxu1 }
 0x1b8   : > { %v5917_v42 = vadd.f32 %v1676_v20, %v1635_v25 }
 0x1b9   : > { %v1568_v48 = vrot.slane %v1560_v47, 1 }
 0x1ba   : > { %4468 = vmatmul.msk.bf16.gmra.mxu0 %vm7448_vm15, %v5535_v34  ;;  %4484 = vmatmul.msk.bf16.gmra.mxu1 %vm7451_vm10, %v5511_v16  ;;  %vm582_vm15 = vcmp.le.s32.totalorder %v508_v61, 6  ;;  %v7460_v61 = vrot.slane %v5879_v29, 1  ;;  %vm7462_vm10 = vmmov %vm7442_vm0 }
 0x1bb   : > { %v1580_v28 = vsel %vm7349_vm9, %v1567_v15, %v1568_v48  ;;  %v5935_v15 = vsel %vm578_vm1, 1.0, %v5098_v17  ;;  %vm7458_vm1 = vmmov %vm7442_vm0 }
 0x1bc   : > { %v1585_v7 = vmul.f32 %v5915_v62, %v1580_v28  ;;  %v1516_v57 = vpop.f32.mrf.mxu2  ;;  %v1545_v19 = vpop.f32.mrf.mxu3  ;;  %v4824_v28 = vld [vmem:[%s7330_s3 + $0x88] sm:$0xff] }
 0x1bd   : > { %v1517_v23 = vadd.f32 %v1516_v57, %v5824_v53  ;;  %2325 = vmatpush.bf16.msrb.mxu2 %v4824_v28  ;;  %2296 = vmatpush.bf16.msra.mxu1 %v4824_v28  ;;  %v5976_v28 = vsel %vm580_vm6, 1.0, %v5098_v17  ;;  %vm7464_vm6 = vmmov %vm7442_vm0 }
 0x1be   : > { %v5926_v31 = vadd.f32 %v1585_v7, %v5810_v14 }
 0x1bf   : > { %v1561_v36 = vadd.f32 %v1545_v19, %v1517_v23  ;;  %v5930_v56 = vpop.f32.mrf.mxu0  ;;  %v5932_v1 = vpop.f32.mrf.mxu1  ;;  %v5956_v19 = vsel %vm579_vm5, 1.0, %v5098_v17  ;;  %vm7463_vm5 = vmmov %vm7442_vm0 }
 0x1c1   : > { %v1569_v47 = vrot.slane %v1561_v36, 1  ;;  %4453 = vmatmul.msk.bf16.gmra.mxu2 %vm7449_vm2, %v5462_v4  ;;  %4465 = vmatmul.msk.bf16.gmra.mxu3 %vm7450_vm4, %v5462_v4  ;;  %vm7459_vm2 = vmmov %vm7442_vm0 }
 0x1c2   : > { %vm7461_vm4 = vmmov %vm7442_vm0 }
 0x1c3   : > { %v1579_v14 = vsel %vm7349_vm9, %v1568_v48, %v1569_v47 }
 0x1c4   : > { %v1586_v33 = vmul.f32 %v5935_v15, %v1579_v14  ;;  %v1519_v37 = vpop.f32.mrf.mxu2  ;;  %v1548_v53 = vpop.f32.mrf.mxu3 }
 0x1c5   : > { %v1520_v25 = vadd.f32 %v1519_v37, %v5839_v26 }
 0x1c6   : > { %v5948_v20 = vadd.f32 %v1586_v33, %v5815_v63  ;;  %v4826_v63 = vld [vmem:[#allocation2 + $0x88] sm:$0xff] }
 0x1c7   : > { %v1562_v48 = vadd.f32 %v1548_v53, %v1520_v25  ;;  %v1640_v7 = vpop.f32.mrf.mxu0  ;;  %v1681_v57 = vpop.f32.mrf.mxu1  ;;  %2255 = vmatpush.bf16.msra.mxu0 %v4826_v63 }
 0x1c8   : > { %v5958_v26 = vadd.f32 %v1681_v57, %v1640_v7 }
 0x1c9   : > { %v1570_v23 = vrot.slane %v1562_v48, 1 }
 0x1ca   : > { %4469 = vmatmul.msk.bf16.gmra.mxu0 %vm7442_vm0, %v5525_v27  ;;  %4485 = vmatmul.msk.bf16.gmra.mxu1 %vm7454_vm11, %v5462_v4  ;;  %vm7467_vm11 = vmmov %vm7442_vm0 }
 0x1cb   : > { %v1578_v43 = vsel %vm7349_vm9, %v1569_v47, %v1570_v23 }
 0x1cc   : > { %v1587_v51 = vmul.f32 %v5956_v19, %v1578_v43  ;;  %v1521_v36 = vpop.f32.mrf.mxu2  ;;  %v1550_v14 = vpop.f32.mrf.mxu3 }
 0x1cd   : > { %v1522_v33 = vadd.f32 %v1521_v36, %v5848_v32 }
 0x1ce   : > { %v5967_v37 = vadd.f32 %v1587_v51, %v5834_v35 }
 0x1cf   : > { %v1563_v53 = vadd.f32 %v1550_v14, %v1522_v33  ;;  %v5971_v25 = vpop.f32.mrf.mxu0  ;;  %v5973_v47 = vpop.f32.mrf.mxu1 }
 0x1d1   : > { %v1571_v48 = vrot.slane %v1563_v53, 1  ;;  %4454 = vmatmul.msk.bf16.gmra.mxu2 %vm7452_vm7, %v5501_v60  ;;  %4466 = vmatmul.msk.bf16.gmra.mxu3 %vm7453_vm8, %v5501_v60  ;;  %v6007_v53 = vsel %vm575_vm13, 1.0, %v5098_v17  ;;  %vm7465_vm7 = vmmov %vm7442_vm0 }
 0x1d2   : > { %7456 = vst [vmem:[#allocation10_spill] sm:$0xff] %v6007_v53  ;;  %vm7466_vm8 = vmmov %vm7442_vm0 }
 0x1d3   : > { %v1577_v35 = vsel %vm7349_vm9, %v1570_v23, %v1571_v48  ;;  %v5994_v23 = vsel %vm581_vm12, 1.0, %v5098_v17  ;;  %vm7468_vm12 = vmmov %vm7442_vm0 }
 0x1d4   : > { %v1588_v5 = vmul.f32 %v5976_v28, %v1577_v35  ;;  %v1524_v18 = vpop.f32.mrf.mxu2  ;;  %v1553_v32 = vpop.f32.mrf.mxu3  ;;  %vm7469_vm13 = vmmov %vm7442_vm0 }
 0x1d5   : > { %v1525_v7 = vadd.f32 %v1524_v18, %v5857_v8 }
 0x1d6   : > { %v5989_v57 = vadd.f32 %v1588_v5, %v5842_v55 }
 0x1d7   : > { %v1564_v63 = vadd.f32 %v1553_v32, %v1525_v7  ;;  %v1645_v43 = vpop.f32.mrf.mxu0  ;;  %v1686_v51 = vpop.f32.mrf.mxu1  ;;  %v6022_v32 = vsel %vm582_vm15, 1.0, %v5098_v17  ;;  %vm7471_vm15 = vmmov %vm7442_vm0 }
 0x1d8   : > { %v5996_v14 = vadd.f32 %v1686_v51, %v1645_v43  ;;  %7457 = vst [vmem:[#allocation11_spill] sm:$0xff] %v6022_v32 }
 0x1d9   : > { %v1572_v36 = vrot.slane %v1564_v63, 1 }
 0x1da   : > { %4470 = vmatmul.msk.bf16.gmra.mxu0 %vm7455_vm14, %v5539_v3  ;;  %4486 = vmatmul.msk.bf16.gmra.mxu1 %vm7461_vm4, %v5501_v60  ;;  %vm7470_vm14 = vmmov %vm7442_vm0 }
 0x1db   : > { %v1576_v8 = vsel %vm7349_vm9, %v1571_v48, %v1572_v36  ;;  %v6015_v48 = vmul.f32 0.0, %v6007_v53  ;;  %vm7474_vm4 = vmmov %vm7442_vm0 }
 0x1dc   : > { %v1589_v12 = vmul.f32 %v5994_v23, %v1576_v8  ;;  %v1526_v41 = vpop.f32.mrf.mxu2  ;;  %v1555_v55 = vpop.f32.mrf.mxu3 }
 0x1dd   : > { %v1527_v33 = vadd.f32 %v1526_v41, %v5866_v30  ;;  %v4823_v41 = vld [vmem:[%s7330_s3 + $0x80] sm:$0xff] }
 0x1de   : > { %v6010_v35 = vadd.f32 %v1589_v12, %v5855_v50  ;;  %2326 = vmatpush.bf16.msrb.mxu2 %v4823_v41  ;;  %2297 = vmatpush.bf16.msra.mxu1 %v4823_v41 }
 0x1df   : > { %v1565_v21 = vadd.f32 %v1555_v55, %v1527_v33  ;;  %v6017_v5 = vpop.f32.mrf.mxu0  ;;  %v6019_v18 = vpop.f32.mrf.mxu1  ;;  %v1674_v33 = vadd.f32 %v5891_v2, %v5889_v58 }
 0x1e1   : > { %v1573_v30 = vrot.slane %v1565_v21, 1  ;;  %4495 = vmatmul.msk.bf16.vlgmr.msra.gmra.mxu2 %vm7458_vm1, %v5488_v6  ;;  %4499 = vmatmul.msk.bf16.vlgmr.msra.gmra.mxu3 %vm7459_vm2, %v5521_v22  ;;  %vm7472_vm1 = vmmov %vm7442_vm0 }
 0x1e2   : > { %vm7473_vm2 = vmmov %vm7442_vm0 }
 0x1e3   : > { %v1575_v52 = vsel %vm7349_vm9, %v1572_v36, %v1573_v30  ;;  %v1582_v50 = vsel %vm7349_vm9, %v1573_v30, %v7460_v61  ;;  %v4825_v30 = vld [vmem:[#allocation2 + $0x80] sm:$0xff] }
 0x1e4   : > { %v1583_v17 = vmul.f32 %v1582_v50, %v6015_v48  ;;  %v1590_v7 = vmul.f32 %v6022_v32, %v1575_v52  ;;  %v1700_v63 = vpop.f32.mrf.mxu2  ;;  %v1791_v43 = vpop.f32.mrf.mxu3  ;;  %2256 = vmatpush.bf16.msra.mxu0 %v4825_v30 }
 0x1e5   : > { %v6039_v51 = vadd.f32 %v1700_v63, %v5881_v45 }
 0x1e6   : > { %v6042_v8 = vadd.f32 %v1583_v17, %v5873_v13  ;;  %v6045_v29 = vadd.f32 %v1590_v7, %v5860_v40 }
 0x1e7   : > { %v1832_v36 = vpop.f32.mrf.mxu0  ;;  %v1861_v12 = vpop.f32.mrf.mxu1  ;;  %v1728_v40 = vrot.slane %v6039_v51, 7 }
 0x1e8   : > { %v1833_v55 = vadd.f32 %v1832_v36, %v1791_v43 }
 0x1ea   : > { %v6052_v45 = vadd.f32 %v1861_v12, %v1833_v55  ;;  %4515 = vmatmul.msk.bf16.vlgmr.msra.gmra.mxu0 %vm7442_vm0, %v5488_v6  ;;  %4527 = vmatmul.msk.bf16.vlgmr.msra.gmra.mxu1 %vm7464_vm6, %v5488_v6  ;;  %v1679_v6 = vadd.f32 %v5932_v1, %v5930_v56  ;;  %vm7477_vm6 = vmmov %vm7442_vm0 }
 0x1ec   : > { %v1702_v21 = vpop.f32.mrf.mxu2  ;;  %v1793_v13 = vpop.f32.mrf.mxu3 }
 0x1ed   : > { %v1721_v52 = vadd.f32 %v1702_v21, %v1674_v33 }
 0x1ef   : > { %v1729_v61 = vrot.slane %v1721_v52, 7  ;;  %v1834_v50 = vpop.f32.mrf.mxu0  ;;  %v1863_v17 = vpop.f32.mrf.mxu1 }
 0x1f0   : > { %v1835_v2 = vadd.f32 %v1834_v50, %v1793_v13 }
 0x1f1   : > { %v1742_v7 = vsel %vm1267_vm3, %v1728_v40, %v1729_v61  ;;  %4496 = vmatmul.msk.bf16.gmra.mxu2 %vm7462_vm10, %v5511_v16  ;;  %4500 = vmatmul.msk.bf16.gmra.mxu3 %vm7463_vm5, %v5535_v34  ;;  %vm7475_vm10 = vmmov %vm7442_vm0 }
 0x1f2   : > { %v1745_v58 = vmul.f32 %v5781_v10, %v1742_v7  ;;  %v6070_v41 = vadd.f32 %v1863_v17, %v1835_v2  ;;  %vm7476_vm5 = vmmov %vm7442_vm0 }
 0x1f4   : > { %v1705_v63 = vpop.f32.mrf.mxu2  ;;  %v1796_v43 = vpop.f32.mrf.mxu3  ;;  %v1753_v36 = vadd.f32 %v1745_v58, %v5910_v38  ;;  %v1890_v50 = vrot.slane %v6070_v41, 1 }
 0x1f5   : > { %v1722_v12 = vadd.f32 %v1705_v63, %v5917_v42 }
 0x1f7   : > { %v1730_v55 = vrot.slane %v1722_v12, 7  ;;  %v1837_v33 = vpop.f32.mrf.mxu0  ;;  %v1866_v21 = vpop.f32.mrf.mxu1 }
 0x1f8   : > { %v1838_v52 = vadd.f32 %v1837_v33, %v1796_v43 }
 0x1f9   : > { %v1741_v30 = vsel %vm1267_vm3, %v1729_v61, %v1730_v55 }
 0x1fa   : > { %v1746_v13 = vmul.f32 %v5655_v24, %v1741_v30  ;;  %v1883_v7 = vadd.f32 %v1866_v21, %v1838_v52  ;;  %4516 = vmatmul.msk.bf16.gmra.mxu0 %vm7467_vm11, %v5511_v16  ;;  %4528 = vmatmul.msk.bf16.gmra.mxu1 %vm7468_vm12, %v5511_v16  ;;  %vm7481_vm11 = vmmov %vm7442_vm0 }
 0x1fb   : > { %vm7482_vm12 = vmmov %vm7442_vm0 }
 0x1fc   : > { %v1754_v38 = vadd.f32 %v1746_v13, %v5926_v31  ;;  %v1707_v42 = vpop.f32.mrf.mxu2  ;;  %v1798_v17 = vpop.f32.mrf.mxu3  ;;  %v1891_v58 = vrot.slane %v1883_v7, 1 }
 0x1fd   : > { %v1723_v2 = vadd.f32 %v1707_v42, %v1679_v6 }
 0x1fe   : > { %v1902_v61 = vsel %vm7349_vm9, %v1890_v50, %v1891_v58 }
 0x1ff   : > { %v1731_v63 = vrot.slane %v1723_v2, 7  ;;  %v1906_v43 = vmul.f32 %v5895_v11, %v1902_v61  ;;  %v1839_v12 = vpop.f32.mrf.mxu0  ;;  %v1868_v33 = vpop.f32.mrf.mxu1 }
 0x200   : > { %v1840_v1 = vadd.f32 %v1839_v12, %v1798_v17 }
 0x201   : > { %v1740_v56 = vsel %vm1267_vm3, %v1730_v55, %v1731_v63  ;;  %4497 = vmatmul.msk.bf16.gmra.mxu2 %vm7465_vm7, %v5462_v4  ;;  %4501 = vmatmul.msk.bf16.gmra.mxu3 %vm7466_vm8, %v5525_v27  ;;  %v6093_v21 = vadd.f32 %v1906_v43, %v1753_v36  ;;  %vm7479_vm7 = vmmov %vm7442_vm0 }
 0x202   : > { %v1747_v31 = vmul.f32 %v5675_v49, %v1740_v56  ;;  %v1884_v30 = vadd.f32 %v1868_v33, %v1840_v1  ;;  %vm7480_vm8 = vmmov %vm7442_vm0 }
 0x204   : > { %v1710_v52 = vpop.f32.mrf.mxu2  ;;  %v1801_v55 = vpop.f32.mrf.mxu3  ;;  %v1755_v13 = vadd.f32 %v1747_v31, %v5948_v20  ;;  %v1892_v6 = vrot.slane %v1884_v30, 1  ;;  %v1684_v20 = vadd.f32 %v5973_v47, %v5971_v25 }
 0x205   : > { %v1724_v7 = vadd.f32 %v1710_v52, %v5958_v26 }
 0x206   : > { %v1901_v42 = vsel %vm7349_vm9, %v1891_v58, %v1892_v6 }
 0x207   : > { %v1732_v17 = vrot.slane %v1724_v7, 7  ;;  %v1907_v2 = vmul.f32 %v5915_v62, %v1901_v42  ;;  %v1842_v61 = vpop.f32.mrf.mxu0  ;;  %v1871_v36 = vpop.f32.mrf.mxu1 }
 0x208   : > { %v1843_v12 = vadd.f32 %v1842_v61, %v1801_v55 }
 0x209   : > { %v1739_v43 = vsel %vm1267_vm3, %v1731_v63, %v1732_v17  ;;  %v6105_v33 = vadd.f32 %v1907_v2, %v1754_v38 }
 0x20a   : > { %v1748_v16 = vmul.f32 %v5696_v44, %v1739_v43  ;;  %v1885_v26 = vadd.f32 %v1871_v36, %v1843_v12  ;;  %4517 = vmatmul.msk.bf16.gmra.mxu0 %vm7471_vm15, %v5462_v4  ;;  %4529 = vmatmul.msk.bf16.gmra.mxu1 %vm7472_vm1, %v5462_v4  ;;  %vm7486_vm15 = vmmov %vm7442_vm0 }
 0x20b   : > { %vm7487_vm1 = vmmov %vm7442_vm0 }
 0x20c   : > { %v1756_v56 = vadd.f32 %v1748_v16, %v5967_v37  ;;  %v1712_v58 = vpop.f32.mrf.mxu2  ;;  %v1803_v1 = vpop.f32.mrf.mxu3  ;;  %v1893_v31 = vrot.slane %v1885_v26, 1 }
 0x20d   : > { %v1725_v30 = vadd.f32 %v1712_v58, %v1684_v20 }
 0x20e   : > { %v1900_v52 = vsel %vm7349_vm9, %v1892_v6, %v1893_v31 }
 0x20f   : > { %v1733_v7 = vrot.slane %v1725_v30, 7  ;;  %v1908_v63 = vmul.f32 %v5935_v15, %v1900_v52  ;;  %v1844_v55 = vpop.f32.mrf.mxu0  ;;  %v1873_v42 = vpop.f32.mrf.mxu1 }
 0x210   : > { %v1845_v2 = vadd.f32 %v1844_v55, %v1803_v1 }
 0x211   : > { %v1738_v38 = vsel %vm1267_vm3, %v1732_v17, %v1733_v7  ;;  %4498 = vmatmul.msk.bf16.gmra.mxu2 %vm7469_vm13, %v5501_v60  ;;  %4502 = vmatmul.msk.bf16.gmra.mxu3 %vm7470_vm14, %v5539_v3  ;;  %v6122_v25 = vadd.f32 %v1908_v63, %v1755_v13  ;;  %vm7484_vm13 = vmmov %vm7442_vm0 }
 0x212   : > { %v1749_v37 = vmul.f32 %v5718_v39, %v1738_v38  ;;  %v1886_v47 = vadd.f32 %v1873_v42, %v1845_v2  ;;  %vm7485_vm14 = vmmov %vm7442_vm0 }
 0x214   : > { %v1715_v6 = vpop.f32.mrf.mxu2  ;;  %v1806_v17 = vpop.f32.mrf.mxu3  ;;  %v1757_v61 = vadd.f32 %v1749_v37, %v5989_v57  ;;  %v1894_v36 = vrot.slane %v1886_v47, 1  ;;  %v1689_v57 = vadd.f32 %v6019_v18, %v6017_v5 }
 0x215   : > { %v1726_v43 = vadd.f32 %v1715_v6, %v5996_v14  ;;  %v1889_v14 = vrot.slane %v6052_v45, 1 }
 0x216   : > { %v1899_v12 = vsel %vm7349_vm9, %v1893_v31, %v1894_v36 }
 0x217   : > { %v1734_v16 = vrot.slane %v1726_v43, 7  ;;  %v1909_v20 = vmul.f32 %v5956_v19, %v1899_v12  ;;  %v1847_v26 = vpop.f32.mrf.mxu0  ;;  %v1876_v13 = vpop.f32.mrf.mxu1 }
 0x218   : > { %v1848_v1 = vadd.f32 %v1847_v26, %v1806_v17 }
 0x219   : > { %v1737_v58 = vsel %vm1267_vm3, %v1733_v7, %v1734_v16  ;;  %v6134_v30 = vadd.f32 %v1909_v20, %v1756_v56  ;;  %v1903_v7 = vsel %vm7349_vm9, %v1889_v14, %v1890_v50 }
 0x21a   : > { %v1750_v4 = vmul.f32 %v5737_v59, %v1737_v58  ;;  %v1887_v52 = vadd.f32 %v1876_v13, %v1848_v1  ;;  %v1905_v50 = vmul.f32 %v6007_v53, %v1903_v7  ;;  %4518 = vmatmul.msk.bf16.gmra.mxu0 %vm7474_vm4, %v5501_v60  ;;  %4530 = vmatmul.msk.bf16.gmra.mxu1 %vm7475_vm10, %v5501_v60  ;;  %vm7489_vm4 = vmmov %vm7442_vm0 }
 0x21b   : > { %vm7490_vm10 = vmmov %vm7442_vm0 }
 0x21c   : > { %v1758_v31 = vadd.f32 %v1750_v4, %v6010_v35  ;;  %v1717_v63 = vpop.f32.mrf.mxu2  ;;  %v1808_v55 = vpop.f32.mrf.mxu3  ;;  %v1895_v42 = vrot.slane %v1887_v52, 1 }
 0x21d   : > { %v1727_v38 = vadd.f32 %v1717_v63, %v1689_v57 }
 0x21e   : > { %v1898_v56 = vsel %vm7349_vm9, %v1894_v36, %v1895_v42 }
 0x21f   : > { %v1735_v2 = vrot.slane %v1727_v38, 7  ;;  %v1910_v5 = vmul.f32 %v5976_v28, %v1898_v56  ;;  %v1849_v18 = vpop.f32.mrf.mxu0  ;;  %v1878_v45 = vpop.f32.mrf.mxu1 }
 0x220   : > { %v1850_v41 = vadd.f32 %v1849_v18, %v1808_v55 }
 0x221   : > { %v1736_v35 = vsel %vm1267_vm3, %v1734_v16, %v1735_v2  ;;  %v1743_v37 = vsel %vm1267_vm3, %v1735_v2, %v1728_v40  ;;  %4531 = vmatmul.msk.bf16.vlgmr.msrb.gmra.mxu2 %vm7473_vm2, %v5521_v22  ;;  %v6160_v17 = vadd.f32 %v1910_v5, %v1757_v61  ;;  %vm7488_vm2 = vmmov %vm7442_vm0 }
 0x222   : > { %v1744_v47 = vmul.f32 %v5767_v46, %v1743_v37  ;;  %v1751_v6 = vmul.f32 %v5757_v9, %v1736_v35  ;;  %v1888_v36 = vadd.f32 %v1878_v45, %v1850_v41 }
 0x224   : > { %v1952_v51 = vpop.f32.mrf.mxu2  ;;  %v1993_v40 = vpop.f32.mrf.mxu3  ;;  %v1759_v43 = vadd.f32 %v1751_v6, %v6045_v29  ;;  %v1752_v22 = vadd.f32 %v1744_v47, %v6042_v8  ;;  %v1896_v12 = vrot.slane %v1888_v36, 1 }
 0x225   : > { %v1994_v16 = vadd.f32 %v1993_v40, %v1952_v51 }
 0x226   : > { %v1913_v20 = vadd.f32 %v1905_v50, %v1752_v22  ;;  %v1897_v26 = vsel %vm7349_vm9, %v1895_v42, %v1896_v12  ;;  %v1904_v61 = vsel %vm7349_vm9, %v1896_v12, %v1889_v14 }
 0x227   : > { %v1911_v13 = vmul.f32 %v5994_v23, %v1897_v26  ;;  %v1912_v58 = vmul.f32 %v6022_v32, %v1904_v61  ;;  %v2022_v60 = vpop.f32.mrf.mxu0  ;;  %v2113_v40 = vpop.f32.mrf.mxu1 }
 0x228   : > { %v6172_v1 = vadd.f32 %v2022_v60, %v1994_v16 }
 0x229   : > { %v6174_v4 = vadd.f32 %v1912_v58, %v1759_v43  ;;  %v6176_v29 = vadd.f32 %v1911_v13, %v1758_v31 }
 0x22a   : > { %v2050_v14 = vrot.slane %v6172_v1, 7 }
 0x22c   : > { %v1954_v8 = vpop.f32.mrf.mxu2  ;;  %v1995_v57 = vpop.f32.mrf.mxu3 }
 0x22d   : > { %v1996_v52 = vadd.f32 %v1995_v57, %v1954_v8 }
 0x22f   : > { %v2024_v63 = vpop.f32.mrf.mxu0  ;;  %v6202_v60 = vpop.f32.mrf.mxu1 }
 0x230   : > { %v2043_v55 = vadd.f32 %v2024_v63, %v1996_v52 }
 0x231   : > { %4532 = vmatmul.msk.bf16.gmra.mxu2 %vm7476_vm5, %v5535_v34  ;;  %vm7491_vm5 = vmmov %vm7442_vm0 }
 0x232   : > { %v2051_v42 = vrot.slane %v2043_v55, 7 }
 0x234   : > { %v1957_v38 = vpop.f32.mrf.mxu2  ;;  %v1998_v7 = vpop.f32.mrf.mxu3  ;;  %v2064_v56 = vsel %vm1267_vm3, %v2050_v14, %v2051_v42 }
 0x235   : > { %v1999_v31 = vadd.f32 %v1998_v7, %v1957_v38  ;;  %v2066_v2 = vmul.f32 %v5767_v46, %v2064_v56 }
 0x237   : > { %v2027_v5 = vpop.f32.mrf.mxu0  ;;  %v6186_v18 = vadd.f32 %v2066_v2, %v1913_v20 }
 0x238   : > { %v2044_v45 = vadd.f32 %v2027_v5, %v1999_v31  ;;  %v2118_v5 = vpop.f32.mrf.mxu1 }
 0x23a   : > { %v2052_v35 = vrot.slane %v2044_v45, 7 }
 0x23c   : > { %v1959_v37 = vpop.f32.mrf.mxu2  ;;  %v2000_v34 = vpop.f32.mrf.mxu3  ;;  %v2063_v41 = vsel %vm1267_vm3, %v2051_v42, %v2052_v35 }
 0x23d   : > { %v2001_v50 = vadd.f32 %v2000_v34, %v1959_v37  ;;  %v2067_v47 = vmul.f32 %v5781_v10, %v2063_v41 }
 0x23f   : > { %v2029_v6 = vpop.f32.mrf.mxu0  ;;  %v6192_v36 = vadd.f32 %v2067_v47, %v6093_v21 }
 0x240   : > { %v2045_v51 = vadd.f32 %v2029_v6, %v2001_v50 }
 0x241   : > { %4533 = vmatmul.msk.bf16.gmra.mxu2 %vm7442_vm0, %v5525_v27 }
 0x242   : > { %v2053_v43 = vrot.slane %v2045_v51, 7  ;;  %v6219_v51 = vpop.f32.mrf.mxu1 }
 0x244   : > { %v1962_v22 = vpop.f32.mrf.mxu2  ;;  %v2003_v12 = vpop.f32.mrf.mxu3  ;;  %v2062_v16 = vsel %vm1267_vm3, %v2052_v35, %v2053_v43 }
 0x245   : > { %v2004_v20 = vadd.f32 %v2003_v12, %v1962_v22  ;;  %v2068_v26 = vmul.f32 %v5655_v24, %v2062_v16  ;;  %v6223_v16 = vmul.f32 0.0, %v5757_v9 }
 0x247   : > { %v2032_v61 = vpop.f32.mrf.mxu0  ;;  %v6200_v13 = vadd.f32 %v2068_v26, %v6105_v33  ;;  %7478 = vst [vmem:[#allocation12_spill] sm:$0xff] %v6223_v16 }
 0x248   : > { %v2046_v21 = vadd.f32 %v2032_v61, %v2004_v20 }
 0x24a   : > { %v2054_v58 = vrot.slane %v2046_v21, 7 }
 0x24c   : > { %v1964_v8 = vpop.f32.mrf.mxu2  ;;  %v2005_v27 = vpop.f32.mrf.mxu3  ;;  %v2061_v57 = vsel %vm1267_vm3, %v2053_v43, %v2054_v58 }
 0x24d   : > { %v2006_v52 = vadd.f32 %v2005_v27, %v1964_v8  ;;  %v2069_v63 = vmul.f32 %v5675_v49, %v2061_v57 }
 0x24f   : > { %v2034_v55 = vpop.f32.mrf.mxu0  ;;  %v2077_v42 = vadd.f32 %v2069_v63, %v6122_v25 }
 0x250   : > { %v2047_v38 = vadd.f32 %v2034_v55, %v2006_v52  ;;  %v2123_v55 = vpop.f32.mrf.mxu1 }
 0x251   : > { %4534 = vmatmul.msk.bf16.gmra.mxu2 %vm7477_vm6, %v5539_v3  ;;  %vm7492_vm6 = vmmov %vm7442_vm0 }
 0x252   : > { %v2055_v33 = vrot.slane %v2047_v38, 7 }
 0x254   : > { %v1967_v7 = vpop.f32.mrf.mxu2  ;;  %v2008_v56 = vpop.f32.mrf.mxu3  ;;  %v2060_v31 = vsel %vm1267_vm3, %v2054_v58, %v2055_v33 }
 0x255   : > { %v2009_v2 = vadd.f32 %v2008_v56, %v1967_v7  ;;  %v2070_v45 = vmul.f32 %v5696_v44, %v2060_v31 }
 0x257   : > { %v2037_v35 = vpop.f32.mrf.mxu0  ;;  %v6214_v37 = vadd.f32 %v2070_v45, %v6134_v30 }
 0x258   : > { %v2048_v34 = vadd.f32 %v2037_v35, %v2009_v2  ;;  %v6239_v7 = vpop.f32.mrf.mxu1 }
 0x25a   : > { %v2056_v25 = vrot.slane %v2048_v34, 7 }
 0x25c   : > { %v1969_v41 = vpop.f32.mrf.mxu2  ;;  %v2010_v50 = vpop.f32.mrf.mxu3  ;;  %v2059_v3 = vsel %vm1267_vm3, %v2055_v33, %v2056_v25 }
 0x25d   : > { %v2011_v47 = vadd.f32 %v2010_v50, %v1969_v41  ;;  %v2071_v6 = vmul.f32 %v5718_v39, %v2059_v3 }
 0x25f   : > { %v2039_v43 = vpop.f32.mrf.mxu0  ;;  %v2079_v22 = vadd.f32 %v2071_v6, %v6160_v17 }
 0x260   : > { %v2049_v12 = vadd.f32 %v2039_v43, %v2011_v47 }
 0x262   : > { %v2057_v30 = vrot.slane %v2049_v12, 7 }
 0x264   : > { %v2154_v20 = vpop.f32.mrf.mxu2  ;;  %v2183_v26 = vpop.f32.mrf.mxu3  ;;  %v2058_v61 = vsel %vm1267_vm3, %v2056_v25, %v2057_v30  ;;  %v2065_v21 = vsel %vm1267_vm3, %v2057_v30, %v2050_v14 }
 0x265   : > { %v2155_v58 = vadd.f32 %v2154_v20, %v2113_v40  ;;  %v2073_v8 = vmul.f32 %v2065_v21, %v6223_v16  ;;  %v2072_v17 = vmul.f32 %v5737_v59, %v2058_v61  ;;  %v4838_v16 = vld [vmem:[#allocation6 + $0x18] sm:$0xff] }
 0x267   : > { %v2203_v27 = vadd.f32 %v2183_v26, %v2155_v58  ;;  %v2081_v57 = vadd.f32 %v2073_v8, %v6174_v4  ;;  %v6235_v52 = vadd.f32 %v2072_v17, %v6176_v29  ;;  %v2128_v4 = vpop.f32.mrf.mxu1 }
 0x269   : > { %v2218_v63 = vmul.f32 0.0, %v2203_v27 }
 0x26b   : > { %v6237_v38 = vadd.f32 %v2218_v63, %v2081_v57 }
 0x26c   : > { %v2156_v33 = vpop.f32.mrf.mxu2  ;;  %v2185_v1 = vpop.f32.mrf.mxu3 }
 0x26f   : > { %v6244_v50 = vpop.f32.mrf.mxu1 }
 0x274   : > { %v2159_v14 = vpop.f32.mrf.mxu2  ;;  %v2188_v40 = vpop.f32.mrf.mxu3 }
 0x275   : > { %v2160_v56 = vadd.f32 %v2159_v14, %v2118_v5  ;;  %v6252_v5 = vpop.f32.mrf.mxu0 }
 0x277   : > { %v2205_v31 = vadd.f32 %v2188_v40, %v2160_v56  ;;  %v6254_v43 = vpop.f32.mrf.mxu1  ;;  %v2157_v56 = vadd.f32 %v2156_v33, %v6202_v60 }
 0x279   : > { %v2220_v2 = vadd.f32 %v2205_v31, %v6192_v36 }
 0x27c   : > { %v2161_v45 = vpop.f32.mrf.mxu2  ;;  %v6242_v35 = vpop.f32.mrf.mxu3 }
 0x27d   : > { %v2260_v61 = vpop.f32.mrf.mxu0 }
 0x27f   : > { %v2301_v58 = vpop.f32.mrf.mxu1 }
 0x284   : > { %v2164_v29 = vpop.f32.mrf.mxu2  ;;  %v2193_v34 = vpop.f32.mrf.mxu3 }
 0x285   : > { %v2165_v25 = vadd.f32 %v2164_v29, %v2123_v55  ;;  %v2263_v8 = vpop.f32.mrf.mxu0  ;;  %v2302_v55 = vadd.f32 %v2301_v58, %v2260_v61 }
 0x287   : > { %v2207_v41 = vadd.f32 %v2193_v34, %v2165_v25  ;;  %v2304_v17 = vpop.f32.mrf.mxu1  ;;  %v2204_v34 = vadd.f32 %v2185_v1, %v2157_v56  ;;  %v6275_v1 = vld [vmem:[%s7332_s5] ss:$0 sm:$0xff] }
 0x288   : > { %v2305_v14 = vadd.f32 %v2304_v17, %v2263_v8 }
 0x289   : > { %v6246_v3 = vadd.f32 %v2207_v41, %v2077_v42 }
 0x28c   : > { %v6248_v47 = vpop.f32.mrf.mxu2  ;;  %v6250_v6 = vpop.f32.mrf.mxu3 }
 0x28d   : > { %v2265_v57 = vpop.f32.mrf.mxu0 }
 0x28f   : > { %v2306_v63 = vpop.f32.mrf.mxu1 }
 0x294   : > { %v2169_v36 = vpop.f32.mrf.mxu2  ;;  %v2198_v12 = vpop.f32.mrf.mxu3 }
 0x295   : > { %v2170_v30 = vadd.f32 %v2169_v36, %v2128_v4  ;;  %v2268_v41 = vpop.f32.mrf.mxu0 }
 0x297   : > { %v2209_v20 = vadd.f32 %v2198_v12, %v2170_v30  ;;  %v2309_v12 = vpop.f32.mrf.mxu1  ;;  %v2307_v30 = vadd.f32 %v2306_v63, %v2265_v57 }
 0x298   : > { %v2310_v8 = vadd.f32 %v2309_v12, %v2268_v41 }
 0x299   : > { %v6256_v26 = vadd.f32 %v2209_v20, %v2079_v22  ;;  %v2219_v20 = vadd.f32 %v2204_v34, %v6186_v18 }
 0x29c   : > { %v6258_v21 = vpop.f32.mrf.mxu2 }
 0x29d   : > { %v2270_v63 = vpop.f32.mrf.mxu0 }
 0x2a4   : > { %v6260_v42 = vpop.f32.mrf.mxu2 }
 0x2ac   : > { %v2330_v27 = vpop.f32.mrf.mxu2 }
 0x2ad   : > { %v6262_v40 = vadd.f32 %v2330_v27, %v2302_v55  ;;  %v2311_v55 = vpop.f32.mrf.mxu1 }
 0x2af   : > { %v2357_v4 = vrot.slane %v6262_v40, 1 }
 0x2b4   : > { %v2333_v31 = vpop.f32.mrf.mxu2 }
 0x2b5   : > { %v2350_v22 = vadd.f32 %v2333_v31, %v2305_v14  ;;  %v2162_v31 = vadd.f32 %v2161_v45, %v6219_v51 }
 0x2b7   : > { %v2358_v29 = vrot.slane %v2350_v22, 1  ;;  %v2206_v45 = vadd.f32 %v6242_v35, %v2162_v31 }
 0x2b9   : > { %v2369_v25 = vsel %vm7349_vm9, %v2357_v4, %v2358_v29 }
 0x2ba   : > { %v2372_v36 = vmul.f32 %v6007_v53, %v2369_v25 }
 0x2bc   : > { %v2335_v61 = vpop.f32.mrf.mxu2  ;;  %v2380_v33 = vadd.f32 %v2372_v36, %v2219_v20 }
 0x2bd   : > { %v2351_v60 = vadd.f32 %v2335_v61, %v2307_v30  ;;  %v2312_v61 = vadd.f32 %v2311_v55, %v2270_v63  ;;  %v2167_v63 = vadd.f32 %v6248_v47, %v6239_v7  ;;  %v2172_v7 = vadd.f32 %v6258_v21, %v6244_v50 }
 0x2be   : > { %v6280_v27 = vadd.f32 %v6275_v1, %v2380_v33 }
 0x2bf   : > { %v2359_v58 = vrot.slane %v2351_v60, 1 }
 0x2c0   : > { %v2421_v22 = vmul.f32 %v6280_v27, %v6280_v27 }
 0x2c1   : > { %v2368_v17 = vsel %vm7349_vm9, %v2358_v29, %v2359_v58  ;;  %v2400_v29 = vsel %vm7479_vm7, %v6280_v27, 0.0  ;;  %vm7493_vm7 = vmmov %vm7442_vm0 }
 0x2c2   : > { %v2373_v57 = vmul.f32 %v5895_v11, %v2368_v17  ;;  %v2429_v12 = vsel %vm7481_vm11, %v2421_v22, 0.0  ;;  %v2221_v17 = vadd.f32 %v2206_v45, %v6200_v13 }
 0x2c4   : > { %v2381_v18 = vadd.f32 %v2373_v57, %v2220_v2  ;;  %v2338_v14 = vpop.f32.mrf.mxu2  ;;  %v2273_v57 = vpop.f32.mrf.mxu0 }
 0x2c5   : > { %v2352_v56 = vadd.f32 %v2338_v14, %v2310_v8 }
 0x2c6   : > { %v6287_v34 = vadd.f32 %v6275_v1, %v2381_v18  ;;  %v2314_v18 = vpop.f32.mrf.mxu1 }
 0x2c7   : > { %v2360_v25 = vrot.slane %v2352_v56, 1  ;;  %v2315_v35 = vadd.f32 %v2314_v18, %v2273_v57 }
 0x2c8   : > { %v2401_v41 = vsel %vm7480_vm8, %v6287_v34, 0.0  ;;  %v2422_v2 = vmul.f32 %v6287_v34, %v6287_v34  ;;  %vm7494_vm8 = vmmov %vm7442_vm0 }
 0x2c9   : > { %v2402_v36 = vadd.f32 %v2401_v41, %v2400_v29  ;;  %v2367_v51 = vsel %vm7349_vm9, %v2359_v58, %v2360_v25  ;;  %v2300_v58 = vadd.f32 %v6254_v43, %v6252_v5  ;;  %v2208_v5 = vadd.f32 %v6250_v6, %v2167_v63 }
 0x2ca   : > { %v2430_v30 = vsel %vm7482_vm12, %v2422_v2, 0.0  ;;  %v2374_v60 = vmul.f32 %v5915_v62, %v2367_v51 }
 0x2cb   : > { %v2431_v20 = vadd.f32 %v2430_v30, %v2429_v12  ;;  %v2348_v41 = vadd.f32 %v6260_v42, %v2300_v58  ;;  %v2200_v12 = vpop.f32.mrf.mxu3  ;;  %v6323_v30 = vmul.f32 0.0, %v6022_v32  ;;  %v2223_v42 = vadd.f32 %v2208_v5, %v6214_v37 }
 0x2cc   : > { %v2340_v33 = vpop.f32.mrf.mxu2  ;;  %v2382_v56 = vadd.f32 %v2374_v60, %v2221_v17  ;;  %v2275_v51 = vpop.f32.mrf.mxu0 }
 0x2cd   : > { %v2353_v8 = vadd.f32 %v2340_v33, %v2312_v61  ;;  %7483 = vst [vmem:[#allocation13_spill] sm:$0xff] %v6323_v30 }
 0x2ce   : > { %v6310_v22 = vadd.f32 %v6275_v1, %v2382_v56  ;;  %v2316_v45 = vpop.f32.mrf.mxu1 }
 0x2cf   : > { %v2361_v14 = vrot.slane %v2353_v8, 1  ;;  %v2317_v33 = vadd.f32 %v2316_v45, %v2275_v51  ;;  %v2210_v8 = vadd.f32 %v2200_v12, %v2172_v7 }
 0x2d0   : > { %v2423_v47 = vmul.f32 %v6310_v22, %v6310_v22  ;;  %v2403_v61 = vsel %vm7484_vm13, %v6310_v22, 0.0 }
 0x2d1   : > { %v2366_v31 = vsel %vm7349_vm9, %v2360_v25, %v2361_v14 }
 0x2d2   : > { %v2375_v55 = vmul.f32 %v5935_v15, %v2366_v31  ;;  %v2432_v17 = vsel %vm7485_vm14, %v2423_v47, 0.0 }
 0x2d3   : > { %v2433_v31 = vadd.f32 %v2432_v17, %v2431_v20 }
 0x2d4   : > { %v2383_v13 = vadd.f32 %v2375_v55, %v6246_v3  ;;  %v2343_v29 = vpop.f32.mrf.mxu2  ;;  %v2356_v3 = vrot.slane %v2348_v41, 1  ;;  %v2225_v55 = vadd.f32 %v2210_v8, %v6235_v52 }
 0x2d5   : > { %v2354_v2 = vadd.f32 %v2343_v29, %v2315_v35 }
 0x2d6   : > { %v6316_v43 = vadd.f32 %v6275_v1, %v2383_v13  ;;  %v2370_v60 = vsel %vm7349_vm9, %v2356_v3, %v2357_v4 }
 0x2d7   : > { %v2362_v25 = vrot.slane %v2354_v2, 1  ;;  %v2379_v58 = vmul.f32 %v2370_v60, %v6323_v30  ;;  %v4832_v30 = vld [vmem:[#allocation4 + $0x8] sm:$0xff] }
 0x2d8   : > { %v2424_v50 = vmul.f32 %v6316_v43, %v6316_v43  ;;  %v2405_v37 = vsel %vm7486_vm15, %v6316_v43, 0.0 }
 0x2d9   : > { %v2365_v6 = vsel %vm7349_vm9, %v2361_v14, %v2362_v25  ;;  %v2404_v14 = vadd.f32 %v2403_v61, %v2402_v36  ;;  %v2387_v20 = vadd.f32 %v2379_v58, %v6237_v38 }
 0x2da   : > { %v2376_v21 = vmul.f32 %v5956_v19, %v2365_v6  ;;  %v2434_v35 = vsel %vm7487_vm1, %v2424_v50, 0.0 }
 0x2db   : > { %v2406_v4 = vadd.f32 %v2405_v37, %v2404_v14  ;;  %v2435_v36 = vadd.f32 %v2434_v35, %v2433_v31  ;;  %v2399_v6 = vadd.f32 %v6275_v1, %v2387_v20 }
 0x2dc   : > { %v2384_v57 = vadd.f32 %v2376_v21, %v2223_v42  ;;  %v2345_v18 = vpop.f32.mrf.mxu2 }
 0x2dd   : > { %v2355_v56 = vadd.f32 %v2345_v18, %v2317_v33  ;;  %v2428_v21 = vmul.f32 %v2399_v6, %v2399_v6 }
 0x2de   : > { %v6343_v40 = vadd.f32 %v6275_v1, %v2384_v57 }
 0x2df   : > { %v2363_v63 = vrot.slane %v2355_v56, 1 }
 0x2e0   : > { %v2407_v13 = vsel %vm7488_vm2, %v6343_v40, 0.0  ;;  %v2425_v29 = vmul.f32 %v6343_v40, %v6343_v40 }
 0x2e1   : > { %v2408_v41 = vadd.f32 %v2407_v13, %v2406_v4  ;;  %v2364_v2 = vsel %vm7349_vm9, %v2362_v25, %v2363_v63  ;;  %v2371_v5 = vsel %vm7349_vm9, %v2363_v63, %v2356_v3 }
 0x2e2   : > { %v2436_v7 = vsel %vm7489_vm4, %v2425_v29, 0.0  ;;  %v2377_v52 = vmul.f32 %v5976_v28, %v2364_v2  ;;  %v2378_v47 = vmul.f32 %v5994_v23, %v2371_v5 }
 0x2e3   : > { %v2437_v51 = vadd.f32 %v2436_v7, %v2435_v36 }
 0x2e4   : > { %v2385_v45 = vadd.f32 %v2377_v52, %v6256_v26  ;;  %v2386_v12 = vadd.f32 %v2378_v47, %v2225_v55  ;;  %v2413_v26 = vsel %vm7492_vm6, %v2399_v6, 0.0 }
 0x2e6   : > { %v2397_v42 = vadd.f32 %v6275_v1, %v2385_v45  ;;  %v2398_v25 = vadd.f32 %v6275_v1, %v2386_v12  ;;  %v2442_v1 = vsel %vm7494_vm8, %v2428_v21, 0.0  ;;  %v2466_v21 = vld [vmem:[%s7333_s6] sm:$0x1] }
 0x2e8   : > { %v2409_v3 = vsel %vm7490_vm10, %v2397_v42, 0.0  ;;  %v2426_v61 = vmul.f32 %v2397_v42, %v2397_v42  ;;  %v2427_v38 = vmul.f32 %v2398_v25, %v2398_v25  ;;  %v2411_v60 = vsel %vm7491_vm5, %v2398_v25, 0.0 }
 0x2e9   : > { %v2410_v50 = vadd.f32 %v2409_v3, %v2408_v41 }
 0x2ea   : > { %v2438_v33 = vsel %vm7442_vm0, %v2426_v61, 0.0  ;;  %v2440_v37 = vsel %vm7493_vm7, %v2427_v38, 0.0 }
 0x2eb   : > { %v2412_v8 = vadd.f32 %v2411_v60, %v2410_v50  ;;  %v2439_v17 = vadd.f32 %v2438_v33, %v2437_v51 }
 0x2ed   : > { %v2414_v57 = vadd.f32 %v2413_v26, %v2412_v8  ;;  %v2441_v18 = vadd.f32 %v2440_v37, %v2439_v17  ;;  %v2468_v8 = vld [vmem:[%s7334_s7] sm:$0x1] }
 0x2ef   : > { %v2415_v14 = vrot.slane %v2414_v57, 4  ;;  %v2443_v56 = vadd.f32 %v2442_v1, %v2441_v18 }
 0x2f1   : > { %v2416_v58 = vadd.f32 %v2415_v14, %v2414_v57  ;;  %v2444_v35 = vrot.slane %v2443_v56, 4 }
 0x2f3   : > { %v2417_v31 = vrot.slane %v2416_v58, 2  ;;  %v2445_v4 = vadd.f32 %v2444_v35, %v2443_v56 }
 0x2f5   : > { %v2418_v63 = vadd.f32 %v2417_v31, %v2416_v58  ;;  %v2446_v55 = vrot.slane %v2445_v4, 2 }
 0x2f7   : > { %v2419_v13 = vrot.slane %v2418_v63, 1  ;;  %v2447_v29 = vadd.f32 %v2446_v55, %v2445_v4 }
 0x2f9   : > { %v2420_v36 = vadd.f32 %v2419_v13, %v2418_v63  ;;  %v2448_v41 = vrot.slane %v2447_v29, 1 }
 0x2fb   : > { %v2449_v2 = vadd.f32 %v2448_v41, %v2447_v29  ;;  %v2450_v5 = vmul.f32 0.015625, %v2420_v36 }
 0x2fd   : > { %v2451_v20 = vmul.f32 0.015625, %v2449_v2  ;;  %v2452_v7 = vmul.f32 %v2450_v5, %v2450_v5 }
 0x2ff   : > { %v2453_v52 = vsub.f32 %v2451_v20, %v2452_v7 }
 0x301   : > { %v2454_v47 = vmax.f32 %v2453_v52, 0.0 }
 0x303   : > { %v2455_v51 = vadd.f32 1e-06, %v2454_v47 }
 0x305   : > { %4945 = vrsqrt.f32 %v2455_v51  ;;  %vm2462_vm12 = vweird.f32 %v2455_v51 }
 0x30b   : > { %v4946_v45 = vpop.eup %4945 }
 0x30c   : > { %v2457_v12 = vmul.f32 %v4946_v45, %v2455_v51  ;;  %vm2463_vm11 = vweird.f32 %v4946_v45 }
 0x30d   : > { %vm2464_vm13 = vmor %vm2462_vm12, %vm2463_vm11 }
 0x30e   : > { %v2458_v3 = vmul.f32 %v4946_v45, %v2457_v12 }
 0x310   : > { %v2459_v61 = vmul.f32 0.5, %v2458_v3 }
 0x312   : > { %v2460_v38 = vsub.f32 1.5, %v2459_v61 }
 0x314   : > { %v2461_v50 = vmul.f32 %v4946_v45, %v2460_v38 }
 0x316   : > { %v2465_v60 = vsel %vm2464_vm13, %v4946_v45, %v2461_v50 }
 0x317   : > { %v2467_v33 = vmul.f32 %v2466_v21, %v2465_v60 }
 0x319   : > { %v2469_v17 = vmul.f32 %v2467_v33, %v2450_v5  ;;  %v2471_v26 = vperm.slane %v2467_v33, 0 }
 0x31b   : > { %v2470_v37 = vsub.f32 %v2468_v8, %v2469_v17  ;;  %v2472_v57 = vmul.f32 %v2471_v26, %v6280_v27  ;;  %v2473_v18 = vmul.f32 %v2471_v26, %v6287_v34  ;;  %v2476_v1 = vmul.f32 %v2471_v26, %v6343_v40 }
 0x31c   : > { %v2477_v14 = vmul.f32 %v2471_v26, %v2397_v42  ;;  %v2478_v56 = vmul.f32 %v2471_v26, %v2398_v25  ;;  %v2474_v58 = vmul.f32 %v2471_v26, %v6310_v22  ;;  %v2475_v35 = vmul.f32 %v2471_v26, %v6316_v43 }
 0x31d   : > { %v2481_v31 = vperm.slane %v2470_v37, 0  ;;  %v2479_v4 = vmul.f32 %v2471_v26, %v2399_v6 }
 0x31f   : > { %v6379_v63 = vadd.f32 %v2481_v31, %v2472_v57  ;;  %v6381_v55 = vadd.f32 %v2481_v31, %v2473_v18  ;;  %v6383_v13 = vadd.f32 %v2481_v31, %v2474_v58  ;;  %v6385_v29 = vadd.f32 %v2481_v31, %v2475_v35 }
 0x320   : > { %v6387_v27 = vadd.f32 %v2481_v31, %v2476_v1  ;;  %v6389_v34 = vadd.f32 %v2481_v31, %v2477_v14  ;;  %v6391_v40 = vadd.f32 %v2481_v31, %v2478_v56  ;;  %v6393_v42 = vadd.f32 %v2481_v31, %v2479_v4 }
 0x321   : > { %v2491_v22 = vsub.f32 0.0, %v6379_v63  ;;  %v2492_v43 = vsub.f32 0.0, %v6381_v55  ;;  %v2493_v6 = vsub.f32 0.0, %v6383_v13  ;;  %v2494_v25 = vsub.f32 0.0, %v6385_v29 }
 0x322   : > { %v2495_v36 = vsub.f32 0.0, %v6387_v27  ;;  %v2496_v41 = vsub.f32 0.0, %v6389_v34  ;;  %v2497_v7 = vsub.f32 0.0, %v6391_v40  ;;  %v2498_v47 = vsub.f32 0.0, %v6393_v42 }
 0x323   : > { %v2499_v2 = vmul.f32 1.442695, %v2491_v22  ;;  %v2501_v5 = vmul.f32 1.442695, %v2492_v43  ;;  %v2503_v20 = vmul.f32 1.442695, %v2493_v6 }
 0x324   : > { %v2505_v52 = vmul.f32 1.442695, %v2494_v25  ;;  %v2507_v51 = vmul.f32 1.442695, %v2495_v36  ;;  %v2509_v45 = vmul.f32 1.442695, %v2496_v41 }
 0x325   : > { %4947 = vpow2.f32 %v2499_v2  ;;  %v2511_v12 = vmul.f32 1.442695, %v2497_v7  ;;  %v2513_v3 = vmul.f32 1.442695, %v2498_v47  ;;  %v4834_v7 = vld [vmem:[#allocation6 + $0x8] sm:$0xff] }
 0x326   : > { %4949 = vpow2.f32 %v2501_v5  ;;  %v4830_v5 = vld [vmem:[#allocation6 + $0x48] sm:$0xff]  ;;  %2878 = vmatpush.bf16.msra.mxu2 %v4834_v7 }
 0x327   : > { %4951 = vpow2.f32 %v2503_v20  ;;  %v4828_v20 = vld [vmem:[#allocation4 + $0x48] sm:$0xff]  ;;  %2739 = vmatpush.bf16.msrb.mxu3 %v4830_v5 }
 0x328   : > { %4953 = vpow2.f32 %v2505_v52  ;;  %2780 = vmatpush.bf16.msrb.mxu0 %v4828_v20  ;;  %2821 = vmatpush.bf16.msrb.mxu1 %v4828_v20 }
 0x329   : > { %4955 = vpow2.f32 %v2507_v51 }
 0x32a   : > { %4957 = vpow2.f32 %v2509_v45 }
 0x32b   : > { %v4948_v61 = vpop.eup %4947  ;;  %4959 = vpow2.f32 %v2511_v12 }
 0x32c   : > { %v4950_v38 = vpop.eup %4949  ;;  %v6403_v50 = vadd.f32 1.0, %v4948_v61  ;;  %4961 = vpow2.f32 %v2513_v3 }
 0x32d   : > { %v4952_v21 = vpop.eup %4951  ;;  %v6405_v60 = vadd.f32 1.0, %v4950_v38 }
 0x32e   : > { %v4954_v33 = vpop.eup %4953  ;;  %v6407_v8 = vadd.f32 1.0, %v4952_v21  ;;  %4963 = vrcp.f32 %v6403_v50  ;;  %v2534_v18 = vand.u32 2147483648, %v6403_v50  ;;  %vm2528_vm14 = vweird.f32 %v6403_v50 }
 0x32f   : > { %v4956_v17 = vpop.eup %4955  ;;  %v6410_v26 = vadd.f32 1.0, %v4954_v33  ;;  %4965 = vrcp.f32 %v6405_v60  ;;  %v2549_v1 = vand.u32 2147483648, %v6405_v60  ;;  %v2532_v35 = vand.u32 2147483647, %v6403_v50 }
 0x330   : > { %v4958_v37 = vpop.eup %4957  ;;  %v6413_v57 = vadd.f32 1.0, %v4956_v17  ;;  %4967 = vrcp.f32 %v6407_v8  ;;  %v6425_v4 = vor.u32 1.1754944e-38, %v2534_v18  ;;  %vm2543_vm15 = vweird.f32 %v6405_v60 }
 0x331   : > { %v4960_v14 = vpop.eup %4959  ;;  %v6418_v58 = vadd.f32 1.0, %v4958_v37  ;;  %4969 = vrcp.f32 %v6410_v26  ;;  %v2547_v22 = vand.u32 2147483647, %v6405_v60  ;;  %v2564_v43 = vand.u32 2147483648, %v6407_v8 }
 0x332   : > { %v4962_v56 = vpop.eup %4961  ;;  %4971 = vrcp.f32 %v6413_v57  ;;  %v6433_v25 = vadd.f32 1.0, %v4960_v14  ;;  %v6437_v41 = vor.u32 1.1754944e-38, %v2549_v1  ;;  %v2579_v2 = vand.u32 2147483648, %v6410_v26 }
 0x333   : > { %v6440_v52 = vadd.f32 1.0, %v4962_v56  ;;  %vm2558_vm1 = vweird.f32 %v6407_v8  ;;  %v2562_v51 = vand.u32 2147483647, %v6407_v8  ;;  %v2577_v45 = vand.u32 2147483647, %v6410_v26 }
 0x334   : > { %v6423_v31 = vpop.eup %4963  ;;  %vm6450_vm4 = vcmp.eq.f32.partialorder %v2532_v35, 8.507059e+37  ;;  %v2592_v38 = vand.u32 2147483647, %v6413_v57  ;;  %4973 = vrcp.f32 %v6418_v58  ;;  %vm6456_vm10 = vcmp.eq.f32.partialorder %v2547_v22, 8.507059e+37  ;;  %v4829_v35 = vld [vmem:[#allocation6 + $0x40] sm:$0xff]  ;;  %v4827_v22 = vld [vmem:[#allocation4 + $0x40] sm:$0xff] }
 0x335   : > { %v6431_v6 = vpop.eup %4965  ;;  %v2524_v36 = vmul.f32 %v6423_v31, %v6403_v50  ;;  %vm2529_vm2 = vweird.f32 %v6423_v31  ;;  %v6462_v37 = vor.u32 1.1754944e-38, %v2564_v43  ;;  %vm2573_vm5 = vweird.f32 %v6410_v26  ;;  %2740 = vmatpush.bf16.msrb.mxu3 %v4829_v35  ;;  %2781 = vmatpush.bf16.msrb.mxu0 %v4827_v22 }
 0x336   : > { %v2539_v47 = vmul.f32 %v6431_v6, %v6405_v60  ;;  %v6447_v12 = vpop.eup %4967  ;;  %v2594_v18 = vand.u32 2147483648, %v6413_v57  ;;  %vm2544_vm0 = vweird.f32 %v6431_v6  ;;  %v6470_v56 = vor.u32 1.1754944e-38, %v2579_v2  ;;  %vm6499_vm13 = vmor %vm2528_vm14, %vm2529_vm2  ;;  %2822 = vmatpush.bf16.msrb.mxu1 %v4827_v22 }
 0x337   : > { %v2525_v3 = vsub.f32 1.0, %v2524_v36  ;;  %v2554_v17 = vmul.f32 %v6447_v12, %v6407_v8  ;;  %v6466_v1 = vpop.eup %4969  ;;  %vm2588_vm6 = vweird.f32 %v6413_v57  ;;  %vm2559_vm7 = vweird.f32 %v6447_v12  ;;  %vm6512_vm14 = vmor %vm2543_vm15, %vm2544_vm0 }
 0x338   : > { %v2540_v21 = vsub.f32 1.0, %v2539_v47  ;;  %v6473_v43 = vpop.eup %4971  ;;  %vm6477_vm8 = vcmp.eq.f32.partialorder %v2562_v51, 8.507059e+37  ;;  %v2569_v7 = vmul.f32 %v6466_v1, %v6410_v26  ;;  %vm6483_vm11 = vcmp.eq.f32.partialorder %v2577_v45, 8.507059e+37  ;;  %v4833_v47 = vld [vmem:[#allocation6] sm:$0xff]  ;;  %vm6529_vm15 = vmor %vm2558_vm1, %vm2559_vm7 }
 0x339   : > { %v2526_v14 = vmul.f32 %v6423_v31, %v2525_v3  ;;  %v2555_v5 = vsub.f32 1.0, %v2554_v17  ;;  %vm6490_vm12 = vcmp.eq.f32.partialorder %v2592_v38, 8.507059e+37  ;;  %v2607_v51 = vand.u32 2147483647, %v6418_v58  ;;  %2879 = vmatpush.bf16.msra.mxu2 %v4833_v47  ;;  %2919 = vmatpush.bf16.msra.mxu3 %v4832_v30 }
 0x33a   : > { %v2541_v36 = vmul.f32 %v6431_v6, %v2540_v21  ;;  %v2584_v21 = vmul.f32 %v6473_v43, %v6413_v57  ;;  %v2570_v53 = vsub.f32 1.0, %v2569_v7  ;;  %v2595_v46 = vor.u32 1.1754944e-38, %v2594_v18  ;;  %v4974_v35 = vpop.eup %4973  ;;  %2948 = vmatpush.bf16.msra.mxu0 %v4832_v30  ;;  %3039 = vmatpush.bf16.msra.mxu1 %v4838_v16 }
 0x33b   : > { %v2527_v3 = vadd.f32 %v6423_v31, %v2526_v14  ;;  %v2556_v38 = vmul.f32 %v6447_v12, %v2555_v5  ;;  %vm2574_vm2 = vweird.f32 %v6466_v1  ;;  %vm2603_vm9 = vweird.f32 %v6418_v58 }
 0x33c   : > { %v2542_v14 = vadd.f32 %v6431_v6, %v2541_v36  ;;  %v2585_v36 = vsub.f32 1.0, %v2584_v21  ;;  %4975 = vrcp.f32 %v6433_v25  ;;  %v2571_v60 = vmul.f32 %v6466_v1, %v2570_v53  ;;  %vm2575_vm1 = vmor %vm2573_vm5, %vm2574_vm2 }
 0x33d   : > { %v2531_v32 = vsel %vm6499_vm13, %v6423_v31, %v2527_v3  ;;  %v2557_v18 = vadd.f32 %v6447_v12, %v2556_v38  ;;  %v2609_v22 = vand.u32 2147483648, %v6418_v58  ;;  %vm2589_vm0 = vweird.f32 %v6473_v43 }
 0x33e   : > { %v2546_v31 = vsel %vm6512_vm14, %v6431_v6, %v2542_v14  ;;  %v2586_v30 = vmul.f32 %v6473_v43, %v2585_v36  ;;  %v2599_v6 = vmul.f32 %v4974_v35, %v6418_v58  ;;  %vm6536_vm13 = vcmp.eq.f32.partialorder %v2607_v51, 8.507059e+37 }
 0x33f   : > { %v2536_v53 = vsel %vm6450_vm4, %v6425_v4, %v2531_v32  ;;  %v2561_v16 = vsel %vm6529_vm15, %v6447_v12, %v2557_v18  ;;  %v2572_v8 = vadd.f32 %v6466_v1, %v2571_v60  ;;  %v2622_v47 = vand.u32 2147483647, %v6433_v25  ;;  %vm2590_vm4 = vmor %vm2588_vm6, %vm2589_vm0 }
 0x340   : > { %v2551_v3 = vsel %vm6456_vm10, %v6437_v41, %v2546_v31  ;;  %v2587_v61 = vadd.f32 %v6473_v43, %v2586_v30  ;;  %v2600_v32 = vsub.f32 1.0, %v2599_v6  ;;  %v2624_v4 = vand.u32 2147483648, %v6433_v25 }
 0x341   : > { %v2576_v12 = vsel %vm2575_vm1, %v6466_v1, %v2572_v8  ;;  %vm2604_vm7 = vweird.f32 %v4974_v35  ;;  %v2610_v21 = vor.u32 1.1754944e-38, %v2609_v22  ;;  %vm2618_vm14 = vweird.f32 %v6433_v25 }
 0x342   : > { %4977 = vrcp.f32 %v6440_v52  ;;  %v4976_v41 = vpop.eup %4975  ;;  %v2566_v26 = vsel %vm6477_vm8, %v6462_v37, %v2561_v16  ;;  %v2581_v33 = vsel %vm6483_vm11, %v6470_v56, %v2576_v12  ;;  %v2591_v1 = vsel %vm2590_vm4, %v6473_v43, %v2587_v61  ;;  %vm2605_vm6 = vmor %vm2603_vm9, %vm2604_vm7 }
 0x343   : > { %v2601_v51 = vmul.f32 %v4974_v35, %v2600_v32  ;;  %v2596_v57 = vsel %vm6490_vm12, %v2595_v46, %v2591_v1  ;;  %v2614_v45 = vmul.f32 %v4976_v41, %v6433_v25  ;;  %vm2619_vm10 = vweird.f32 %v4976_v41 }
 0x344   : > { %vm6572_vm5 = vcmp.eq.f32.partialorder %v2622_v47, 8.507059e+37  ;;  %v2625_v38 = vor.u32 1.1754944e-38, %v2624_v4  ;;  %v2639_v37 = vand.u32 2147483648, %v6440_v52  ;;  %v2643_v2 = vmul.f32 %v2536_v53, %v6379_v63  ;;  %vm2620_vm11 = vmor %vm2618_vm14, %vm2619_vm10 }
 0x345   : > { %v2602_v20 = vadd.f32 %v4974_v35, %v2601_v51  ;;  %v2644_v56 = vmul.f32 %v2551_v3, %v6381_v55  ;;  %v2615_v46 = vsub.f32 1.0, %v2614_v45  ;;  %v2637_v43 = vand.u32 2147483647, %v6440_v52 }
 0x346   : > { %v2645_v17 = vmul.f32 %v2566_v26, %v6383_v13  ;;  %v2646_v50 = vmul.f32 %v2581_v33, %v6385_v29  ;;  %vm2633_vm8 = vweird.f32 %v6440_v52  ;;  %v2640_v31 = vor.u32 1.1754944e-38, %v2639_v37 }
 0x347   : > { %v2606_v36 = vsel %vm2605_vm6, %v4974_v35, %v2602_v20  ;;  %v2647_v18 = vmul.f32 %v2596_v57, %v6387_v27  ;;  %v2651_v63 = vpack.c.bf16 %v2643_v2, %v2643_v2  ;;  %v2616_v58 = vmul.f32 %v4976_v41, %v2615_v46 }
 0x348   : > { %v4978_v60 = vpop.eup %4977  ;;  %v2611_v55 = vsel %vm6536_vm13, %v2610_v21, %v2606_v36  ;;  %v2652_v22 = vpack.c.bf16 %v2644_v56, %v2644_v56  ;;  %v2653_v5 = vpack.c.bf16 %v2645_v17, %v2645_v17  ;;  %v2654_v29 = vpack.c.bf16 %v2646_v50, %v2646_v50 }
 0x349   : > { %v2629_v30 = vmul.f32 %v4978_v60, %v6440_v52  ;;  %vm2634_vm9 = vweird.f32 %v4978_v60  ;;  %v2648_v13 = vmul.f32 %v2611_v55, %v6389_v34  ;;  %v2617_v35 = vadd.f32 %v4976_v41, %v2616_v58 }
 0x34a   : > { %v2655_v6 = vpack.c.bf16 %v2647_v18, %v2647_v18  ;;  %v2697_v53 = vunpack.c.l.b16 %v2651_v63  ;;  %v2698_v16 = vunpack.c.l.b16 %v2652_v22  ;;  %v2699_v8 = vunpack.c.l.b16 %v2653_v5  ;;  %vm2635_vm0 = vmor %vm2633_vm8, %vm2634_vm9 }
 0x34b   : > { %v2630_v27 = vsub.f32 1.0, %v2629_v30  ;;  %v2656_v7 = vpack.c.bf16 %v2648_v13, %v2648_v13  ;;  %v2700_v47 = vunpack.c.l.b16 %v2654_v29  ;;  %v2621_v3 = vsel %vm2620_vm11, %v4976_v41, %v2617_v35 }
 0x34c   : > { %v2663_v61 = vunpack.c.l.bf16 %v2655_v6  ;;  %v2701_v32 = vunpack.c.l.b16 %v2655_v6  ;;  %v6594_v4 = vpack.c.b16 %v2698_v16, %v2697_v53  ;;  %v2626_v34 = vsel %vm6572_vm5, %v2625_v38, %v2621_v3  ;;  %v4831_v38 = vld [vmem:[#allocation4] sm:$0xff]  ;;  %v4842_v53 = vld [vmem:[#allocation6 + $0x28] sm:$0xff]  ;;  %v4840_v16 = vld [vmem:[#allocation4 + $0x28] sm:$0xff] }
 0x34d   : > { %v2631_v12 = vmul.f32 %v4978_v60, %v2630_v27  ;;  %v2664_v21 = vunpack.c.l.bf16 %v2656_v7  ;;  %v2702_v26 = vunpack.c.l.b16 %v2656_v7  ;;  %v2649_v33 = vmul.f32 %v2626_v34, %v6391_v40  ;;  %2920 = vmatpush.bf16.msra.mxu3 %v4831_v38  ;;  %2949 = vmatpush.bf16.msra.mxu0 %v4831_v38  ;;  %v4841_v27 = vld [vmem:[#allocation6 + $0x20] sm:$0xff]  ;;  %v4839_v7 = vld [vmem:[#allocation4 + $0x20] sm:$0xff] }
 0x34e   : > { %v2671_v1 = vsub.f32 %v2647_v18, %v2663_v61  ;;  %v6599_v25 = vpack.c.b16 %v2700_v47, %v2699_v8  ;;  %vm7515_vm12 = vcmask 261120   ;;  %v2659_v41 = vunpack.c.l.bf16 %v2651_v63  ;;  %v4846_v8 = vld [vmem:[#allocation6 + $0x38] sm:$0xff]  ;;  %v4844_v47 = vld [vmem:[#allocation4 + $0x38] sm:$0xff] }
 0x34f   : > { %4543 = vmatmul.msk.bf16.vlgmr.msrb.gmra.mxu3 %vm7515_vm12, %v6594_v4  ;;  %vm7516_vm2 = vmmov %vm7515_vm12  ;;  %v2632_v51 = vadd.f32 %v4978_v60, %v2631_v12  ;;  %v2672_v57 = vsub.f32 %v2648_v13, %v2664_v21  ;;  %v6605_v45 = vpack.c.b16 %v2702_v26, %v2701_v32  ;;  %v2660_v14 = vunpack.c.l.bf16 %v2652_v22  ;;  %v4845_v21 = vld [vmem:[#allocation6 + $0x30] sm:$0xff] }
 0x350   : > { %4555 = vmatmul.msk.bf16.vlgmr.msrb.gmra.mxu0 %vm7516_vm2, %v6594_v4  ;;  %vm7517_vm15 = vmmov %vm7516_vm2  ;;  %v2657_v40 = vpack.c.bf16 %v2649_v33, %v2649_v33  ;;  %v2667_v20 = vsub.f32 %v2643_v2, %v2659_v41  ;;  %v2661_v37 = vunpack.c.l.bf16 %v2653_v5  ;;  %v2662_v46 = vunpack.c.l.bf16 %v2654_v29  ;;  %v4835_v29 = vld [vmem:[#allocation4 + $0x10] sm:$0xff] }
 0x351   : > { %4571 = vmatmul.msk.bf16.vlgmr.msra.gmra.mxu2 %vm7517_vm15, %v6594_v4  ;;  %v2636_v36 = vsel %vm2635_vm0, %v4978_v60, %v2632_v51  ;;  %vm2638_vm13 = vcmp.eq.f32.partialorder %v2637_v43, 8.507059e+37  ;;  %v6612_v18 = vpack.c.bf16 %v2672_v57, %v2671_v1  ;;  %v2668_v63 = vsub.f32 %v2644_v56, %v2660_v14  ;;  %vm7518_vm1 = vmmov %vm7516_vm2  ;;  %v4837_v43 = vld [vmem:[#allocation6 + $0x10] sm:$0xff]  ;;  %3184 = vmatpush.bf16.msrb.mxu0 %v4842_v53  ;;  %v4843_v1 = vld [vmem:[#allocation4 + $0x30] sm:$0xff] }
 0x352   : > { %v2641_v55 = vsel %vm2638_vm13, %v2640_v31, %v2636_v36  ;;  %v2669_v58 = vsub.f32 %v2645_v17, %v2661_v37  ;;  %v2665_v30 = vunpack.c.l.bf16 %v2657_v40  ;;  %v2670_v52 = vsub.f32 %v2646_v50, %v2662_v46  ;;  %3040 = vmatpush.bf16.msra.mxu1 %v4837_v43  ;;  %vm7519_vm4 = vmmov %vm7518_vm1  ;;  %v4836_v50 = vld [vmem:[#allocation4 + $0x18] sm:$0xff] }
 0x353   : > { %v2650_v22 = vmul.f32 %v2641_v55, %v6393_v42  ;;  %v6615_v13 = vpack.c.bf16 %v2668_v63, %v2667_v20  ;;  %v2703_v6 = vunpack.c.l.b16 %v2657_v40  ;;  %vm7520_vm7 = vmmov %vm7518_vm1  ;;  %3080 = vmatpush.bf16.msrb.mxu2 %v4836_v50  ;;  %3109 = vmatpush.bf16.msrb.mxu3 %v4836_v50 }
 0x354   : > { %v6619_v2 = vpack.c.bf16 %v2670_v52, %v2669_v58  ;;  %v2673_v56 = vsub.f32 %v2649_v33, %v2665_v30  ;;  %vm7521_vm14 = vmmov %vm7518_vm1 }
 0x355   : > { %v2658_v35 = vpack.c.bf16 %v2650_v22, %v2650_v22  ;;  %4559 = vmatmul.msk.bf16.vlgmr.msrb.gmra.mxu1 %vm7518_vm1, %v6615_v13  ;;  %vm7522_vm10 = vmmov %vm7518_vm1  ;;  %3185 = vmatpush.bf16.msrb.mxu0 %v4841_v27 }
 0x356   : > { %vm7523_vm5 = vmmov %vm7518_vm1  ;;  %3225 = vmatpush.bf16.msrb.mxu1 %v4840_v16 }
 0x357   : > { %v2666_v60 = vunpack.c.l.bf16 %v2658_v35  ;;  %v2704_v5 = vunpack.c.l.b16 %v2658_v35  ;;  %3081 = vmatpush.bf16.msrb.mxu2 %v4835_v29  ;;  %3110 = vmatpush.bf16.msrb.mxu3 %v4835_v29  ;;  %vm7524_vm6 = vmmov %vm7518_vm1  ;;  %v4850_v35 = vld [vmem:[#allocation6 + $0x58] sm:$0xff]  ;;  %v4848_v29 = vld [vmem:[#allocation4 + $0x58] sm:$0xff] }
 0x358   : > { %vm7525_vm8 = vmmov %vm7518_vm1 }
 0x359   : > { %v2674_v31 = vsub.f32 %v2650_v22, %v2666_v60  ;;  %v6621_v17 = vpack.c.b16 %v2704_v5, %v2703_v6  ;;  %vm7526_vm9 = vmmov %vm7518_vm1  ;;  %v4849_v60 = vld [vmem:[#allocation6 + $0x50] sm:$0xff] }
 0x35a   : > { %vm7527_vm11 = vmmov %vm7518_vm1  ;;  %3226 = vmatpush.bf16.msrb.mxu1 %v4839_v7 }
 0x35b   : > { %v6623_v42 = vpack.c.bf16 %v2674_v31, %v2673_v56  ;;  %3254 = vmatpush.bf16.msra.mxu2 %v4840_v16  ;;  %vm7528_vm12 = vmmov %vm7518_vm1 }
 0x35c   : > { %vm7529_vm2 = vmmov %vm7518_vm1 }
 0x35d   : > { %vm7530_vm15 = vmmov %vm7518_vm1 }
 0x35e   : > { %vm7531_vm0 = vmmov %vm7518_vm1 }
 0x35f   : > { %4544 = vmatmul.msk.bf16.gmra.mxu3 %vm7519_vm4, %v6599_v25  ;;  %vm7532_vm13 = vmmov %vm7531_vm0  ;;  %3255 = vmatpush.bf16.msra.mxu2 %v4839_v7 }
 0x360   : > { %4556 = vmatmul.msk.bf16.gmra.mxu0 %vm7520_vm7, %v6599_v25  ;;  %vm7533_vm1 = vmmov %vm7531_vm0 }
 0x361   : > { %4572 = vmatmul.msk.bf16.gmra.mxu2 %vm7521_vm14, %v6599_v25  ;;  %vm7534_vm4 = vmmov %vm7531_vm0 }
 0x362   : > { %vm7535_vm7 = vmmov %vm7531_vm0 }
 0x363   : > { %vm7536_vm14 = vmmov %vm7531_vm0 }
 0x365   : > { %4560 = vmatmul.msk.bf16.gmra.mxu1 %vm7522_vm10, %v6619_v2  ;;  %vm7537_vm10 = vmmov %vm7531_vm0 }
 0x36f   : > { %4545 = vmatmul.msk.bf16.gmra.mxu3 %vm7523_vm5, %v6605_v45  ;;  %vm7538_vm5 = vmmov %vm7531_vm0 }
 0x370   : > { %4557 = vmatmul.msk.bf16.gmra.mxu0 %vm7524_vm6, %v6605_v45  ;;  %vm7539_vm6 = vmmov %vm7531_vm0 }
 0x371   : > { %4573 = vmatmul.msk.bf16.gmra.mxu2 %vm7525_vm8, %v6605_v45  ;;  %vm7540_vm8 = vmmov %vm7531_vm0 }
 0x375   : > { %4561 = vmatmul.msk.bf16.gmra.mxu1 %vm7526_vm9, %v6612_v18  ;;  %vm7541_vm9 = vmmov %vm7531_vm0 }
 0x37f   : > { %4546 = vmatmul.msk.bf16.gmra.mxu3 %vm7527_vm11, %v6621_v17  ;;  %vm7542_vm11 = vmmov %vm7531_vm0 }
 0x380   : > { %4558 = vmatmul.msk.bf16.gmra.mxu0 %vm7528_vm12, %v6621_v17  ;;  %vm7543_vm12 = vmmov %vm7531_vm0 }
 0x381   : > { %4574 = vmatmul.msk.bf16.gmra.mxu2 %vm7529_vm2, %v6621_v17  ;;  %vm7544_vm2 = vmmov %vm7531_vm0 }
 0x385   : > { %4562 = vmatmul.msk.bf16.gmra.mxu1 %vm7530_vm15, %v6623_v42  ;;  %vm7545_vm15 = vmmov %vm7531_vm0 }
 0x38f   : > { %4583 = vmatmul.msk.bf16.vlgmr.msra.gmra.mxu3 %vm7531_vm0, %v6594_v4 }
 0x390   : > { %4587 = vmatmul.msk.bf16.vlgmr.msra.gmra.mxu0 %vm7532_vm13, %v6615_v13  ;;  %3345 = vmatpush.bf16.msra.mxu3 %v4846_v8  ;;  %vm7546_vm13 = vmmov %vm7531_vm0 }
 0x391   : > { %4611 = vmatmul.msk.bf16.vlgmr.msrb.gmra.mxu2 %vm7533_vm1, %v6594_v4  ;;  %3386 = vmatpush.bf16.msra.mxu0 %v4844_v47  ;;  %vm7547_vm1 = vmmov %vm7531_vm0 }
 0x392   : > { %3506 = vmatpush.bf16.msrb.mxu2 %v4850_v35 }
 0x394   : > { %3346 = vmatpush.bf16.msra.mxu3 %v4845_v21 }
 0x395   : > { %4599 = vmatmul.msk.bf16.vlgmr.msra.gmra.mxu1 %vm7534_vm4, %v6594_v4  ;;  %vm7548_vm4 = vmmov %vm7531_vm0  ;;  %3387 = vmatpush.bf16.msra.mxu0 %v4843_v1 }
 0x396   : > { %3415 = vmatpush.bf16.msra.mxu1 %v4844_v47  ;;  %3507 = vmatpush.bf16.msrb.mxu2 %v4849_v60 }
 0x39a   : > { %3416 = vmatpush.bf16.msra.mxu1 %v4843_v1 }
 0x39f   : > { %4584 = vmatmul.msk.bf16.gmra.mxu3 %vm7535_vm7, %v6599_v25  ;;  %vm7549_vm7 = vmmov %vm7531_vm0 }
 0x3a0   : > { %4588 = vmatmul.msk.bf16.gmra.mxu0 %vm7536_vm14, %v6619_v2  ;;  %vm7550_vm14 = vmmov %vm7531_vm0 }
 0x3a1   : > { %4612 = vmatmul.msk.bf16.gmra.mxu2 %vm7537_vm10, %v6599_v25  ;;  %vm7551_vm10 = vmmov %vm7531_vm0 }
 0x3a5   : > { %4600 = vmatmul.msk.bf16.gmra.mxu1 %vm7538_vm5, %v6599_v25  ;;  %vm7552_vm5 = vmmov %vm7531_vm0 }
 0x3af   : > { %4585 = vmatmul.msk.bf16.gmra.mxu3 %vm7539_vm6, %v6605_v45  ;;  %vm7553_vm6 = vmmov %vm7531_vm0 }
 0x3b0   : > { %4589 = vmatmul.msk.bf16.gmra.mxu0 %vm7540_vm8, %v6612_v18  ;;  %vm7554_vm8 = vmmov %vm7531_vm0 }
 0x3b1   : > { %4613 = vmatmul.msk.bf16.gmra.mxu2 %vm7541_vm9, %v6605_v45  ;;  %vm7555_vm9 = vmmov %vm7531_vm0 }
 0x3b5   : > { %4601 = vmatmul.msk.bf16.gmra.mxu1 %vm7542_vm11, %v6605_v45  ;;  %vm7556_vm11 = vmmov %vm7531_vm0 }
 0x3bf   : > { %4586 = vmatmul.msk.bf16.gmra.mxu3 %vm7543_vm12, %v6621_v17  ;;  %vm7557_vm12 = vmmov %vm7531_vm0 }
 0x3c0   : > { %4590 = vmatmul.msk.bf16.gmra.mxu0 %vm7544_vm2, %v6623_v42  ;;  %vm7558_vm2 = vmmov %vm7531_vm0 }
 0x3c1   : > { %4614 = vmatmul.msk.bf16.gmra.mxu2 %vm7545_vm15, %v6621_v17  ;;  %vm7559_vm15 = vmmov %vm7531_vm0 }
 0x3c5   : > { %4602 = vmatmul.msk.bf16.gmra.mxu1 %vm7531_vm0, %v6621_v17 }
 0x3cd   : > { %v2783_v3 = vpop.f32.mrf.mxu0 }
 0x3cf   : > { %4615 = vmatmul.msk.bf16.vlgmr.msrb.gmra.mxu3 %vm7546_vm13, %v6615_v13  ;;  %vm7560_vm13 = vmmov %vm7531_vm0 }
 0x3d0   : > { %4627 = vmatmul.msk.bf16.vlgmr.msrb.gmra.mxu0 %vm7547_vm1, %v6594_v4  ;;  %3547 = vmatpush.bf16.msrb.mxu3 %v4848_v29  ;;  %vm7561_vm1 = vmmov %vm7531_vm0 }
 0x3d1   : > { %4643 = vmatmul.msk.bf16.vlgmr.msra.gmra.mxu2 %vm7548_vm4, %v6615_v13  ;;  %3576 = vmatpush.bf16.msrb.mxu0 %v4848_v29  ;;  %vm7562_vm4 = vmmov %vm7531_vm0 }
 0x3d2   : > { %v2742_v61 = vpop.f32.mrf.mxu3  ;;  %v2824_v32 = vpop.f32.mrf.mxu1 }
 0x3d3   : > { %v2784_v34 = vadd.f32 %v2783_v3, %v2742_v61  ;;  %v4854_v3 = vld [vmem:[#allocation6 + $0x68] sm:$0xff] }
 0x3d4   : > { %v6687_v12 = vpop.f32.mrf.mxu2 }
 0x3d5   : > { %v2785_v26 = vpop.f32.mrf.mxu0  ;;  %v6689_v33 = vadd.f32 %v2824_v32, %v2784_v34  ;;  %4639 = vmatmul.msk.bf16.vlgmr.msrb.gmra.mxu1 %vm7549_vm7, %v6594_v4  ;;  %vm7563_vm7 = vmmov %vm7531_vm0 }
 0x3d6   : > { %3667 = vmatpush.bf16.msrb.mxu1 %v4854_v3 }
 0x3da   : > { %v2744_v41 = vpop.f32.mrf.mxu3  ;;  %v2826_v51 = vpop.f32.mrf.mxu1 }
 0x3db   : > { %v2786_v57 = vadd.f32 %v2785_v26, %v2744_v41 }
 0x3dc   : > { %v6693_v14 = vpop.f32.mrf.mxu2 }
 0x3dd   : > { %v2788_v38 = vpop.f32.mrf.mxu0  ;;  %v6695_v40 = vadd.f32 %v2826_v51, %v2786_v57 }
 0x3df   : > { %4616 = vmatmul.msk.bf16.gmra.mxu3 %vm7550_vm14, %v6619_v2  ;;  %vm7564_vm14 = vmmov %vm7531_vm0 }
 0x3e0   : > { %4628 = vmatmul.msk.bf16.gmra.mxu0 %vm7551_vm10, %v6599_v25  ;;  %vm7565_vm10 = vmmov %vm7531_vm0 }
 0x3e1   : > { %4644 = vmatmul.msk.bf16.gmra.mxu2 %vm7552_vm5, %v6619_v2  ;;  %vm7566_vm5 = vmmov %vm7531_vm0 }
 0x3e2   : > { %v2747_v20 = vpop.f32.mrf.mxu3  ;;  %v2829_v37 = vpop.f32.mrf.mxu1 }
 0x3e3   : > { %v2789_v46 = vadd.f32 %v2788_v38, %v2747_v20 }
 0x3e4   : > { %v6703_v36 = vpop.f32.mrf.mxu2 }
 0x3e5   : > { %v2790_v63 = vpop.f32.mrf.mxu0  ;;  %v6705_v55 = vadd.f32 %v2829_v37, %v2789_v46  ;;  %4640 = vmatmul.msk.bf16.gmra.mxu1 %vm7553_vm6, %v6599_v25  ;;  %vm7567_vm6 = vmmov %vm7531_vm0 }
 0x3ea   : > { %v2749_v58 = vpop.f32.mrf.mxu3  ;;  %v2831_v22 = vpop.f32.mrf.mxu1 }
 0x3eb   : > { %v2791_v30 = vadd.f32 %v2790_v63, %v2749_v58 }
 0x3ec   : > { %v6709_v52 = vpop.f32.mrf.mxu2 }
 0x3ed   : > { %v2793_v6 = vpop.f32.mrf.mxu0  ;;  %v6711_v43 = vadd.f32 %v2831_v22, %v2791_v30 }
 0x3ef   : > { %4617 = vmatmul.msk.bf16.gmra.mxu3 %vm7554_vm8, %v6612_v18  ;;  %vm7568_vm8 = vmmov %vm7531_vm0 }
 0x3f0   : > { %4629 = vmatmul.msk.bf16.gmra.mxu0 %vm7555_vm9, %v6605_v45  ;;  %vm7569_vm9 = vmmov %vm7531_vm0 }
 0x3f1   : > { %4645 = vmatmul.msk.bf16.gmra.mxu2 %vm7556_vm11, %v6612_v18  ;;  %vm7570_vm11 = vmmov %vm7531_vm0 }
 0x3f2   : > { %v2752_v56 = vpop.f32.mrf.mxu3  ;;  %v2834_v5 = vpop.f32.mrf.mxu1 }
 0x3f3   : > { %v2794_v31 = vadd.f32 %v2793_v6, %v2752_v56  ;;  %v4847_v6 = vld [vmem:[#allocation4 + $0x50] sm:$0xff] }
 0x3f4   : > { %v6719_v50 = vpop.f32.mrf.mxu2  ;;  %3548 = vmatpush.bf16.msrb.mxu3 %v4847_v6  ;;  %3577 = vmatpush.bf16.msrb.mxu0 %v4847_v6 }
 0x3f5   : > { %v2795_v53 = vpop.f32.mrf.mxu0  ;;  %v6721_v16 = vadd.f32 %v2834_v5, %v2794_v31  ;;  %4641 = vmatmul.msk.bf16.gmra.mxu1 %vm7557_vm12, %v6605_v45  ;;  %vm7571_vm12 = vmmov %vm7531_vm0 }
 0x3fa   : > { %v2754_v27 = vpop.f32.mrf.mxu3  ;;  %v2836_v7 = vpop.f32.mrf.mxu1 }
 0x3fb   : > { %v2796_v8 = vadd.f32 %v2795_v53, %v2754_v27 }
 0x3fc   : > { %v6725_v47 = vpop.f32.mrf.mxu2 }
 0x3fd   : > { %v2798_v61 = vpop.f32.mrf.mxu0  ;;  %v6727_v32 = vadd.f32 %v2836_v7, %v2796_v8  ;;  %v4853_v7 = vld [vmem:[#allocation6 + $0x60] sm:$0xff] }
 0x3fe   : > { %3668 = vmatpush.bf16.msrb.mxu1 %v4853_v7 }
 0x3ff   : > { %4618 = vmatmul.msk.bf16.gmra.mxu3 %vm7558_vm2, %v6623_v42  ;;  %vm7572_vm2 = vmmov %vm7531_vm0 }
 0x400   : > { %4630 = vmatmul.msk.bf16.gmra.mxu0 %vm7559_vm15, %v6621_v17  ;;  %vm7573_vm15 = vmmov %vm7531_vm0 }
 0x401   : > { %4646 = vmatmul.msk.bf16.gmra.mxu2 %vm7531_vm0, %v6623_v42 }
 0x402   : > { %v2757_v34 = vpop.f32.mrf.mxu3  ;;  %v2839_v21 = vpop.f32.mrf.mxu1 }
 0x403   : > { %v2799_v26 = vadd.f32 %v2798_v61, %v2757_v34 }
 0x404   : > { %v6735_v1 = vpop.f32.mrf.mxu2 }
 0x405   : > { %v2800_v41 = vpop.f32.mrf.mxu0  ;;  %v6737_v51 = vadd.f32 %v2839_v21, %v2799_v26  ;;  %4642 = vmatmul.msk.bf16.gmra.mxu1 %vm7560_vm13, %v6621_v17  ;;  %vm7574_vm13 = vmmov %vm7531_vm0 }
 0x40a   : > { %v2759_v57 = vpop.f32.mrf.mxu3  ;;  %v2841_v38 = vpop.f32.mrf.mxu1 }
 0x40b   : > { %v2801_v20 = vadd.f32 %v2800_v41, %v2759_v57 }
 0x40c   : > { %v6741_v37 = vpop.f32.mrf.mxu2 }
 0x40d   : > { %v2951_v46 = vpop.f32.mrf.mxu0  ;;  %v6743_v63 = vadd.f32 %v2841_v38, %v2801_v20 }
 0x40f   : > { %4655 = vmatmul.msk.bf16.vlgmr.msra.gmra.mxu3 %vm7561_vm1, %v6594_v4  ;;  %vm7575_vm1 = vmmov %vm7531_vm0 }
 0x410   : > { %4667 = vmatmul.msk.bf16.vlgmr.msra.gmra.mxu0 %vm7562_vm4, %v6594_v4  ;;  %vm7576_vm4 = vmmov %vm7531_vm0 }
 0x411   : > { %4683 = vmatmul.msk.bf16.vlgmr.msrb.gmra.mxu2 %vm7563_vm7, %v6594_v4  ;;  %vm7577_vm7 = vmmov %vm7531_vm0 }
 0x412   : > { %v2922_v58 = vpop.f32.mrf.mxu3  ;;  %v3042_v22 = vpop.f32.mrf.mxu1 }
 0x413   : > { %v2923_v30 = vadd.f32 %v2922_v58, %v6687_v12 }
 0x414   : > { %v3083_v35 = vpop.f32.mrf.mxu2 }
 0x415   : > { %v6752_v60 = vadd.f32 %v3083_v35, %v3042_v22  ;;  %v2953_v56 = vpop.f32.mrf.mxu0  ;;  %v6754_v5 = vadd.f32 %v2951_v46, %v2923_v30  ;;  %4671 = vmatmul.msk.bf16.vlgmr.msra.gmra.mxu1 %vm7564_vm14, %v6615_v13  ;;  %vm7578_vm14 = vmmov %vm7531_vm0 }
 0x417   : > { %v2979_v61 = vrot.slane %v6754_v5, 7 }
 0x41a   : > { %v2924_v31 = vpop.f32.mrf.mxu3  ;;  %v3044_v29 = vpop.f32.mrf.mxu1 }
 0x41b   : > { %v2925_v53 = vadd.f32 %v2924_v31, %v6693_v14 }
 0x41c   : > { %v3085_v27 = vpop.f32.mrf.mxu2 }
 0x41d   : > { %v6759_v8 = vadd.f32 %v3085_v27, %v3044_v29  ;;  %v2956_v12 = vpop.f32.mrf.mxu0  ;;  %v2972_v3 = vadd.f32 %v2953_v56, %v2925_v53  ;;  %v4852_v53 = vld [vmem:[#allocation4 + $0x68] sm:$0xff] }
 0x41e   : > { %3708 = vmatpush.bf16.msra.mxu2 %v4852_v53  ;;  %3737 = vmatpush.bf16.msra.mxu3 %v4852_v53 }
 0x41f   : > { %v2980_v34 = vrot.slane %v2972_v3, 7  ;;  %4656 = vmatmul.msk.bf16.gmra.mxu3 %vm7565_vm10, %v6599_v25  ;;  %vm7579_vm10 = vmmov %vm7531_vm0 }
 0x420   : > { %4668 = vmatmul.msk.bf16.gmra.mxu0 %vm7566_vm5, %v6599_v25  ;;  %vm7580_vm5 = vmmov %vm7531_vm0 }
 0x421   : > { %4684 = vmatmul.msk.bf16.gmra.mxu2 %vm7567_vm6, %v6599_v25  ;;  %v2993_v14 = vsel %vm1267_vm3, %v2979_v61, %v2980_v34  ;;  %vm7581_vm6 = vmmov %vm7531_vm0 }
 0x422   : > { %v2927_v21 = vpop.f32.mrf.mxu3  ;;  %v2997_v26 = vmul.f32 %v5655_v24, %v2993_v14  ;;  %v3047_v41 = vpop.f32.mrf.mxu1 }
 0x423   : > { %v2928_v57 = vadd.f32 %v2927_v21, %v6703_v36 }
 0x424   : > { %v3088_v38 = vpop.f32.mrf.mxu2  ;;  %v6777_v58 = vadd.f32 %v2997_v26, %v6705_v55 }
 0x425   : > { %v6774_v20 = vadd.f32 %v3088_v38, %v3047_v41  ;;  %v2958_v46 = vpop.f32.mrf.mxu0  ;;  %v2973_v22 = vadd.f32 %v2956_v12, %v2928_v57  ;;  %4672 = vmatmul.msk.bf16.gmra.mxu1 %vm7568_vm8, %v6619_v2  ;;  %vm7582_vm8 = vmmov %vm7531_vm0 }
 0x427   : > { %v2981_v30 = vrot.slane %v2973_v22, 7 }
 0x429   : > { %v2992_v35 = vsel %vm1267_vm3, %v2980_v34, %v2981_v30 }
 0x42a   : > { %v2929_v6 = vpop.f32.mrf.mxu3  ;;  %v2998_v56 = vmul.f32 %v5675_v49, %v2992_v35  ;;  %v3049_v31 = vpop.f32.mrf.mxu1  ;;  %v4858_v35 = vld [vmem:[#allocation6 + $0x78] sm:$0xff] }
 0x42b   : > { %v2930_v36 = vadd.f32 %v2929_v6, %v6709_v52  ;;  %v4851_v52 = vld [vmem:[#allocation4 + $0x60] sm:$0xff]  ;;  %3828 = vmatpush.bf16.msra.mxu0 %v4858_v35 }
 0x42c   : > { %v3090_v29 = vpop.f32.mrf.mxu2  ;;  %v6788_v7 = vadd.f32 %v2998_v56, %v6711_v43  ;;  %3709 = vmatpush.bf16.msra.mxu2 %v4851_v52  ;;  %3738 = vmatpush.bf16.msra.mxu3 %v4851_v52 }
 0x42d   : > { %v6785_v27 = vadd.f32 %v3090_v29, %v3049_v31  ;;  %v2961_v55 = vpop.f32.mrf.mxu0  ;;  %v2974_v12 = vadd.f32 %v2958_v46, %v2930_v36 }
 0x42f   : > { %v2982_v3 = vrot.slane %v2974_v12, 7  ;;  %4657 = vmatmul.msk.bf16.gmra.mxu3 %vm7569_vm9, %v6605_v45  ;;  %vm7583_vm9 = vcmp.lt.s32.totalorder %v5629_v0, 7 }
 0x430   : > { %4669 = vmatmul.msk.bf16.gmra.mxu0 %vm7570_vm11, %v6605_v45  ;;  %vm7584_vm11 = vmmov %vm7531_vm0 }
 0x431   : > { %4685 = vmatmul.msk.bf16.gmra.mxu2 %vm7571_vm12, %v6605_v45  ;;  %v2991_v34 = vsel %vm1267_vm3, %v2981_v30, %v2982_v3  ;;  %vm7585_vm12 = vmmov %vm7583_vm9 }
 0x432   : > { %v2932_v14 = vpop.f32.mrf.mxu3  ;;  %v2999_v43 = vmul.f32 %v5696_v44, %v2991_v34  ;;  %v3052_v21 = vpop.f32.mrf.mxu1 }
 0x433   : > { %v2933_v26 = vadd.f32 %v2932_v14, %v6719_v50 }
 0x434   : > { %v3093_v41 = vpop.f32.mrf.mxu2  ;;  %v6803_v46 = vadd.f32 %v2999_v43, %v6721_v16 }
 0x435   : > { %v6800_v57 = vadd.f32 %v3093_v41, %v3052_v21  ;;  %v2963_v38 = vpop.f32.mrf.mxu0  ;;  %v2975_v22 = vadd.f32 %v2961_v55, %v2933_v26  ;;  %4673 = vmatmul.msk.bf16.gmra.mxu1 %vm7572_vm2, %v6612_v18  ;;  %v4856_v55 = vld [vmem:[#allocation4 + $0x78] sm:$0xff]  ;;  %vm7586_vm2 = vmmov %vm7531_vm0 }
 0x436   : > { %3869 = vmatpush.bf16.msra.mxu1 %v4856_v55  ;;  %3898 = vmatpush.bf16.msrb.mxu2 %v4856_v55 }
 0x437   : > { %v2983_v30 = vrot.slane %v2975_v22, 7 }
 0x439   : > { %v2990_v6 = vsel %vm1267_vm3, %v2982_v3, %v2983_v30 }
 0x43a   : > { %v2934_v56 = vpop.f32.mrf.mxu3  ;;  %v3000_v50 = vmul.f32 %v5718_v39, %v2990_v6  ;;  %v3054_v31 = vpop.f32.mrf.mxu1 }
 0x43b   : > { %v2935_v36 = vadd.f32 %v2934_v56, %v6725_v47 }
 0x43c   : > { %v3095_v29 = vpop.f32.mrf.mxu2  ;;  %v6814_v12 = vadd.f32 %v3000_v50, %v6727_v32 }
 0x43d   : > { %v6811_v53 = vadd.f32 %v3095_v29, %v3054_v31  ;;  %v2966_v16 = vpop.f32.mrf.mxu0  ;;  %v2976_v52 = vadd.f32 %v2963_v38, %v2935_v36 }
 0x43f   : > { %v2984_v34 = vrot.slane %v2976_v52, 7  ;;  %4658 = vmatmul.msk.bf16.gmra.mxu3 %vm7573_vm15, %v6621_v17  ;;  %vm7587_vm15 = vmmov %vm7531_vm0 }
 0x440   : > { %4670 = vmatmul.msk.bf16.gmra.mxu0 %vm7531_vm0, %v6621_v17 }
 0x441   : > { %4686 = vmatmul.msk.bf16.gmra.mxu2 %vm7574_vm13, %v6621_v17  ;;  %v2989_v47 = vsel %vm1267_vm3, %v2983_v30, %v2984_v34  ;;  %vm7588_vm13 = vmmov %vm7583_vm9 }
 0x442   : > { %v2937_v3 = vpop.f32.mrf.mxu3  ;;  %v3001_v32 = vmul.f32 %v5737_v59, %v2989_v47  ;;  %v3057_v14 = vpop.f32.mrf.mxu1 }
 0x443   : > { %v2938_v43 = vadd.f32 %v2937_v3, %v6735_v1 }
 0x444   : > { %v3098_v21 = vpop.f32.mrf.mxu2  ;;  %v6829_v38 = vadd.f32 %v3001_v32, %v6737_v51 }
 0x445   : > { %v6826_v26 = vadd.f32 %v3098_v21, %v3057_v14  ;;  %v2968_v41 = vpop.f32.mrf.mxu0  ;;  %v2977_v22 = vadd.f32 %v2966_v16, %v2938_v43  ;;  %4674 = vmatmul.msk.bf16.gmra.mxu1 %vm7575_vm1, %v6623_v42  ;;  %vm7589_vm1 = vmmov %vm7531_vm0 }
 0x447   : > { %v2985_v35 = vrot.slane %v2977_v22, 7 }
 0x449   : > { %v2988_v30 = vsel %vm1267_vm3, %v2984_v34, %v2985_v35 }
 0x44a   : > { %v2939_v6 = vpop.f32.mrf.mxu3  ;;  %v3002_v56 = vmul.f32 %v5757_v9, %v2988_v30  ;;  %v3059_v50 = vpop.f32.mrf.mxu1 }
 0x44b   : > { %v2940_v1 = vadd.f32 %v2939_v6, %v6741_v37 }
 0x44c   : > { %v3100_v31 = vpop.f32.mrf.mxu2  ;;  %v6840_v51 = vadd.f32 %v3002_v56, %v6743_v63 }
 0x44d   : > { %v6837_v36 = vadd.f32 %v3100_v31, %v3059_v50  ;;  %v3187_v29 = vpop.f32.mrf.mxu0  ;;  %v2978_v16 = vadd.f32 %v2968_v41, %v2940_v1  ;;  %v4855_v1 = vld [vmem:[#allocation4 + $0x70] sm:$0xff] }
 0x44e   : > { %3870 = vmatpush.bf16.msra.mxu1 %v4855_v1  ;;  %3899 = vmatpush.bf16.msrb.mxu2 %v4855_v1 }
 0x44f   : > { %v2986_v55 = vrot.slane %v2978_v16, 7  ;;  %4695 = vmatmul.msk.bf16.vlgmr.msrb.gmra.mxu3 %vm7576_vm4, %v6594_v4  ;;  %vm7590_vm4 = vmmov %vm7583_vm9 }
 0x450   : > { %4699 = vmatmul.msk.bf16.vlgmr.msrb.gmra.mxu0 %vm7577_vm7, %v6615_v13  ;;  %vm7591_vm7 = vmmov %vm7531_vm0 }
 0x451   : > { %4723 = vmatmul.msk.bf16.vlgmr.msra.gmra.mxu2 %vm7578_vm14, %v6594_v4  ;;  %v2987_v37 = vsel %vm1267_vm3, %v2985_v35, %v2986_v55  ;;  %v2994_v63 = vsel %vm1267_vm3, %v2986_v55, %v2979_v61  ;;  %vm7592_vm14 = vmmov %vm7531_vm0 }
 0x452   : > { %v2996_v52 = vmul.f32 %v5781_v10, %v2994_v63  ;;  %v3112_v34 = vpop.f32.mrf.mxu3  ;;  %v2995_v47 = vmul.f32 %v2987_v37, %v5778_v54  ;;  %v3228_v3 = vpop.f32.mrf.mxu1 }
 0x453   : > { %v3132_v32 = vadd.f32 %v3112_v34, %v6752_v60  ;;  %v3229_v43 = vadd.f32 %v3228_v3, %v3187_v29 }
 0x454   : > { %v3257_v14 = vpop.f32.mrf.mxu2  ;;  %v3004_v21 = vadd.f32 %v2996_v52, %v6695_v40  ;;  %v6859_v22 = vadd.f32 %v2995_v47, %v6689_v33  ;;  %v4857_v40 = vld [vmem:[#allocation6 + $0x70] sm:$0xff] }
 0x455   : > { %v3189_v41 = vpop.f32.mrf.mxu0  ;;  %4711 = vmatmul.msk.bf16.vlgmr.msrb.gmra.mxu1 %vm7579_vm10, %v6594_v4  ;;  %v6863_v61 = vadd.f32 %v3257_v14, %v3229_v43  ;;  %3829 = vmatpush.bf16.msra.mxu0 %v4857_v40  ;;  %vm7593_vm10 = vmmov %vm7531_vm0 }
 0x456   : > { %v3149_v5 = vadd.f32 %v3132_v32, %v3004_v21 }
 0x457   : > { %v3285_v33 = vrot.slane %v6863_v61, 1 }
 0x45a   : > { %v3114_v35 = vpop.f32.mrf.mxu3  ;;  %v3230_v30 = vpop.f32.mrf.mxu1 }
 0x45b   : > { %v3133_v54 = vadd.f32 %v3114_v35, %v6759_v8  ;;  %v3231_v60 = vadd.f32 %v3230_v30, %v3189_v41 }
 0x45c   : > { %v3259_v6 = vpop.f32.mrf.mxu2 }
 0x45d   : > { %v3192_v56 = vpop.f32.mrf.mxu0  ;;  %v3150_v50 = vadd.f32 %v3133_v54, %v6777_v58  ;;  %v3278_v31 = vadd.f32 %v3259_v6, %v3231_v60 }
 0x45f   : > { %4696 = vmatmul.msk.bf16.gmra.mxu3 %vm7580_vm5, %v6599_v25  ;;  %v3286_v29 = vrot.slane %v3278_v31, 1  ;;  %vm7594_vm5 = vmmov %vm7590_vm4 }
 0x460   : > { %4700 = vmatmul.msk.bf16.gmra.mxu0 %vm7581_vm6, %v6619_v2  ;;  %vm7595_vm6 = vmmov %vm7531_vm0 }
 0x461   : > { %4724 = vmatmul.msk.bf16.gmra.mxu2 %vm7582_vm8, %v6599_v25  ;;  %v3299_v8 = vsel %vm7583_vm9, %v3285_v33, %v3286_v29  ;;  %vm7596_vm8 = vmmov %vm7590_vm4 }
 0x462   : > { %v3117_v58 = vpop.f32.mrf.mxu3  ;;  %v3302_v16 = vmul.f32 %v5895_v11, %v3299_v8  ;;  %v3233_v55 = vpop.f32.mrf.mxu1  ;;  %vm7597_vm9 = vmmov %vm7531_vm0 }
 0x463   : > { %v3134_v37 = vadd.f32 %v3117_v58, %v6774_v20  ;;  %v3234_v52 = vadd.f32 %v3233_v55, %v3192_v56  ;;  %v4862_v55 = vld [vmem:[#allocation6 + $0x88] sm:$0xff] }
 0x464   : > { %v3262_v63 = vpop.f32.mrf.mxu2  ;;  %v6880_v47 = vadd.f32 %v3302_v16, %v3149_v5  ;;  %3973 = vmatpush.bf16.msrb.mxu3 %v4862_v55 }
 0x465   : > { %v3194_v34 = vpop.f32.mrf.mxu0  ;;  %v3151_v3 = vadd.f32 %v3134_v37, %v6788_v7  ;;  %4712 = vmatmul.msk.bf16.gmra.mxu1 %vm7584_vm11, %v6599_v25  ;;  %v3279_v32 = vadd.f32 %v3262_v63, %v3234_v52  ;;  %v4860_v63 = vld [vmem:[#allocation4 + $0x88] sm:$0xff]  ;;  %vm7598_vm11 = vmmov %vm7531_vm0 }
 0x466   : > { %4014 = vmatpush.bf16.msrb.mxu0 %v4860_v63  ;;  %4043 = vmatpush.bf16.msrb.mxu1 %v4860_v63 }
 0x467   : > { %v3287_v14 = vrot.slane %v3279_v32, 1 }
 0x469   : > { %v3298_v43 = vsel %vm7585_vm12, %v3286_v29, %v3287_v14  ;;  %vm7599_vm12 = vmmov %vm7531_vm0 }
 0x46a   : > { %v3119_v21 = vpop.f32.mrf.mxu3  ;;  %v3303_v41 = vmul.f32 %v5915_v62, %v3298_v43  ;;  %v3235_v35 = vpop.f32.mrf.mxu1 }
 0x46b   : > { %v3135_v20 = vadd.f32 %v3119_v21, %v6785_v27  ;;  %v3236_v54 = vadd.f32 %v3235_v35, %v3194_v34 }
 0x46c   : > { %v3264_v30 = vpop.f32.mrf.mxu2  ;;  %v6889_v6 = vadd.f32 %v3303_v41, %v3150_v50 }
 0x46d   : > { %v3197_v5 = vpop.f32.mrf.mxu0  ;;  %v3152_v7 = vadd.f32 %v3135_v20, %v6803_v46  ;;  %v3280_v60 = vadd.f32 %v3264_v30, %v3236_v54 }
 0x46f   : > { %4697 = vmatmul.msk.bf16.gmra.mxu3 %vm7586_vm2, %v6605_v45  ;;  %v3288_v56 = vrot.slane %v3280_v60, 1  ;;  %vm7600_vm2 = vmmov %vm7590_vm4 }
 0x470   : > { %4701 = vmatmul.msk.bf16.gmra.mxu0 %vm7587_vm15, %v6612_v18  ;;  %vm7601_vm15 = vmmov %vm7600_vm2 }
 0x471   : > { %4725 = vmatmul.msk.bf16.gmra.mxu2 %vm7531_vm0, %v6605_v45  ;;  %v3297_v27 = vsel %vm7588_vm13, %v3287_v14, %v3288_v56  ;;  %vm7603_vm13 = vmmov %vm7531_vm0 }
 0x472   : > { %v3122_v40 = vpop.f32.mrf.mxu3  ;;  %v3304_v50 = vmul.f32 %v5935_v15, %v3297_v27  ;;  %v3238_v1 = vpop.f32.mrf.mxu1 }
 0x473   : > { %v3136_v46 = vadd.f32 %v3122_v40, %v6800_v57  ;;  %v3239_v29 = vadd.f32 %v3238_v1, %v3197_v5 }
 0x474   : > { %v3267_v31 = vpop.f32.mrf.mxu2  ;;  %v6902_v58 = vadd.f32 %v3304_v50, %v3151_v3 }
 0x475   : > { %v3199_v8 = vpop.f32.mrf.mxu0  ;;  %v3153_v16 = vadd.f32 %v3136_v46, %v6814_v12  ;;  %4713 = vmatmul.msk.bf16.gmra.mxu1 %vm7589_vm1, %v6605_v45  ;;  %v3281_v37 = vadd.f32 %v3267_v31, %v3239_v29  ;;  %vm7604_vm1 = vmmov %vm7531_vm0 }
 0x477   : > { %v3289_v52 = vrot.slane %v3281_v37, 1 }
 0x479   : > { %v3296_v57 = vsel %vm7590_vm4, %v3288_v56, %v3289_v52  ;;  %vm7605_vm4 = vmmov %vm7531_vm0 }
 0x47a   : > { %v3124_v34 = vpop.f32.mrf.mxu3  ;;  %v3305_v32 = vmul.f32 %v5956_v19, %v3296_v57  ;;  %v3240_v3 = vpop.f32.mrf.mxu1 }
 0x47b   : > { %v3137_v14 = vadd.f32 %v3124_v34, %v6811_v53  ;;  %v3241_v43 = vadd.f32 %v3240_v3, %v3199_v8 }
 0x47c   : > { %v3269_v12 = vpop.f32.mrf.mxu2  ;;  %v6911_v41 = vadd.f32 %v3305_v32, %v3152_v7 }
 0x47d   : > { %v3202_v21 = vpop.f32.mrf.mxu0  ;;  %v3154_v35 = vadd.f32 %v3137_v14, %v6829_v38  ;;  %v3282_v20 = vadd.f32 %v3269_v12, %v3241_v43  ;;  %v7602_v12 = vld [vmem:[#allocation11_spill] sm:$0xff] }
 0x47f   : > { %4698 = vmatmul.msk.bf16.gmra.mxu3 %vm7591_vm7, %v6621_v17  ;;  %v3290_v30 = vrot.slane %v3282_v20, 1  ;;  %vm7606_vm7 = vmmov %vm7531_vm0 }
 0x480   : > { %4702 = vmatmul.msk.bf16.gmra.mxu0 %vm7592_vm14, %v6623_v42  ;;  %vm7607_vm14 = vmmov %vm7531_vm0 }
 0x481   : > { %4726 = vmatmul.msk.bf16.gmra.mxu2 %vm7593_vm10, %v6621_v17  ;;  %v3295_v53 = vsel %vm7594_vm5, %v3289_v52, %v3290_v30  ;;  %vm7608_vm10 = vmmov %vm7531_vm0 }
 0x482   : > { %v3127_v54 = vpop.f32.mrf.mxu3  ;;  %v3306_v5 = vmul.f32 %v5976_v28, %v3295_v53  ;;  %v3243_v7 = vpop.f32.mrf.mxu1  ;;  %vm7609_vm5 = vmmov %vm7531_vm0 }
 0x483   : > { %v3138_v38 = vadd.f32 %v3127_v54, %v6826_v26  ;;  %v3244_v56 = vadd.f32 %v3243_v7, %v3202_v21 }
 0x484   : > { %v3272_v60 = vpop.f32.mrf.mxu2  ;;  %v6924_v40 = vadd.f32 %v3306_v5, %v3153_v16 }
 0x485   : > { %v3204_v27 = vpop.f32.mrf.mxu0  ;;  %v3155_v50 = vadd.f32 %v3138_v38, %v6840_v51  ;;  %4714 = vmatmul.msk.bf16.gmra.mxu1 %vm7595_vm6, %v6621_v17  ;;  %v3283_v1 = vadd.f32 %v3272_v60, %v3244_v56  ;;  %vm7610_vm6 = vmmov %vm7531_vm0 }
 0x487   : > { %v3291_v46 = vrot.slane %v3283_v1, 1 }
 0x489   : > { %v3294_v31 = vsel %vm7596_vm8, %v3290_v30, %v3291_v46  ;;  %v4861_v30 = vld [vmem:[#allocation6 + $0x80] sm:$0xff]  ;;  %vm7611_vm8 = vmmov %vm7531_vm0 }
 0x48a   : > { %v3129_v29 = vpop.f32.mrf.mxu3  ;;  %v3307_v8 = vmul.f32 %v5994_v23, %v3294_v31  ;;  %v3245_v55 = vpop.f32.mrf.mxu1  ;;  %3974 = vmatpush.bf16.msrb.mxu3 %v4861_v30 }
 0x48b   : > { %v3139_v26 = vadd.f32 %v3129_v29, %v6837_v36  ;;  %v3246_v63 = vadd.f32 %v3245_v55, %v3204_v27 }
 0x48c   : > { %v3274_v37 = vpop.f32.mrf.mxu2  ;;  %v6933_v52 = vadd.f32 %v3307_v8, %v3154_v35 }
 0x48d   : > { %v3389_v16 = vpop.f32.mrf.mxu0  ;;  %v3140_v51 = vmul.f32 0.0, %v3139_v26  ;;  %v3284_v57 = vadd.f32 %v3274_v37, %v3246_v63 }
 0x48f   : > { %v3148_v34 = vadd.f32 %v3140_v51, %v6859_v22  ;;  %4727 = vmatmul.msk.bf16.vlgmr.msra.gmra.mxu3 %vm7597_vm9, %v6615_v13  ;;  %v3292_v32 = vrot.slane %v3284_v57, 1  ;;  %vm7612_vm9 = vmmov %vm7531_vm0 }
 0x490   : > { %4739 = vmatmul.msk.bf16.vlgmr.msra.gmra.mxu0 %vm7598_vm11, %v6594_v4  ;;  %vm7613_vm11 = vmmov %vm7531_vm0 }
 0x491   : > { %4755 = vmatmul.msk.bf16.vlgmr.msrb.gmra.mxu2 %vm7599_vm12, %v6615_v13  ;;  %v3293_v36 = vsel %vm7600_vm2, %v3291_v46, %v3292_v32  ;;  %v3300_v3 = vsel %vm7601_vm15, %v3292_v32, %v3285_v33  ;;  %vm7614_vm12 = vmmov %vm7531_vm0 }
 0x492   : > { %v3348_v14 = vpop.f32.mrf.mxu3  ;;  %v3301_v22 = vmul.f32 %v3300_v3, %v6015_v48  ;;  %v3308_v43 = vmul.f32 %v7602_v12, %v3293_v36  ;;  %v3418_v21 = vpop.f32.mrf.mxu1  ;;  %v4859_v48 = vld [vmem:[#allocation4 + $0x80] sm:$0xff]  ;;  %vm7615_vm2 = vmmov %vm7531_vm0 }
 0x493   : > { %v3390_v35 = vadd.f32 %v3389_v16, %v3348_v14  ;;  %4015 = vmatpush.bf16.msrb.mxu0 %v4859_v48  ;;  %4044 = vmatpush.bf16.msrb.mxu1 %v4859_v48  ;;  %vm7616_vm15 = vmmov %vm7531_vm0 }
 0x494   : > { %v6950_v20 = vpop.f32.mrf.mxu2  ;;  %v6952_v54 = vadd.f32 %v3301_v22, %v3148_v34  ;;  %v6954_v5 = vadd.f32 %v3308_v43, %v3155_v50 }
 0x495   : > { %v3391_v53 = vpop.f32.mrf.mxu0  ;;  %v6956_v7 = vadd.f32 %v3418_v21, %v3390_v35  ;;  %4751 = vmatmul.msk.bf16.vlgmr.msra.gmra.mxu1 %vm7531_vm0, %v6594_v4 }
 0x497   : > { %v3446_v1 = vrot.slane %v6956_v7, 7 }
 0x49a   : > { %v3350_v61 = vpop.f32.mrf.mxu3  ;;  %v3420_v33 = vpop.f32.mrf.mxu1 }
 0x49b   : > { %v3392_v38 = vadd.f32 %v3391_v53, %v3350_v61 }
 0x49c   : > { %v6960_v60 = vpop.f32.mrf.mxu2 }
 0x49d   : > { %v3394_v56 = vpop.f32.mrf.mxu0  ;;  %v3439_v27 = vadd.f32 %v3420_v33, %v3392_v38 }
 0x49f   : > { %v3447_v50 = vrot.slane %v3439_v27, 7  ;;  %4728 = vmatmul.msk.bf16.gmra.mxu3 %vm7603_vm13, %v6619_v2  ;;  %vm7618_vm13 = vmmov %vm7531_vm0 }
 0x4a0   : > { %4740 = vmatmul.msk.bf16.gmra.mxu0 %vm7604_vm1, %v6599_v25  ;;  %vm7619_vm1 = vmmov %vm7531_vm0 }
 0x4a1   : > { %4756 = vmatmul.msk.bf16.gmra.mxu2 %vm7605_vm4, %v6619_v2  ;;  %v3460_v46 = vsel %vm1267_vm3, %v3446_v1, %v3447_v50  ;;  %vm7620_vm4 = vcmp.lt.s32.totalorder %v5629_v0, 7 }
 0x4a2   : > { %v3463_v31 = vmul.f32 %v5781_v10, %v3460_v46  ;;  %v3353_v29 = vpop.f32.mrf.mxu3  ;;  %v3423_v8 = vpop.f32.mrf.mxu1 }
 0x4a3   : > { %v3395_v55 = vadd.f32 %v3394_v56, %v3353_v29 }
 0x4a4   : > { %v6974_v26 = vpop.f32.mrf.mxu2  ;;  %v6977_v63 = vadd.f32 %v3463_v31, %v6880_v47 }
 0x4a5   : > { %v3396_v37 = vpop.f32.mrf.mxu0  ;;  %v3440_v16 = vadd.f32 %v3423_v8, %v3395_v55  ;;  %4752 = vmatmul.msk.bf16.gmra.mxu1 %vm7606_vm7, %v6599_v25  ;;  %vm7622_vm7 = vmmov %vm7531_vm0 }
 0x4a7   : > { %v3448_v51 = vrot.slane %v3440_v16, 7 }
 0x4a9   : > { %v3459_v57 = vsel %vm1267_vm3, %v3447_v50, %v3448_v51 }
 0x4aa   : > { %v3464_v34 = vmul.f32 %v5655_v24, %v3459_v57  ;;  %v3355_v32 = vpop.f32.mrf.mxu3  ;;  %v3425_v36 = vpop.f32.mrf.mxu1 }
 0x4ab   : > { %v3397_v3 = vadd.f32 %v3396_v37, %v3355_v32 }
 0x4ac   : > { %v6984_v14 = vpop.f32.mrf.mxu2  ;;  %v6987_v43 = vadd.f32 %v3464_v34, %v6889_v6 }
 0x4ad   : > { %v3399_v22 = vpop.f32.mrf.mxu0  ;;  %v3441_v47 = vadd.f32 %v3425_v36, %v3397_v3 }
 0x4af   : > { %v3449_v21 = vrot.slane %v3441_v47, 7  ;;  %4729 = vmatmul.msk.bf16.gmra.mxu3 %vm7607_vm14, %v6612_v18  ;;  %vm7623_vm14 = vmmov %vm7620_vm4 }
 0x4b0   : > { %4741 = vmatmul.msk.bf16.gmra.mxu0 %vm7608_vm10, %v6605_v45  ;;  %vm7624_vm10 = vmmov %vm7531_vm0 }
 0x4b1   : > { %4757 = vmatmul.msk.bf16.gmra.mxu2 %vm7609_vm5, %v6612_v18  ;;  %v3458_v35 = vsel %vm1267_vm3, %v3448_v51, %v3449_v21  ;;  %vm7625_vm5 = vmmov %vm7531_vm0 }
 0x4b2   : > { %v3465_v30 = vmul.f32 %v5675_v49, %v3458_v35  ;;  %v3358_v53 = vpop.f32.mrf.mxu3  ;;  %v3428_v61 = vpop.f32.mrf.mxu1 }
 0x4b3   : > { %v3400_v6 = vadd.f32 %v3399_v22, %v3358_v53 }
 0x4b4   : > { %v6998_v48 = vpop.f32.mrf.mxu2  ;;  %v7001_v38 = vadd.f32 %v3465_v30, %v6902_v58 }
 0x4b5   : > { %v3401_v33 = vpop.f32.mrf.mxu0  ;;  %v3442_v56 = vadd.f32 %v3428_v61, %v3400_v6  ;;  %4753 = vmatmul.msk.bf16.gmra.mxu1 %vm7610_vm6, %v6605_v45  ;;  %vm7626_vm6 = vmmov %vm7620_vm4 }
 0x4b7   : > { %v3450_v27 = vrot.slane %v3442_v56, 7 }
 0x4b9   : > { %v3457_v50 = vsel %vm1267_vm3, %v3449_v21, %v3450_v27 }
 0x4ba   : > { %v3466_v46 = vmul.f32 %v5696_v44, %v3457_v50  ;;  %v3360_v31 = vpop.f32.mrf.mxu3  ;;  %v3430_v29 = vpop.f32.mrf.mxu1 }
 0x4bb   : > { %v3402_v8 = vadd.f32 %v3401_v33, %v3360_v31 }
 0x4bc   : > { %v7008_v55 = vpop.f32.mrf.mxu2  ;;  %v7011_v16 = vadd.f32 %v3466_v46, %v6911_v41 }
 0x4bd   : > { %v3404_v37 = vpop.f32.mrf.mxu0  ;;  %v3443_v58 = vadd.f32 %v3430_v29, %v3402_v8  ;;  %v7617_v8 = vld [vmem:[#allocation9_spill] sm:$0xff] }
 0x4bf   : > { %v3451_v51 = vrot.slane %v3443_v58, 7  ;;  %4730 = vmatmul.msk.bf16.gmra.mxu3 %vm7611_vm8, %v6623_v42  ;;  %vm7627_vm8 = vmmov %vm7531_vm0 }
 0x4c0   : > { %4742 = vmatmul.msk.bf16.gmra.mxu0 %vm7612_vm9, %v6621_v17  ;;  %vm7628_vm9 = vmmov %vm7620_vm4 }
 0x4c1   : > { %4758 = vmatmul.msk.bf16.gmra.mxu2 %vm7613_vm11, %v6623_v42  ;;  %v3456_v57 = vsel %vm1267_vm3, %v3450_v27, %v3451_v51  ;;  %vm7629_vm11 = vmmov %vm7531_vm0 }
 0x4c2   : > { %v3467_v34 = vmul.f32 %v5718_v39, %v3456_v57  ;;  %v3363_v32 = vpop.f32.mrf.mxu3  ;;  %v3433_v36 = vpop.f32.mrf.mxu1 }
 0x4c3   : > { %v3405_v41 = vadd.f32 %v3404_v37, %v3363_v32 }
 0x4c4   : > { %v7022_v3 = vpop.f32.mrf.mxu2  ;;  %v7025_v47 = vadd.f32 %v3467_v34, %v6924_v40 }
 0x4c5   : > { %v3406_v22 = vpop.f32.mrf.mxu0  ;;  %v3444_v21 = vadd.f32 %v3433_v36, %v3405_v41  ;;  %4754 = vmatmul.msk.bf16.gmra.mxu1 %vm7614_vm12, %v6621_v17  ;;  %vm7630_vm12 = vmmov %vm7531_vm0 }
 0x4c7   : > { %v3452_v35 = vrot.slane %v3444_v21, 7 }
 0x4c9   : > { %v3455_v30 = vsel %vm1267_vm3, %v3451_v51, %v3452_v35 }
 0x4ca   : > { %v3468_v53 = vmul.f32 %v5737_v59, %v3455_v30  ;;  %v3365_v61 = vpop.f32.mrf.mxu3  ;;  %v3435_v6 = vpop.f32.mrf.mxu1 }
 0x4cb   : > { %v3407_v33 = vadd.f32 %v3406_v22, %v3365_v61 }
 0x4cc   : > { %v7032_v56 = vpop.f32.mrf.mxu2  ;;  %v7035_v50 = vadd.f32 %v3468_v53, %v6933_v52 }
 0x4cd   : > { %v3579_v27 = vpop.f32.mrf.mxu0  ;;  %v3445_v40 = vadd.f32 %v3435_v6, %v3407_v33 }
 0x4cf   : > { %v3453_v46 = vrot.slane %v3445_v40, 7  ;;  %4767 = vmatmul.msk.bf16.vlgmr.msrb.gmra.mxu3 %vm7615_vm2, %v6594_v4  ;;  %vm7631_vm2 = vmmov %vm7620_vm4 }
 0x4d0   : > { %4779 = vmatmul.msk.bf16.vlgmr.msrb.gmra.mxu0 %vm7616_vm15, %v6594_v4  ;;  %vm7632_vm15 = vmmov %vm7531_vm0 }
 0x4d1   : > { %v3454_v31 = vsel %vm1267_vm3, %v3452_v35, %v3453_v46  ;;  %v3461_v29 = vsel %vm1267_vm3, %v3453_v46, %v3446_v1 }
 0x4d2   : > { %v3462_v37 = vmul.f32 %v7617_v8, %v3461_v29  ;;  %v3469_v52 = vmul.f32 %v5757_v9, %v3454_v31  ;;  %v3550_v58 = vpop.f32.mrf.mxu3  ;;  %v7049_v51 = vpop.f32.mrf.mxu1 }
 0x4d3   : > { %v3551_v57 = vadd.f32 %v3550_v58, %v6950_v20 }
 0x4d4   : > { %v7052_v34 = vpop.f32.mrf.mxu2  ;;  %v7055_v4 = vadd.f32 %v3469_v52, %v6954_v5  ;;  %v3470_v7 = vadd.f32 %v3462_v37, %v6952_v54 }
 0x4d5   : > { %v3581_v32 = vpop.f32.mrf.mxu0  ;;  %v7058_v36 = vadd.f32 %v3579_v27, %v3551_v57  ;;  %4783 = vmatmul.msk.bf16.vlgmr.msrb.gmra.mxu1 %vm7531_vm0, %v6615_v13  ;;  %vm7633_vm0 = vmmov %vm7631_vm2 }
 0x4d7   : > { %v3607_v5 = vrot.slane %v7058_v36, 1 }
 0x4da   : > { %v3552_v1 = vpop.f32.mrf.mxu3  ;;  %v7062_v9 = vpop.f32.mrf.mxu1 }
 0x4db   : > { %v3553_v41 = vadd.f32 %v3552_v1, %v6960_v60  ;;  %v7621_v60 = vld [vmem:[#allocation10_spill] sm:$0xff] }
 0x4dc   : > { %v7065_v22 = vpop.f32.mrf.mxu2 }
 0x4dd   : > { %v3584_v20 = vpop.f32.mrf.mxu0  ;;  %v3600_v21 = vadd.f32 %v3581_v32, %v3553_v41 }
 0x4df   : > { %v3608_v35 = vrot.slane %v3600_v21, 1  ;;  %4768 = vmatmul.msk.bf16.gmra.mxu3 %vm7618_vm13, %v6599_v25  ;;  %vm7634_vm13 = vmmov %vm7633_vm0 }
 0x4e0   : > { %4780 = vmatmul.msk.bf16.gmra.mxu0 %vm7619_vm1, %v6599_v25  ;;  %vm7635_vm1 = vmmov %vm7633_vm0 }
 0x4e1   : > { %v3621_v13 = vsel %vm7620_vm4, %v3607_v5, %v3608_v35  ;;  %vm7639_vm4 = vmmov %vm7633_vm0 }
 0x4e2   : > { %v3555_v54 = vpop.f32.mrf.mxu3  ;;  %v3623_v30 = vmul.f32 %v7621_v60, %v3621_v13  ;;  %v7077_v53 = vpop.f32.mrf.mxu1 }
 0x4e3   : > { %v3556_v61 = vadd.f32 %v3555_v54, %v6974_v26 }
 0x4e4   : > { %v7080_v6 = vpop.f32.mrf.mxu2  ;;  %v7082_v27 = vadd.f32 %v3623_v30, %v3470_v7 }
 0x4e5   : > { %v3586_v33 = vpop.f32.mrf.mxu0  ;;  %v3601_v40 = vadd.f32 %v3584_v20, %v3556_v61  ;;  %4784 = vmatmul.msk.bf16.gmra.mxu1 %vm7622_vm7, %v6619_v2  ;;  %vm7640_vm7 = vmmov %vm7625_vm5 }
 0x4e7   : > { %v3609_v25 = vrot.slane %v3601_v40, 1 }
 0x4e9   : > { %v3620_v46 = vsel %vm7623_vm14, %v3608_v35, %v3609_v25  ;;  %vm7641_vm14 = vmmov %vm7633_vm0 }
 0x4ea   : > { %v3557_v31 = vpop.f32.mrf.mxu3  ;;  %v3624_v29 = vmul.f32 %v5895_v11, %v3620_v46  ;;  %v7089_v37 = vpop.f32.mrf.mxu1 }
 0x4eb   : > { %v3558_v26 = vadd.f32 %v3557_v31, %v6984_v14 }
 0x4ec   : > { %v7092_v52 = vpop.f32.mrf.mxu2  ;;  %v7095_v57 = vadd.f32 %v3624_v29, %v6977_v63 }
 0x4ed   : > { %v3589_v58 = vpop.f32.mrf.mxu0  ;;  %v3602_v32 = vadd.f32 %v3586_v33, %v3558_v26 }
 0x4ef   : > { %v3610_v7 = vrot.slane %v3602_v32, 1  ;;  %4769 = vmatmul.msk.bf16.gmra.mxu3 %vm7624_vm10, %v6605_v45  ;;  %vm7642_vm10 = vmmov %vm7625_vm5 }
 0x4f0   : > { %4781 = vmatmul.msk.bf16.gmra.mxu0 %vm7625_vm5, %v6605_v45  ;;  %vm7643_vm5 = vmmov %vm7633_vm0 }
 0x4f1   : > { %v3619_v2 = vsel %vm7626_vm6, %v3609_v25, %v3610_v7  ;;  %vm7644_vm6 = vmmov %vm7640_vm7 }
 0x4f2   : > { %v3560_v1 = vpop.f32.mrf.mxu3  ;;  %v3625_v14 = vmul.f32 %v5915_v62, %v3619_v2  ;;  %v7104_v41 = vpop.f32.mrf.mxu1 }
 0x4f3   : > { %v3561_v20 = vadd.f32 %v3560_v1, %v6998_v48 }
 0x4f4   : > { %v7107_v63 = vpop.f32.mrf.mxu2  ;;  %v7110_v35 = vadd.f32 %v3625_v14, %v6987_v43 }
 0x4f5   : > { %v3591_v21 = vpop.f32.mrf.mxu0  ;;  %v3603_v13 = vadd.f32 %v3589_v58, %v3561_v20  ;;  %4785 = vmatmul.msk.bf16.gmra.mxu1 %vm7627_vm8, %v6612_v18  ;;  %vm7645_vm8 = vmmov %vm7633_vm0 }
 0x4f7   : > { %v3611_v45 = vrot.slane %v3603_v13, 1 }
 0x4f9   : > { %v3618_v54 = vsel %vm7628_vm9, %v3610_v7, %v3611_v45  ;;  %vm7646_vm9 = vmmov %vm7644_vm6 }
 0x4fa   : > { %v3562_v30 = vpop.f32.mrf.mxu3  ;;  %v3626_v61 = vmul.f32 %v5935_v15, %v3618_v54  ;;  %v7117_v33 = vpop.f32.mrf.mxu1 }
 0x4fb   : > { %v3563_v48 = vadd.f32 %v3562_v30, %v7008_v55 }
 0x4fc   : > { %v7120_v40 = vpop.f32.mrf.mxu2  ;;  %v7123_v43 = vadd.f32 %v3626_v61, %v7001_v38 }
 0x4fd   : > { %v3594_v25 = vpop.f32.mrf.mxu0  ;;  %v3604_v46 = vadd.f32 %v3591_v21, %v3563_v48 }
 0x4ff   : > { %v3612_v31 = vrot.slane %v3604_v46, 1  ;;  %4770 = vmatmul.msk.bf16.gmra.mxu3 %vm7629_vm11, %v6621_v17  ;;  %vm7647_vm11 = vmmov %vm7633_vm0 }
 0x500   : > { %4782 = vmatmul.msk.bf16.gmra.mxu0 %vm7630_vm12, %v6621_v17  ;;  %vm7648_vm12 = vmmov %vm7644_vm6 }
 0x501   : > { %v3617_v18 = vsel %vm7631_vm2, %v3611_v45, %v3612_v31  ;;  %vm7649_vm2 = vmmov %vm7633_vm0 }
 0x502   : > { %v3565_v29 = vpop.f32.mrf.mxu3  ;;  %v3627_v55 = vmul.f32 %v5956_v19, %v3617_v18  ;;  %v7132_v26 = vpop.f32.mrf.mxu1 }
 0x503   : > { %v3566_v58 = vadd.f32 %v3565_v29, %v7022_v3 }
 0x504   : > { %v7135_v38 = vpop.f32.mrf.mxu2  ;;  %v7138_v7 = vadd.f32 %v3627_v55, %v7011_v16 }
 0x505   : > { %v3596_v32 = vpop.f32.mrf.mxu0  ;;  %v3605_v2 = vadd.f32 %v3594_v25, %v3566_v58  ;;  %4786 = vmatmul.msk.bf16.gmra.mxu1 %vm7632_vm15, %v6623_v42  ;;  %v3712_v42 = vadd.f32 %v7052_v34, %v7049_v51  ;;  %vm7650_vm15 = vmmov %vm7633_vm0 }
 0x507   : > { %v3613_v17 = vrot.slane %v3605_v2, 1 }
 0x509   : > { %v3616_v1 = vsel %vm7633_vm0, %v3612_v31, %v3613_v17 }
 0x50a   : > { %v3567_v14 = vpop.f32.mrf.mxu3  ;;  %v3628_v20 = vmul.f32 %v5976_v28, %v3616_v1  ;;  %v7145_v21 = vpop.f32.mrf.mxu1 }
 0x50b   : > { %v3568_v3 = vadd.f32 %v3567_v14, %v7032_v56 }
 0x50c   : > { %v7148_v13 = vpop.f32.mrf.mxu2  ;;  %v7151_v16 = vadd.f32 %v3628_v20, %v7025_v47  ;;  %v3717_v20 = vadd.f32 %v7080_v6, %v7077_v53  ;;  %v3719_v53 = vadd.f32 %v7092_v52, %v7089_v37  ;;  %v3722_v37 = vadd.f32 %v7107_v63, %v7104_v41 }
 0x50d   : > { %v3831_v45 = vpop.f32.mrf.mxu0  ;;  %v3606_v54 = vadd.f32 %v3596_v32, %v3568_v3  ;;  %v3724_v41 = vadd.f32 %v7120_v40, %v7117_v33  ;;  %v3727_v33 = vadd.f32 %v7135_v38, %v7132_v26  ;;  %v3729_v26 = vadd.f32 %v7148_v13, %v7145_v21 }
 0x50f   : > { %v3614_v30 = vrot.slane %v3606_v54, 1 }
 0x511   : > { %v3615_v61 = vsel %vm7634_vm13, %v3613_v17, %v3614_v30  ;;  %v3622_v48 = vsel %vm7635_vm1, %v3614_v30, %v3607_v5 }
 0x512   : > { %v3630_v56 = vmul.f32 %v7602_v12, %v3622_v48  ;;  %v3740_v25 = vpop.f32.mrf.mxu3  ;;  %v3629_v46 = vmul.f32 %v5994_v23, %v3615_v61  ;;  %v3872_v47 = vpop.f32.mrf.mxu1  ;;  %v3714_v12 = vadd.f32 %v7065_v22, %v7062_v9 }
 0x513   : > { %v7163_v31 = vadd.f32 %v3740_v25, %v3712_v42  ;;  %v7167_v29 = vadd.f32 %v3872_v47, %v3831_v45 }
 0x514   : > { %v7165_v18 = vpop.f32.mrf.mxu2  ;;  %v7170_v34 = vadd.f32 %v3630_v56, %v7055_v4  ;;  %v7173_v36 = vadd.f32 %v3629_v46, %v7035_v50 }
 0x515   : > { %v3833_v51 = vpop.f32.mrf.mxu0  ;;  %v3768_v1 = vrot.slane %v7163_v31, 7 }
 0x51a   : > { %v3742_v5 = vpop.f32.mrf.mxu3  ;;  %v3874_v55 = vpop.f32.mrf.mxu1 }
 0x51b   : > { %v3761_v58 = vadd.f32 %v3742_v5, %v3714_v12  ;;  %v3875_v2 = vadd.f32 %v3874_v55, %v3833_v51 }
 0x51c   : > { %v3903_v32 = vpop.f32.mrf.mxu2 }
 0x51d   : > { %v3836_v17 = vpop.f32.mrf.mxu0  ;;  %v3769_v14 = vrot.slane %v3761_v58, 7  ;;  %v3922_v22 = vadd.f32 %v3903_v32, %v3875_v2 }
 0x51f   : > { %v3782_v4 = vsel %vm1267_vm3, %v3768_v1, %v3769_v14 }
 0x520   : > { %v3784_v50 = vmul.f32 %v7617_v8, %v3782_v4 }
 0x522   : > { %v3792_v9 = vadd.f32 %v3784_v50, %v7082_v27  ;;  %v3745_v3 = vpop.f32.mrf.mxu3  ;;  %v3877_v45 = vpop.f32.mrf.mxu1 }
 0x523   : > { %v3762_v54 = vadd.f32 %v3745_v3, %v3717_v20  ;;  %v3878_v61 = vadd.f32 %v3877_v45, %v3836_v17 }
 0x524   : > { %v3906_v30 = vpop.f32.mrf.mxu2  ;;  %v7186_v42 = vadd.f32 %v3922_v22, %v3792_v9 }
 0x525   : > { %v3838_v48 = vpop.f32.mrf.mxu0  ;;  %v3770_v56 = vrot.slane %v3762_v54, 7  ;;  %v3923_v27 = vadd.f32 %v3906_v30, %v3878_v61 }
 0x527   : > { %v3781_v25 = vsel %vm1267_vm3, %v3769_v14, %v3770_v56 }
 0x528   : > { %v3785_v8 = vmul.f32 %v5781_v10, %v3781_v25 }
 0x52a   : > { %v3793_v6 = vadd.f32 %v3785_v8, %v7095_v57  ;;  %v3747_v46 = vpop.f32.mrf.mxu3  ;;  %v3879_v47 = vpop.f32.mrf.mxu1 }
 0x52b   : > { %v3763_v51 = vadd.f32 %v3747_v46, %v3719_v53  ;;  %v3880_v55 = vadd.f32 %v3879_v47, %v3838_v48 }
 0x52c   : > { %v3908_v12 = vpop.f32.mrf.mxu2  ;;  %v7194_v5 = vadd.f32 %v3923_v27, %v3793_v6 }
 0x52d   : > { %v3841_v58 = vpop.f32.mrf.mxu0  ;;  %v3771_v32 = vrot.slane %v3763_v51, 7  ;;  %v3924_v57 = vadd.f32 %v3908_v12, %v3880_v55 }
 0x52f   : > { %v3780_v2 = vsel %vm1267_vm3, %v3770_v56, %v3771_v32 }
 0x530   : > { %v3786_v10 = vmul.f32 %v5655_v24, %v3780_v2 }
 0x532   : > { %v3794_v52 = vadd.f32 %v3786_v10, %v7110_v35  ;;  %v3750_v17 = vpop.f32.mrf.mxu3  ;;  %v3882_v14 = vpop.f32.mrf.mxu1 }
 0x533   : > { %v3764_v4 = vadd.f32 %v3750_v17, %v3722_v37  ;;  %v3883_v9 = vadd.f32 %v3882_v14, %v3841_v58 }
 0x534   : > { %v3911_v50 = vpop.f32.mrf.mxu2  ;;  %v7202_v20 = vadd.f32 %v3924_v57, %v3794_v52 }
 0x535   : > { %v3843_v22 = vpop.f32.mrf.mxu0  ;;  %v3772_v3 = vrot.slane %v3764_v4, 7  ;;  %v3925_v35 = vadd.f32 %v3911_v50, %v3883_v9  ;;  %v3921_v50 = vadd.f32 %v7165_v18, %v7167_v29 }
 0x537   : > { %v3779_v45 = vsel %vm1267_vm3, %v3771_v32, %v3772_v3 }
 0x538   : > { %v3787_v24 = vmul.f32 %v5675_v49, %v3779_v45 }
 0x53a   : > { %v3795_v63 = vadd.f32 %v3787_v24, %v7123_v43  ;;  %v3752_v54 = vpop.f32.mrf.mxu3  ;;  %v3884_v30 = vpop.f32.mrf.mxu1 }
 0x53b   : > { %v3765_v61 = vadd.f32 %v3752_v54, %v3724_v41  ;;  %v3885_v25 = vadd.f32 %v3884_v30, %v3843_v22 }
 0x53c   : > { %v3913_v48 = vpop.f32.mrf.mxu2  ;;  %v7210_v56 = vadd.f32 %v3925_v35, %v3795_v63 }
 0x53d   : > { %v3846_v8 = vpop.f32.mrf.mxu0  ;;  %v3773_v53 = vrot.slane %v3765_v61, 7  ;;  %v3926_v43 = vadd.f32 %v3913_v48, %v3885_v25 }
 0x53f   : > { %v3778_v6 = vsel %vm1267_vm3, %v3772_v3, %v3773_v53  ;;  %v3936_v3 = vmul.f32 0.0, %v3921_v50 }
 0x540   : > { %v3788_v49 = vmul.f32 %v5696_v44, %v3778_v6 }
 0x542   : > { %v3796_v40 = vadd.f32 %v3788_v49, %v7138_v7  ;;  %v3755_v27 = vpop.f32.mrf.mxu3  ;;  %v3887_v46 = vpop.f32.mrf.mxu1  ;;  %v7253_v49 = vld [vmem:[%s7337_s10] ss:$0 sm:$0xff] }
 0x543   : > { %v3766_v47 = vadd.f32 %v3755_v27, %v3727_v33  ;;  %v3888_v12 = vadd.f32 %v3887_v46, %v3846_v8 }
 0x544   : > { %v7218_v51 = vadd.f32 %v3926_v43, %v3796_v40  ;;  %v3916_v32 = vpop.f32.mrf.mxu2 }
 0x545   : > { %v3848_v55 = vpop.f32.mrf.mxu0  ;;  %v3774_v58 = vrot.slane %v3766_v47, 7  ;;  %v3927_v7 = vadd.f32 %v3916_v32, %v3888_v12 }
 0x547   : > { %v3777_v2 = vsel %vm1267_vm3, %v3773_v53, %v3774_v58  ;;  %v7638_v53 = vld [vmem:[#allocation13_spill] sm:$0xff] }
 0x548   : > { %v3789_v44 = vmul.f32 %v5718_v39, %v3777_v2 }
 0x54a   : > { %v3797_v38 = vadd.f32 %v3789_v44, %v7151_v16  ;;  %v3757_v10 = vpop.f32.mrf.mxu3  ;;  %v3889_v37 = vpop.f32.mrf.mxu1  ;;  %v7636_v16 = vld [vmem:[#allocation12_spill] sm:$0xff] }
 0x54b   : > { %v3767_v52 = vadd.f32 %v3757_v10, %v3729_v26  ;;  %v3890_v17 = vadd.f32 %v3889_v37, %v3848_v55 }
 0x54c   : > { %v7226_v57 = vadd.f32 %v3927_v7, %v3797_v38  ;;  %v3918_v13 = vpop.f32.mrf.mxu2 }
 0x54d   : > { %v4017_v14 = vpop.f32.mrf.mxu0  ;;  %v3775_v4 = vrot.slane %v3767_v52, 7  ;;  %v3928_v41 = vadd.f32 %v3918_v13, %v3890_v17 }
 0x54f   : > { %v3776_v39 = vsel %vm1267_vm3, %v3774_v58, %v3775_v4  ;;  %v3783_v21 = vsel %vm1267_vm3, %v3775_v4, %v3768_v1  ;;  %vm7637_vm3 = vmmov %vm7633_vm0  ;;  %v4979_v58 = vld [vmem:[%s5207_s23 + $0x38] sm:$0xff]  ;;  %v4980_v4 = vld [vmem:[%s5207_s23] sm:$0xff] }
 0x550   : > { %v3791_v9 = vmul.f32 %v3783_v21, %v7636_v16  ;;  %v3790_v22 = vmul.f32 %v5737_v59, %v3776_v39  ;;  %vm7651_vm0 = vmmov %vm7644_vm6 }
 0x551   : > { %vm7652_vm13 = vmmov %vm7651_vm0 }
 0x552   : > { %v3799_v45 = vadd.f32 %v3791_v9, %v7170_v34  ;;  %v3798_v24 = vadd.f32 %v3790_v22, %v7173_v36  ;;  %v3976_v18 = vpop.f32.mrf.mxu3  ;;  %v4046_v29 = vpop.f32.mrf.mxu1  ;;  %vm7653_vm1 = vmmov %vm7651_vm0 }
 0x553   : > { %v4018_v54 = vadd.f32 %v4017_v14, %v3976_v18 }
 0x554   : > { %v3944_v63 = vadd.f32 %v3936_v3, %v3799_v45  ;;  %v7240_v35 = vadd.f32 %v3928_v41, %v3798_v24  ;;  %v4981_v24 = vld [vmem:[%s5207_s23 + $0x8] sm:$0xff] }
 0x555   : > { %v4019_v31 = vpop.f32.mrf.mxu0  ;;  %v7242_v1 = vadd.f32 %v4046_v29, %v4018_v54 }
 0x557   : > { %v4074_v34 = vrot.slane %v7242_v1, 1  ;;  %v4986_v1 = vld [vmem:[%s5207_s23 + $0x30] sm:$0xff] }
 0x55a   : > { %v3978_v30 = vpop.f32.mrf.mxu3  ;;  %v4048_v61 = vpop.f32.mrf.mxu1 }
 0x55b   : > { %v4020_v48 = vadd.f32 %v4019_v31, %v3978_v30 }
 0x55d   : > { %v4022_v59 = vpop.f32.mrf.mxu0  ;;  %v4067_v25 = vadd.f32 %v4048_v61, %v4020_v48  ;;  %v4982_v48 = vld [vmem:[%s5207_s23 + $0x10] sm:$0xff] }
 0x55f   : > { %v4075_v36 = vrot.slane %v4067_v25, 1 }
 0x561   : > { %v4088_v8 = vsel %vm7637_vm3, %v4074_v34, %v4075_v36 }
 0x562   : > { %v4097_v6 = vmul.f32 %v4088_v8, %v7638_v53  ;;  %v3981_v33 = vpop.f32.mrf.mxu3  ;;  %v4051_v40 = vpop.f32.mrf.mxu1 }
 0x563   : > { %v4023_v43 = vadd.f32 %v4022_v59, %v3981_v33 }
 0x564   : > { %v4105_v27 = vadd.f32 %v4097_v6, %v3944_v63 }
 0x565   : > { %v4024_v46 = vpop.f32.mrf.mxu0  ;;  %v4068_v47 = vadd.f32 %v4051_v40, %v4023_v43 }
 0x566   : > { %v4117_v12 = vadd.f32 %v7253_v49, %v4105_v27  ;;  %v4983_v27 = vld [vmem:[%s5207_s23 + $0x18] sm:$0xff] }
 0x567   : > { %v4076_v55 = vrot.slane %v4068_v47, 1 }
 0x568   : > { %v4125_v32 = vadd.f32 %v4979_v58, %v4117_v12 }
 0x569   : > { %v4087_v2 = vsel %vm7639_vm4, %v4075_v36, %v4076_v55 }
 0x56a   : > { %4133 = vst.msk [vmem:[%s7261_s29 + $0x38] sm:$0xff] %vm7640_vm7, %v4125_v32  ;;  %v4090_v44 = vmul.f32 %v7621_v60, %v4087_v2  ;;  %v3983_v26 = vpop.f32.mrf.mxu3  ;;  %v4053_v38 = vpop.f32.mrf.mxu1 }
 0x56b   : > { %v4025_v7 = vadd.f32 %v4024_v46, %v3983_v26 }
 0x56c   : > { %v4098_v10 = vadd.f32 %v4090_v44, %v7186_v42 }
 0x56d   : > { %v4027_v37 = vpop.f32.mrf.mxu0  ;;  %v4069_v52 = vadd.f32 %v4053_v38, %v4025_v7  ;;  %v4984_v38 = vld [vmem:[%s5207_s23 + $0x20] sm:$0xff] }
 0x56e   : > { %v4110_v17 = vadd.f32 %v7253_v49, %v4098_v10 }
 0x56f   : > { %v4077_v14 = vrot.slane %v4069_v52, 1 }
 0x570   : > { %v4118_v50 = vadd.f32 %v4980_v4, %v4110_v17 }
 0x571   : > { %v4086_v39 = vsel %vm7641_vm14, %v4076_v55, %v4077_v14 }
 0x572   : > { %4126 = vst.msk [vmem:[%s7261_s29] sm:$0xff] %vm7642_vm10, %v4118_v50  ;;  %v4091_v60 = vmul.f32 %v5895_v11, %v4086_v39  ;;  %v3986_v21 = vpop.f32.mrf.mxu3  ;;  %v4056_v13 = vpop.f32.mrf.mxu1  ;;  %v4985_v50 = vld [vmem:[%s5207_s23 + $0x28] sm:$0xff] }
 0x573   : > { %v4028_v16 = vadd.f32 %v4027_v37, %v3986_v21 }
 0x574   : > { %v4099_v42 = vadd.f32 %v4091_v60, %v7194_v5 }
 0x575   : > { %v4070_v9 = vadd.f32 %v4056_v13, %v4028_v16  ;;  %v4029_v3 = vpop.f32.mrf.mxu0 }
 0x576   : > { %v4111_v22 = vadd.f32 %v7253_v49, %v4099_v42 }
 0x577   : > { %v4078_v45 = vrot.slane %v4070_v9, 1 }
 0x578   : > { %v4119_v41 = vadd.f32 %v4981_v24, %v4111_v22 }
 0x579   : > { %v4085_v18 = vsel %vm7643_vm5, %v4077_v14, %v4078_v45 }
 0x57a   : > { %4127 = vst.msk [vmem:[%s7261_s29 + $0x8] sm:$0xff] %vm7644_vm6, %v4119_v41  ;;  %v4092_v11 = vmul.f32 %v5915_v62, %v4085_v18  ;;  %v3988_v29 = vpop.f32.mrf.mxu3  ;;  %v4058_v63 = vpop.f32.mrf.mxu1 }
 0x57b   : > { %v4030_v31 = vadd.f32 %v4029_v3, %v3988_v29 }
 0x57c   : > { %v4100_v5 = vadd.f32 %v4092_v11, %v7202_v20 }
 0x57d   : > { %v4071_v54 = vadd.f32 %v4058_v63, %v4030_v31  ;;  %v4032_v25 = vpop.f32.mrf.mxu0 }
 0x57e   : > { %v4112_v30 = vadd.f32 %v7253_v49, %v4100_v5 }
 0x57f   : > { %v4079_v61 = vrot.slane %v4071_v54, 1 }
 0x580   : > { %v4120_v59 = vadd.f32 %v4982_v48, %v4112_v30 }
 0x581   : > { %v4084_v36 = vsel %vm7645_vm8, %v4078_v45, %v4079_v61 }
 0x582   : > { %4128 = vst.msk [vmem:[%s7261_s29 + $0x10] sm:$0xff] %vm7646_vm9, %v4120_v59  ;;  %v4093_v62 = vmul.f32 %v5935_v15, %v4084_v36  ;;  %v3991_v8 = vpop.f32.mrf.mxu3  ;;  %v4061_v53 = vpop.f32.mrf.mxu1 }
 0x583   : > { %v4033_v6 = vadd.f32 %v4032_v25, %v3991_v8 }
 0x584   : > { %v4101_v20 = vadd.f32 %v4093_v62, %v7210_v56 }
 0x585   : > { %v4072_v33 = vadd.f32 %v4061_v53, %v4033_v6  ;;  %v4034_v12 = vpop.f32.mrf.mxu0 }
 0x586   : > { %v4113_v40 = vadd.f32 %v7253_v49, %v4101_v20 }
 0x587   : > { %v4080_v43 = vrot.slane %v4072_v33, 1 }
 0x588   : > { %v4121_v46 = vadd.f32 %v4983_v27, %v4113_v40 }
 0x589   : > { %v4083_v47 = vsel %vm7647_vm11, %v4079_v61, %v4080_v43 }
 0x58a   : > { %4129 = vst.msk [vmem:[%s7261_s29 + $0x18] sm:$0xff] %vm7648_vm12, %v4121_v46  ;;  %v4094_v15 = vmul.f32 %v5956_v19, %v4083_v47  ;;  %v3993_v55 = vpop.f32.mrf.mxu3  ;;  %v4063_v32 = vpop.f32.mrf.mxu1 }
 0x58b   : > { %v4035_v58 = vadd.f32 %v4034_v12, %v3993_v55 }
 0x58c   : > { %v4102_v56 = vadd.f32 %v4094_v15, %v7218_v51 }
 0x58d   : > { %v4073_v2 = vadd.f32 %v4063_v32, %v4035_v58 }
 0x58e   : > { %v4114_v44 = vadd.f32 %v7253_v49, %v4102_v56 }
 0x58f   : > { %v4081_v26 = vrot.slane %v4073_v2, 1 }
 0x590   : > { %v4122_v7 = vadd.f32 %v4984_v38, %v4114_v44 }
 0x591   : > { %v4082_v10 = vsel %vm7649_vm2, %v4080_v43, %v4081_v26  ;;  %v4089_v19 = vsel %vm7650_vm15, %v4081_v26, %v4074_v34 }
 0x592   : > { %4130 = vst.msk [vmem:[%s7261_s29 + $0x20] sm:$0xff] %vm7651_vm0, %v4122_v7  ;;  %v4095_v51 = vmul.f32 %v5976_v28, %v4082_v10  ;;  %v4096_v37 = vmul.f32 %v5994_v23, %v4089_v19 }
 0x594   : > { %v4103_v52 = vadd.f32 %v4095_v51, %v7226_v57  ;;  %v4104_v17 = vadd.f32 %v4096_v37, %v7240_v35 }
 0x596   : > { %v4115_v14 = vadd.f32 %v7253_v49, %v4103_v52  ;;  %v4116_v4 = vadd.f32 %v7253_v49, %v4104_v17 }
 0x598   : > { %v4123_v39 = vadd.f32 %v4985_v50, %v4115_v14  ;;  %v4124_v60 = vadd.f32 %v4986_v1, %v4116_v4 }
 0x59a   : > { %4131 = vst.msk [vmem:[%s7261_s29 + $0x28] sm:$0xff] %vm7652_vm13, %v4123_v39 }
 0x59b   : > { %4132 = vst.msk [vmem:[%s7261_s29 + $0x30] sm:$0xff] %vm7653_vm1, %v4124_v60 }
 0x59c PF: > { %s23_s17 = sadd.s32 1, %s5091_s17  }
 0x59d   : > { %p20_p7 = scmp.ge.s32.totalorder %s23_s17, 4  }
 0x59f   :  { %22 = sbr.rel (!%p20_p7) target bundleno = 2 (0x2), region = 139 }
 0x5a4   :  { %4155 = vsyncpa [#allocation3], 1 }
 0x5a5   :  { %4157 = vsyncpa [#allocation3 + $0x1], 1 }
 0x5a6   :  { %4158 = vsyncpa [#allocation5], 1 }

</bundles_post_ra>
